<compile_context>
chip_gen: v7x
topology: tpu7x:2x2x1
jax: 0.10.0
libtpu: 0.0.40
codegen_flags: <defaults>
</compile_context>

<pallas_src>
import functools

import jax
import jax.numpy as jnp
import numpy as np
from jax import lax
from jax.experimental import pallas as pl
from jax.experimental.pallas import tpu as pltpu


def _round_up(x, m):
    return (x + m - 1) // m * m


def _cdiv(a, b):
    return -(-a // b)


@functools.lru_cache(maxsize=None)
def _vmem_limit():
    """Generation-aware scoped-VMEM limit (~85% of physical per-core VMEM)."""
    try:
        cap = getattr(pltpu.get_tpu_info(), "vmem_capacity_bytes", None)
        if cap:
            return int(cap * 0.85)
    except Exception:
        pass
    return 48 * 1024 * 1024  # safe fallback on every generation (v7x physical = 64 MiB)


def _choose_time_blocks(T, tb, d_max, Hp, Cp, budget):
    """Largest time block tt that fits the VMEM budget; T padded to ng * tt."""
    G = 4 * Hp
    # Weight blocks (conservatively assume default double-buffering), scratch,
    # resident logits block, and live f32 gate tiles for an unroll of <= 8.
    fixed = 2 * 2 * (d_max * G + Hp * G) + 2 * 4 * G      # bf16 W_ih/W_hh + f32 bias, x2 buffers
    fixed += 2 * (2 * Hp * Cp + 4 * Cp)                   # fused-FC weights (final layer)
    fixed += tb * Hp * (2 + 4)                            # h (bf16) / c (f32) scratch
    fixed += 2 * tb * Cp * 4                              # resident logits output block
    fixed += 8 * tb * G * 4                               # live f32 gate temporaries
    per_tt = 2 * tb * (d_max + Hp) * 2                    # double-buffered bf16 x-in + h-out streams
    avail = int(budget * 0.75) - fixed
    tt_max = max(1, min(64, avail // per_tt))
    ng = _cdiv(T, tt_max)
    tt = _cdiv(T, ng)
    return tt, ng


# ---------------------------------------------------------------------------
# LSTM cell step (PyTorch gate order [i, f, g, o]).
#  - x @ W_ih fused here (no xp HBM round-trip); both matmul operands bf16,
#    f32 accumulation; gate elementwise math f32; h carried in bf16.
#  - sigmoid(x) = 0.5*tanh(0.5*x)+0.5 -> one EUP push per gate.
# ---------------------------------------------------------------------------
def _sigmoid(x):
    return 0.5 * jnp.tanh(0.5 * x) + 0.5


def _lstm_cell(x_t, w_ih_ref, w_hh_ref, bias, h, c, Hp):
    gates = (
        jnp.dot(x_t, w_ih_ref[...], preferred_element_type=jnp.float32)
        + jnp.dot(h, w_hh_ref[...], preferred_element_type=jnp.float32)
        + bias
    )
    i_g = _sigmoid(gates[:, 0 * Hp:1 * Hp])
    f_g = _sigmoid(gates[:, 1 * Hp:2 * Hp])
    g_g = jnp.tanh(gates[:, 2 * Hp:3 * Hp])
    o_g = _sigmoid(gates[:, 3 * Hp:4 * Hp])
    c_new = f_g * c + i_g * g_g
    h_new = (o_g * jnp.tanh(c_new)).astype(jnp.bfloat16)
    return h_new, c_new


# ---------------------------------------------------------------------------
# Sequence-output LSTM layer kernel.
# Grid = (batch blocks [parallel], time blocks [arbitrary]); one grid step == tt steps.
# ---------------------------------------------------------------------------
def _lstm_seq_kernel(x_ref, w_ih_ref, w_hh_ref, b_ref, out_ref, h_scr, c_scr, *, unroll):
    @pl.when(pl.program_id(1) == 0)
    def _():
        h_scr[...] = jnp.zeros_like(h_scr)
        c_scr[...] = jnp.zeros_like(c_scr)

    Hp = h_scr.shape[-1]
    TT = x_ref.shape[0]
    bias = b_ref[...]

    def step(i, carry):
        h, c = carry
        h_new, c_new = _lstm_cell(x_ref[i], w_ih_ref, w_hh_ref, bias, h, c, Hp)
        out_ref[i] = h_new
        return h_new, c_new

    h_fin, c_fin = lax.fori_loop(
        0, TT, step, (h_scr[...], c_scr[...]),
        unroll=True if unroll >= TT else unroll)
    h_scr[...] = h_fin
    c_scr[...] = c_fin


def lstm_layer_seq(x, w_ih_t, w_hh_t, b, *, tb, tt, unroll):
    """x: (Tp, Bp, Dinp) bf16 -> (Tp, Bp, Hp) bf16."""
    Tp, Bp, Dinp = x.shape
    Hp, G = w_hh_t.shape
    return pl.pallas_call(
        functools.partial(_lstm_seq_kernel, unroll=unroll),
        out_shape=jax.ShapeDtypeStruct((Tp, Bp, Hp), jnp.bfloat16),
        grid_spec=pltpu.PrefetchScalarGridSpec(
            num_scalar_prefetch=0,
            grid=(Bp // tb, Tp // tt),
            in_specs=[
                pl.BlockSpec((tt, tb, Dinp), lambda bb, t: (t, bb, 0)),
                # TODO(synk): pipeline_mode=pl.Buffered(1) on these constant-index
                # weight blocks would halve their resident VMEM (matters most for
                # large H on v7x); left default-buffered for compile safety.
                pl.BlockSpec((Dinp, G), lambda bb, t: (0, 0)),
                pl.BlockSpec((Hp, G), lambda bb, t: (0, 0)),
                pl.BlockSpec((1, G), lambda bb, t: (0, 0)),
            ],
            out_specs=pl.BlockSpec((tt, tb, Hp), lambda bb, t: (t, bb, 0)),
            scratch_shapes=[
                pltpu.VMEM((tb, Hp), jnp.bfloat16),   # h carried in bf16
                pltpu.VMEM((tb, Hp), jnp.float32),    # c in f32
            ],
        ),
        compiler_params=pltpu.CompilerParams(
            dimension_semantics=("parallel", "arbitrary"),
            vmem_limit_bytes=_vmem_limit(),
        ),
    )(x, w_ih_t, w_hh_t, b)


# ---------------------------------------------------------------------------
# Final LSTM layer kernel with fused FC: only (Bp, Cp) logits go to HBM.
# Padded timesteps (t >= t_valid) are masked so h_fin == h at the true last step.
# ---------------------------------------------------------------------------
def _lstm_final_kernel(x_ref, w_ih_ref, w_hh_ref, b_ref, w_fc_ref, b_fc_ref,
                       out_ref, h_scr, c_scr, *, unroll, t_valid, masked):
    tb_id = pl.program_id(1)

    @pl.when(tb_id == 0)
    def _():
        h_scr[...] = jnp.zeros_like(h_scr)
        c_scr[...] = jnp.zeros_like(c_scr)

    Hp = h_scr.shape[-1]
    TT = x_ref.shape[0]
    bias = b_ref[...]
    t0 = tb_id * TT

    def step(i, carry):
        h, c = carry
        h_new, c_new = _lstm_cell(x_ref[i], w_ih_ref, w_hh_ref, bias, h, c, Hp)
        if masked:  # static: only when the time axis was padded
            valid = (t0 + i) < t_valid
            h_new = jnp.where(valid, h_new, h)
            c_new = jnp.where(valid, c_new, c)
        return h_new, c_new

    h_fin, c_fin = lax.fori_loop(
        0, TT, step, (h_scr[...], c_scr[...]),
        unroll=True if unroll >= TT else unroll)
    h_scr[...] = h_fin
    c_scr[...] = c_fin

    @pl.when(tb_id == pl.num_programs(1) - 1)
    def _():
        out_ref[...] = (
            jnp.dot(h_fin, w_fc_ref[...], preferred_element_type=jnp.float32)
            + b_fc_ref[...]
        )


def lstm_layer_final(x, w_ih_t, w_hh_t, b, w_fc_t, b_fc, *, tb, tt, unroll, t_valid):
    """x: (Tp, Bp, Dinp) bf16 -> logits (Bp, Cp) f32 (FC fused at last valid step)."""
    Tp, Bp, Dinp = x.shape
    Hp, G = w_hh_t.shape
    Cp = w_fc_t.shape[1]
    # TODO(synk): for very large Cp (> ~512) drop the fused FC and emit h_fin +
    # a separate tiny GEMM so W_fc does not sit resident in VMEM every time block.
    kern = functools.partial(_lstm_final_kernel, unroll=unroll,
                             t_valid=t_valid, masked=(Tp != t_valid))
    return pl.pallas_call(
        kern,
        out_shape=jax.ShapeDtypeStruct((Bp, Cp), jnp.float32),
        grid_spec=pltpu.PrefetchScalarGridSpec(
            num_scalar_prefetch=0,
            grid=(Bp // tb, Tp // tt),
            in_specs=[
                pl.BlockSpec((tt, tb, Dinp), lambda bb, t: (t, bb, 0)),
                pl.BlockSpec((Dinp, G), lambda bb, t: (0, 0)),
                pl.BlockSpec((Hp, G), lambda bb, t: (0, 0)),
                pl.BlockSpec((1, G), lambda bb, t: (0, 0)),
                pl.BlockSpec((Hp, Cp), lambda bb, t: (0, 0)),
                pl.BlockSpec((1, Cp), lambda bb, t: (0, 0)),
            ],
            out_specs=pl.BlockSpec((tb, Cp), lambda bb, t: (bb, 0)),
            scratch_shapes=[
                pltpu.VMEM((tb, Hp), jnp.bfloat16),
                pltpu.VMEM((tb, Hp), jnp.float32),
            ],
        ),
        compiler_params=pltpu.CompilerParams(
            dimension_semantics=("parallel", "arbitrary"),
            vmem_limit_bytes=_vmem_limit(),
        ),
    )(x, w_ih_t, w_hh_t, b, w_fc_t, b_fc)


# ---------------------------------------------------------------------------
# Full forward: multi-layer LSTM (h0 = c0 = 0) + Linear on the last timestep.
# ---------------------------------------------------------------------------
@functools.partial(jax.jit, static_argnames=("num_layers", "num_classes"))
def rnn_forward(x_btd, kparams, num_layers, num_classes):
    B, T, Din_in = x_btd.shape
    Dinp0 = kparams["lstm_0"][0].shape[0]
    Hp = kparams["lstm_0"][1].shape[0]
    Cp = kparams["fc"][0].shape[1]

    # Batch padding / batch block: 2 blocks when Bp >= 16 -> both v7x TensorCores.
    if B > 8:
        Bp = _round_up(B, 16)
        tb = Bp // 2
    else:
        Bp = 8
        tb = 8

    # VMEM-budget-driven time blocking; T padded to ng * tt (masked in final layer).
    tt, ng = _choose_time_blocks(T, tb, max(Dinp0, Hp), Hp, Cp, _vmem_limit())
    Tp = tt * ng
    unroll = min(tt, 8)

    # (B, T, D) -> (Tp, Bp, Dinp0) bf16; padded batch rows are sliced off at the end.
    x = jnp.transpose(x_btd, (1, 0, 2)).astype(jnp.bfloat16)
    x = jnp.pad(x, ((0, Tp - T), (0, Bp - B), (0, Dinp0 - Din_in)))

    cur = x
    logits_p = None
    for layer in range(num_layers):
        w_ih_t, w_hh_t, b = kparams[f"lstm_{layer}"]
        if layer < num_layers - 1:
            cur = lstm_layer_seq(cur, w_ih_t, w_hh_t, b, tb=tb, tt=tt, unroll=unroll)
        else:
            w_fc_t, b_fc = kparams["fc"]
            logits_p = lstm_layer_final(cur, w_ih_t, w_hh_t, b, w_fc_t, b_fc,
                                        tb=tb, tt=tt, unroll=unroll, t_valid=T)
    return logits_p[:B, :num_classes]


# ---------------------------------------------------------------------------
# Parameters: raw PyTorch-equivalent f32 params + padded/bf16 kernel params.
# ---------------------------------------------------------------------------
def init_params(key, input_size, hidden_size, num_layers, num_classes):
    raw = {}
    bound = 1.0 / np.sqrt(hidden_size)
    for layer in range(num_layers):
        din = input_size if layer == 0 else hidden_size
        key, k1, k2, k3, k4 = jax.random.split(key, 5)
        w_ih = jax.random.uniform(k1, (4 * hidden_size, din), jnp.float32, -bound, bound)
        w_hh = jax.random.uniform(k2, (4 * hidden_size, hidden_size), jnp.float32, -bound, bound)
        b_ih = jax.random.uniform(k3, (4 * hidden_size,), jnp.float32, -bound, bound)
        b_hh = jax.random.uniform(k4, (4 * hidden_size,), jnp.float32, -bound, bound)
        raw[f"lstm_{layer}"] = (w_ih, w_hh, b_ih, b_hh)
    key, k5, k6 = jax.random.split(key, 3)
    w_fc = jax.random.uniform(k5, (num_classes, hidden_size), jnp.float32, -bound, bound)
    b_fc = jax.random.uniform(k6, (num_classes,), jnp.float32, -bound, bound)
    raw["fc"] = (w_fc, b_fc)
    return raw


def _pad_gate_cols(w_t, H, Hp):
    """(K, 4H) with [i|f|g|o] blocks -> (K, 4Hp), each gate block zero-padded."""
    K = w_t.shape[0]
    return jnp.pad(w_t.reshape(K, 4, H), ((0, 0), (0, 0), (0, Hp - H))).reshape(K, 4 * Hp)


def prepare_kernel_params(raw, input_size, hidden_size, num_layers, num_classes):
    """Pre-transpose, fuse biases, pad to lane-dense (8,128)-aligned shapes,
    downcast matmul operands to bf16 (biases stay f32). Zero padding keeps
    padded hidden lanes exactly zero through the recurrence."""
    H = hidden_size
    Hp = _round_up(H, 128)
    Dp0 = _round_up(input_size, 128)
    Cp = _round_up(num_classes, 128)
    kp = {}
    for layer in range(num_layers):
        w_ih, w_hh, b_ih, b_hh = raw[f"lstm_{layer}"]
        din = input_size if layer == 0 else H
        dinp = Dp0 if layer == 0 else Hp
        w_ih_t = _pad_gate_cols(w_ih.T, H, Hp)                      # (din, 4Hp)
        w_ih_t = jnp.pad(w_ih_t, ((0, dinp - din), (0, 0)))         # (dinp, 4Hp)
        w_hh_t = _pad_gate_cols(w_hh.T, H, Hp)
        w_hh_t = jnp.pad(w_hh_t, ((0, Hp - H), (0, 0)))             # (Hp, 4Hp)
        b = _pad_gate_cols((b_ih + b_hh)[None, :], H, Hp)           # (1, 4Hp)
        kp[f"lstm_{layer}"] = (
            w_ih_t.astype(jnp.bfloat16),
            w_hh_t.astype(jnp.bfloat16),
            b.astype(jnp.float32),
        )
    w_fc, b_fc = raw["fc"]
    w_fc_t = jnp.pad(w_fc.T, ((0, Hp - H), (0, Cp - num_classes)))  # (Hp, Cp)
    b_fc_p = jnp.pad(b_fc, (0, Cp - num_classes))[None, :]          # (1, Cp)
    kp["fc"] = (w_fc_t.astype(jnp.bfloat16), b_fc_p.astype(jnp.float32))
    return kp


# ---------------------------------------------------------------------------
# Pure-JAX f32 reference (PyTorch nn.LSTM semantics) for a silent check.
# ---------------------------------------------------------------------------
def rnn_forward_ref(x_btd, raw, num_layers, hidden_size):
    B, T, _ = x_btd.shape
    H = hidden_size
    x = x_btd.astype(jnp.float32)
    for layer in range(num_layers):
        w_ih, w_hh, b_ih, b_hh = raw[f"lstm_{layer}"]
        h = jnp.zeros((B, H), jnp.float32)
        c = jnp.zeros((B, H), jnp.float32)
        outs = []
        for t in range(T):
            gates = x[:, t, :] @ w_ih.T + h @ w_hh.T + b_ih + b_hh
            i = jax.nn.sigmoid(gates[:, 0 * H:1 * H])
            f = jax.nn.sigmoid(gates[:, 1 * H:2 * H])
            g = jnp.tanh(gates[:, 2 * H:3 * H])
            o = jax.nn.sigmoid(gates[:, 3 * H:4 * H])
            c = f * c + i * g
            h = o * jnp.tanh(c)
            outs.append(h)
        x = jnp.stack(outs, axis=1)
    w_fc, b_fc = raw["fc"]
    return x[:, -1, :] @ w_fc.T + b_fc


if __name__ == "__main__":
    B, T = 2, 8
    input_size, hidden_size, num_layers, num_classes = 16, 32, 2, 5

    key = jax.random.PRNGKey(0)
    key, kx = jax.random.split(key)
    x = jax.random.normal(kx, (B, T, input_size), jnp.float32)

    raw = init_params(key, input_size, hidden_size, num_layers, num_classes)
    kparams = prepare_kernel_params(raw, input_size, hidden_size, num_layers, num_classes)

    out = rnn_forward(x, kparams, num_layers, num_classes)
    out = jax.block_until_ready(out)

    ref = rnn_forward_ref(x, raw, num_layers, hidden_size)
    np.testing.assert_allclose(np.asarray(out), np.asarray(ref), rtol=2e-2, atol=2e-2)

    assert out.shape == (B, num_classes)
    print("KERNEL_OK")
</pallas_src>

<mosaic_0001>
module attributes {stable_mosaic.version = 11 : i64} {
  func.func @_lstm_seq_kernel(%arg0: i32, %arg1: i32, %arg2: memref<8x8x128xbf16, #tpu.memory_space<vmem>>, %arg3: memref<128x512xbf16, #tpu.memory_space<vmem>>, %arg4: memref<128x512xbf16, #tpu.memory_space<vmem>>, %arg5: memref<1x512xf32, #tpu.memory_space<vmem>>, %arg6: memref<8x8x128xbf16, #tpu.memory_space<vmem>>, %arg7: memref<8x128xbf16, #tpu.memory_space<vmem>>, %arg8: memref<8x128xf32, #tpu.memory_space<vmem>>) attributes {dimension_semantics = [#tpu.dimension_semantics<parallel>, #tpu.dimension_semantics<arbitrary>], iteration_bounds = array<i64: 1, 1>, scalar_prefetch = 0 : i64, scratch_operands = 2 : i64, tpu.core_type = #tpu.core_type<tc>, window_params = [{transform_indices = @transform_0, window_bounds = array<i64: 8, 8, 128>}, {pipeline_mode = #tpu.pipeline_mode<synchronous>, transform_indices = @transform_1, window_bounds = array<i64: 128, 512>}, {pipeline_mode = #tpu.pipeline_mode<synchronous>, transform_indices = @transform_2, window_bounds = array<i64: 128, 512>}, {pipeline_mode = #tpu.pipeline_mode<synchronous>, transform_indices = @transform_3, window_bounds = array<i64: 1, 512>}, {transform_indices = @transform_4, window_bounds = array<i64: 8, 8, 128>}]} {
    %c0_i32 = arith.constant 0 : i32
    %0 = arith.cmpi eq, %arg1, %c0_i32 : i32
    %1 = arith.extui %0 : i1 to i32
    %c0_i32_0 = arith.constant 0 : i32
    %2 = arith.cmpi ne, %1, %c0_i32_0 : i32
    scf.if %2 {
      %cst_162 = arith.constant 0.000000e+00 : bf16
      %376 = vector.broadcast %cst_162 : bf16 to vector<8x128xbf16>
      %c0_163 = arith.constant 0 : index
      %c0_164 = arith.constant 0 : index
      %377 = vector.load %arg7[%c0_163, %c0_164] : memref<8x128xbf16, #tpu.memory_space<vmem>>, vector<8x128xbf16>
      tpu.vector_store %arg7[%c0_163, %c0_164], %376 {strides = array<i32>} : memref<8x128xbf16, #tpu.memory_space<vmem>>, vector<8x128xbf16>,
      %cst_165 = arith.constant 0.000000e+00 : f32
      %378 = vector.broadcast %cst_165 : f32 to vector<8x128xf32>
      %c0_166 = arith.constant 0 : index
      %c0_167 = arith.constant 0 : index
      %379 = vector.load %arg8[%c0_166, %c0_167] : memref<8x128xf32, #tpu.memory_space<vmem>>, vector<8x128xf32>
      tpu.vector_store %arg8[%c0_166, %c0_167], %378 {strides = array<i32>} : memref<8x128xf32, #tpu.memory_space<vmem>>, vector<8x128xf32>,
    } else {
    }
    %c0 = arith.constant 0 : index
    %c0_1 = arith.constant 0 : index
    %3 = vector.load %arg5[%c0, %c0_1] : memref<1x512xf32, #tpu.memory_space<vmem>>, vector<1x512xf32>
    %c0_2 = arith.constant 0 : index
    %c0_3 = arith.constant 0 : index
    %4 = vector.load %arg7[%c0_2, %c0_3] : memref<8x128xbf16, #tpu.memory_space<vmem>>, vector<8x128xbf16>
    %c0_4 = arith.constant 0 : index
    %c0_5 = arith.constant 0 : index
    %5 = vector.load %arg8[%c0_4, %c0_5] : memref<8x128xf32, #tpu.memory_space<vmem>>, vector<8x128xf32>
    %c0_i32_6 = arith.constant 0 : i32
    %6 = arith.index_cast %c0_i32_6 : i32 to index
    %c0_7 = arith.constant 0 : index
    %c0_8 = arith.constant 0 : index
    %7 = vector.load %arg2[%6, %c0_7, %c0_8] : memref<8x8x128xbf16, #tpu.memory_space<vmem>>, vector<1x8x128xbf16>
    %8 = vector.shape_cast %7 : vector<1x8x128xbf16> to vector<8x128xbf16>
    %c0_9 = arith.constant 0 : index
    %c0_10 = arith.constant 0 : index
    %9 = vector.load %arg3[%c0_9, %c0_10] : memref<128x512xbf16, #tpu.memory_space<vmem>>, vector<128x512xbf16>
    %cst = arith.constant dense<0.000000e+00> : vector<8x512xf32>
    %10 = tpu.matmul %8, %9, %cst {dimension_numbers = #tpu.dot_dimension_numbers<[1], [0], [0], [1], [0, 0, 1, 1], [], []>} : vector<8x128xbf16>, vector<128x512xbf16>, vector<8x512xf32> -> vector<8x512xf32>
    %c0_11 = arith.constant 0 : index
    %c0_12 = arith.constant 0 : index
    %11 = vector.load %arg4[%c0_11, %c0_12] : memref<128x512xbf16, #tpu.memory_space<vmem>>, vector<128x512xbf16>
    %cst_13 = arith.constant dense<0.000000e+00> : vector<8x512xf32>
    %12 = tpu.matmul %4, %11, %cst_13 {dimension_numbers = #tpu.dot_dimension_numbers<[1], [0], [0], [1], [0, 0, 1, 1], [], []>} : vector<8x128xbf16>, vector<128x512xbf16>, vector<8x512xf32> -> vector<8x512xf32>
    %13 = arith.addf %10, %12 : vector<8x512xf32>
    %14 = vector.broadcast %3 : vector<1x512xf32> to vector<8x512xf32>
    %15 = arith.addf %13, %14 : vector<8x512xf32>
    %16 = vector.extract_strided_slice %15 {offsets = [0, 0], sizes = [8, 128], strides = [1, 1]} : vector<8x512xf32> to vector<8x128xf32>
    %cst_14 = arith.constant 5.000000e-01 : f32
    %17 = vector.broadcast %cst_14 : f32 to vector<8x128xf32>
    %18 = arith.mulf %17, %16 : vector<8x128xf32>
    %19 = math.tanh %18 : vector<8x128xf32>
    %cst_15 = arith.constant 5.000000e-01 : f32
    %20 = vector.broadcast %cst_15 : f32 to vector<8x128xf32>
    %21 = arith.mulf %20, %19 : vector<8x128xf32>
    %cst_16 = arith.constant 5.000000e-01 : f32
    %22 = vector.broadcast %cst_16 : f32 to vector<8x128xf32>
    %23 = arith.addf %21, %22 : vector<8x128xf32>
    %24 = vector.extract_strided_slice %15 {offsets = [0, 128], sizes = [8, 128], strides = [1, 1]} : vector<8x512xf32> to vector<8x128xf32>
    %cst_17 = arith.constant 5.000000e-01 : f32
    %25 = vector.broadcast %cst_17 : f32 to vector<8x128xf32>
    %26 = arith.mulf %25, %24 : vector<8x128xf32>
    %27 = math.tanh %26 : vector<8x128xf32>
    %cst_18 = arith.constant 5.000000e-01 : f32
    %28 = vector.broadcast %cst_18 : f32 to vector<8x128xf32>
    %29 = arith.mulf %28, %27 : vector<8x128xf32>
    %cst_19 = arith.constant 5.000000e-01 : f32
    %30 = vector.broadcast %cst_19 : f32 to vector<8x128xf32>
    %31 = arith.addf %29, %30 : vector<8x128xf32>
    %32 = vector.extract_strided_slice %15 {offsets = [0, 256], sizes = [8, 128], strides = [1, 1]} : vector<8x512xf32> to vector<8x128xf32>
    %33 = math.tanh %32 : vector<8x128xf32>
    %34 = vector.extract_strided_slice %15 {offsets = [0, 384], sizes = [8, 128], strides = [1, 1]} : vector<8x512xf32> to vector<8x128xf32>
    %cst_20 = arith.constant 5.000000e-01 : f32
    %35 = vector.broadcast %cst_20 : f32 to vector<8x128xf32>
    %36 = arith.mulf %35, %34 : vector<8x128xf32>
    %37 = math.tanh %36 : vector<8x128xf32>
    %cst_21 = arith.constant 5.000000e-01 : f32
    %38 = vector.broadcast %cst_21 : f32 to vector<8x128xf32>
    %39 = arith.mulf %38, %37 : vector<8x128xf32>
    %cst_22 = arith.constant 5.000000e-01 : f32
    %40 = vector.broadcast %cst_22 : f32 to vector<8x128xf32>
    %41 = arith.addf %39, %40 : vector<8x128xf32>
    %42 = arith.mulf %31, %5 : vector<8x128xf32>
    %43 = arith.mulf %23, %33 : vector<8x128xf32>
    %44 = arith.addf %42, %43 : vector<8x128xf32>
    %45 = math.tanh %44 : vector<8x128xf32>
    %46 = arith.mulf %41, %45 : vector<8x128xf32>
    %47 = arith.truncf %46 : vector<8x128xf32> to vector<8x128xbf16>
    %48 = arith.index_cast %c0_i32_6 : i32 to index
    %c0_23 = arith.constant 0 : index
    %c0_24 = arith.constant 0 : index
    %49 = vector.load %arg6[%48, %c0_23, %c0_24] : memref<8x8x128xbf16, #tpu.memory_space<vmem>>, vector<1x8x128xbf16>
    %50 = vector.shape_cast %49 : vector<1x8x128xbf16> to vector<8x128xbf16>
    %51 = vector.shape_cast %47 : vector<8x128xbf16> to vector<1x8x128xbf16>
    tpu.vector_store %arg6[%48, %c0_23, %c0_24], %51 {strides = array<i32>} : memref<8x8x128xbf16, #tpu.memory_space<vmem>>, vector<1x8x128xbf16>,
    %c1_i32 = arith.constant 1 : i32
    %52 = arith.index_cast %c1_i32 : i32 to index
    %c0_25 = arith.constant 0 : index
    %c0_26 = arith.constant 0 : index
    %53 = vector.load %arg2[%52, %c0_25, %c0_26] : memref<8x8x128xbf16, #tpu.memory_space<vmem>>, vector<1x8x128xbf16>
    %54 = vector.shape_cast %53 : vector<1x8x128xbf16> to vector<8x128xbf16>
    %c0_27 = arith.constant 0 : index
    %c0_28 = arith.constant 0 : index
    %55 = vector.load %arg3[%c0_27, %c0_28] : memref<128x512xbf16, #tpu.memory_space<vmem>>, vector<128x512xbf16>
    %cst_29 = arith.constant dense<0.000000e+00> : vector<8x512xf32>
    %56 = tpu.matmul %54, %55, %cst_29 {dimension_numbers = #tpu.dot_dimension_numbers<[1], [0], [0], [1], [0, 0, 1, 1], [], []>} : vector<8x128xbf16>, vector<128x512xbf16>, vector<8x512xf32> -> vector<8x512xf32>
    %c0_30 = arith.constant 0 : index
    %c0_31 = arith.constant 0 : index
    %57 = vector.load %arg4[%c0_30, %c0_31] : memref<128x512xbf16, #tpu.memory_space<vmem>>, vector<128x512xbf16>
    %cst_32 = arith.constant dense<0.000000e+00> : vector<8x512xf32>
    %58 = tpu.matmul %47, %57, %cst_32 {dimension_numbers = #tpu.dot_dimension_numbers<[1], [0], [0], [1], [0, 0, 1, 1], [], []>} : vector<8x128xbf16>, vector<128x512xbf16>, vector<8x512xf32> -> vector<8x512xf32>
    %59 = arith.addf %56, %58 : vector<8x512xf32>
    %60 = vector.broadcast %3 : vector<1x512xf32> to vector<8x512xf32>
    %61 = arith.addf %59, %60 : vector<8x512xf32>
    %62 = vector.extract_strided_slice %61 {offsets = [0, 0], sizes = [8, 128], strides = [1, 1]} : vector<8x512xf32> to vector<8x128xf32>
    %cst_33 = arith.constant 5.000000e-01 : f32
    %63 = vector.broadcast %cst_33 : f32 to vector<8x128xf32>
    %64 = arith.mulf %63, %62 : vector<8x128xf32>
    %65 = math.tanh %64 : vector<8x128xf32>
    %cst_34 = arith.constant 5.000000e-01 : f32
    %66 = vector.broadcast %cst_34 : f32 to vector<8x128xf32>
    %67 = arith.mulf %66, %65 : vector<8x128xf32>
    %cst_35 = arith.constant 5.000000e-01 : f32
    %68 = vector.broadcast %cst_35 : f32 to vector<8x128xf32>
    %69 = arith.addf %67, %68 : vector<8x128xf32>
    %70 = vector.extract_strided_slice %61 {offsets = [0, 128], sizes = [8, 128], strides = [1, 1]} : vector<8x512xf32> to vector<8x128xf32>
    %cst_36 = arith.constant 5.000000e-01 : f32
    %71 = vector.broadcast %cst_36 : f32 to vector<8x128xf32>
    %72 = arith.mulf %71, %70 : vector<8x128xf32>
    %73 = math.tanh %72 : vector<8x128xf32>
    %cst_37 = arith.constant 5.000000e-01 : f32
    %74 = vector.broadcast %cst_37 : f32 to vector<8x128xf32>
    %75 = arith.mulf %74, %73 : vector<8x128xf32>
    %cst_38 = arith.constant 5.000000e-01 : f32
    %76 = vector.broadcast %cst_38 : f32 to vector<8x128xf32>
    %77 = arith.addf %75, %76 : vector<8x128xf32>
    %78 = vector.extract_strided_slice %61 {offsets = [0, 256], sizes = [8, 128], strides = [1, 1]} : vector<8x512xf32> to vector<8x128xf32>
    %79 = math.tanh %78 : vector<8x128xf32>
    %80 = vector.extract_strided_slice %61 {offsets = [0, 384], sizes = [8, 128], strides = [1, 1]} : vector<8x512xf32> to vector<8x128xf32>
    %cst_39 = arith.constant 5.000000e-01 : f32
    %81 = vector.broadcast %cst_39 : f32 to vector<8x128xf32>
    %82 = arith.mulf %81, %80 : vector<8x128xf32>
    %83 = math.tanh %82 : vector<8x128xf32>
    %cst_40 = arith.constant 5.000000e-01 : f32
    %84 = vector.broadcast %cst_40 : f32 to vector<8x128xf32>
    %85 = arith.mulf %84, %83 : vector<8x128xf32>
    %cst_41 = arith.constant 5.000000e-01 : f32
    %86 = vector.broadcast %cst_41 : f32 to vector<8x128xf32>
    %87 = arith.addf %85, %86 : vector<8x128xf32>
    %88 = arith.mulf %77, %44 : vector<8x128xf32>
    %89 = arith.mulf %69, %79 : vector<8x128xf32>
    %90 = arith.addf %88, %89 : vector<8x128xf32>
    %91 = math.tanh %90 : vector<8x128xf32>
    %92 = arith.mulf %87, %91 : vector<8x128xf32>
    %93 = arith.truncf %92 : vector<8x128xf32> to vector<8x128xbf16>
    %94 = arith.index_cast %c1_i32 : i32 to index
    %c0_42 = arith.constant 0 : index
    %c0_43 = arith.constant 0 : index
    %95 = vector.load %arg6[%94, %c0_42, %c0_43] : memref<8x8x128xbf16, #tpu.memory_space<vmem>>, vector<1x8x128xbf16>
    %96 = vector.shape_cast %95 : vector<1x8x128xbf16> to vector<8x128xbf16>
    %97 = vector.shape_cast %93 : vector<8x128xbf16> to vector<1x8x128xbf16>
    tpu.vector_store %arg6[%94, %c0_42, %c0_43], %97 {strides = array<i32>} : memref<8x8x128xbf16, #tpu.memory_space<vmem>>, vector<1x8x128xbf16>,
    %c2_i32 = arith.constant 2 : i32
    %98 = arith.index_cast %c2_i32 : i32 to index
    %c0_44 = arith.constant 0 : index
    %c0_45 = arith.constant 0 : index
    %99 = vector.load %arg2[%98, %c0_44, %c0_45] : memref<8x8x128xbf16, #tpu.memory_space<vmem>>, vector<1x8x128xbf16>
    %100 = vector.shape_cast %99 : vector<1x8x128xbf16> to vector<8x128xbf16>
    %c0_46 = arith.constant 0 : index
    %c0_47 = arith.constant 0 : index
    %101 = vector.load %arg3[%c0_46, %c0_47] : memref<128x512xbf16, #tpu.memory_space<vmem>>, vector<128x512xbf16>
    %cst_48 = arith.constant dense<0.000000e+00> : vector<8x512xf32>
    %102 = tpu.matmul %100, %101, %cst_48 {dimension_numbers = #tpu.dot_dimension_numbers<[1], [0], [0], [1], [0, 0, 1, 1], [], []>} : vector<8x128xbf16>, vector<128x512xbf16>, vector<8x512xf32> -> vector<8x512xf32>
    %c0_49 = arith.constant 0 : index
    %c0_50 = arith.constant 0 : index
    %103 = vector.load %arg4[%c0_49, %c0_50] : memref<128x512xbf16, #tpu.memory_space<vmem>>, vector<128x512xbf16>
    %cst_51 = arith.constant dense<0.000000e+00> : vector<8x512xf32>
    %104 = tpu.matmul %93, %103, %cst_51 {dimension_numbers = #tpu.dot_dimension_numbers<[1], [0], [0], [1], [0, 0, 1, 1], [], []>} : vector<8x128xbf16>, vector<128x512xbf16>, vector<8x512xf32> -> vector<8x512xf32>
    %105 = arith.addf %102, %104 : vector<8x512xf32>
    %106 = vector.broadcast %3 : vector<1x512xf32> to vector<8x512xf32>
    %107 = arith.addf %105, %106 : vector<8x512xf32>
    %108 = vector.extract_strided_slice %107 {offsets = [0, 0], sizes = [8, 128], strides = [1, 1]} : vector<8x512xf32> to vector<8x128xf32>
    %cst_52 = arith.constant 5.000000e-01 : f32
    %109 = vector.broadcast %cst_52 : f32 to vector<8x128xf32>
    %110 = arith.mulf %109, %108 : vector<8x128xf32>
    %111 = math.tanh %110 : vector<8x128xf32>
    %cst_53 = arith.constant 5.000000e-01 : f32
    %112 = vector.broadcast %cst_53 : f32 to vector<8x128xf32>
    %113 = arith.mulf %112, %111 : vector<8x128xf32>
    %cst_54 = arith.constant 5.000000e-01 : f32
    %114 = vector.broadcast %cst_54 : f32 to vector<8x128xf32>
    %115 = arith.addf %113, %114 : vector<8x128xf32>
    %116 = vector.extract_strided_slice %107 {offsets = [0, 128], sizes = [8, 128], strides = [1, 1]} : vector<8x512xf32> to vector<8x128xf32>
    %cst_55 = arith.constant 5.000000e-01 : f32
    %117 = vector.broadcast %cst_55 : f32 to vector<8x128xf32>
    %118 = arith.mulf %117, %116 : vector<8x128xf32>
    %119 = math.tanh %118 : vector<8x128xf32>
    %cst_56 = arith.constant 5.000000e-01 : f32
    %120 = vector.broadcast %cst_56 : f32 to vector<8x128xf32>
    %121 = arith.mulf %120, %119 : vector<8x128xf32>
    %cst_57 = arith.constant 5.000000e-01 : f32
    %122 = vector.broadcast %cst_57 : f32 to vector<8x128xf32>
    %123 = arith.addf %121, %122 : vector<8x128xf32>
    %124 = vector.extract_strided_slice %107 {offsets = [0, 256], sizes = [8, 128], strides = [1, 1]} : vector<8x512xf32> to vector<8x128xf32>
    %125 = math.tanh %124 : vector<8x128xf32>
    %126 = vector.extract_strided_slice %107 {offsets = [0, 384], sizes = [8, 128], strides = [1, 1]} : vector<8x512xf32> to vector<8x128xf32>
    %cst_58 = arith.constant 5.000000e-01 : f32
    %127 = vector.broadcast %cst_58 : f32 to vector<8x128xf32>
    %128 = arith.mulf %127, %126 : vector<8x128xf32>
    %129 = math.tanh %128 : vector<8x128xf32>
    %cst_59 = arith.constant 5.000000e-01 : f32
    %130 = vector.broadcast %cst_59 : f32 to vector<8x128xf32>
    %131 = arith.mulf %130, %129 : vector<8x128xf32>
    %cst_60 = arith.constant 5.000000e-01 : f32
    %132 = vector.broadcast %cst_60 : f32 to vector<8x128xf32>
    %133 = arith.addf %131, %132 : vector<8x128xf32>
    %134 = arith.mulf %123, %90 : vector<8x128xf32>
    %135 = arith.mulf %115, %125 : vector<8x128xf32>
    %136 = arith.addf %134, %135 : vector<8x128xf32>
    %137 = math.tanh %136 : vector<8x128xf32>
    %138 = arith.mulf %133, %137 : vector<8x128xf32>
    %139 = arith.truncf %138 : vector<8x128xf32> to vector<8x128xbf16>
    %140 = arith.index_cast %c2_i32 : i32 to index
    %c0_61 = arith.constant 0 : index
    %c0_62 = arith.constant 0 : index
    %141 = vector.load %arg6[%140, %c0_61, %c0_62] : memref<8x8x128xbf16, #tpu.memory_space<vmem>>, vector<1x8x128xbf16>
    %142 = vector.shape_cast %141 : vector<1x8x128xbf16> to vector<8x128xbf16>
    %143 = vector.shape_cast %139 : vector<8x128xbf16> to vector<1x8x128xbf16>
    tpu.vector_store %arg6[%140, %c0_61, %c0_62], %143 {strides = array<i32>} : memref<8x8x128xbf16, #tpu.memory_space<vmem>>, vector<1x8x128xbf16>,
    %c3_i32 = arith.constant 3 : i32
    %144 = arith.index_cast %c3_i32 : i32 to index
    %c0_63 = arith.constant 0 : index
    %c0_64 = arith.constant 0 : index
    %145 = vector.load %arg2[%144, %c0_63, %c0_64] : memref<8x8x128xbf16, #tpu.memory_space<vmem>>, vector<1x8x128xbf16>
    %146 = vector.shape_cast %145 : vector<1x8x128xbf16> to vector<8x128xbf16>
    %c0_65 = arith.constant 0 : index
    %c0_66 = arith.constant 0 : index
    %147 = vector.load %arg3[%c0_65, %c0_66] : memref<128x512xbf16, #tpu.memory_space<vmem>>, vector<128x512xbf16>
    %cst_67 = arith.constant dense<0.000000e+00> : vector<8x512xf32>
    %148 = tpu.matmul %146, %147, %cst_67 {dimension_numbers = #tpu.dot_dimension_numbers<[1], [0], [0], [1], [0, 0, 1, 1], [], []>} : vector<8x128xbf16>, vector<128x512xbf16>, vector<8x512xf32> -> vector<8x512xf32>
    %c0_68 = arith.constant 0 : index
    %c0_69 = arith.constant 0 : index
    %149 = vector.load %arg4[%c0_68, %c0_69] : memref<128x512xbf16, #tpu.memory_space<vmem>>, vector<128x512xbf16>
    %cst_70 = arith.constant dense<0.000000e+00> : vector<8x512xf32>
    %150 = tpu.matmul %139, %149, %cst_70 {dimension_numbers = #tpu.dot_dimension_numbers<[1], [0], [0], [1], [0, 0, 1, 1], [], []>} : vector<8x128xbf16>, vector<128x512xbf16>, vector<8x512xf32> -> vector<8x512xf32>
    %151 = arith.addf %148, %150 : vector<8x512xf32>
    %152 = vector.broadcast %3 : vector<1x512xf32> to vector<8x512xf32>
    %153 = arith.addf %151, %152 : vector<8x512xf32>
    %154 = vector.extract_strided_slice %153 {offsets = [0, 0], sizes = [8, 128], strides = [1, 1]} : vector<8x512xf32> to vector<8x128xf32>
    %cst_71 = arith.constant 5.000000e-01 : f32
    %155 = vector.broadcast %cst_71 : f32 to vector<8x128xf32>
    %156 = arith.mulf %155, %154 : vector<8x128xf32>
    %157 = math.tanh %156 : vector<8x128xf32>
    %cst_72 = arith.constant 5.000000e-01 : f32
    %158 = vector.broadcast %cst_72 : f32 to vector<8x128xf32>
    %159 = arith.mulf %158, %157 : vector<8x128xf32>
    %cst_73 = arith.constant 5.000000e-01 : f32
    %160 = vector.broadcast %cst_73 : f32 to vector<8x128xf32>
    %161 = arith.addf %159, %160 : vector<8x128xf32>
    %162 = vector.extract_strided_slice %153 {offsets = [0, 128], sizes = [8, 128], strides = [1, 1]} : vector<8x512xf32> to vector<8x128xf32>
    %cst_74 = arith.constant 5.000000e-01 : f32
    %163 = vector.broadcast %cst_74 : f32 to vector<8x128xf32>
    %164 = arith.mulf %163, %162 : vector<8x128xf32>
    %165 = math.tanh %164 : vector<8x128xf32>
    %cst_75 = arith.constant 5.000000e-01 : f32
    %166 = vector.broadcast %cst_75 : f32 to vector<8x128xf32>
    %167 = arith.mulf %166, %165 : vector<8x128xf32>
    %cst_76 = arith.constant 5.000000e-01 : f32
    %168 = vector.broadcast %cst_76 : f32 to vector<8x128xf32>
    %169 = arith.addf %167, %168 : vector<8x128xf32>
    %170 = vector.extract_strided_slice %153 {offsets = [0, 256], sizes = [8, 128], strides = [1, 1]} : vector<8x512xf32> to vector<8x128xf32>
    %171 = math.tanh %170 : vector<8x128xf32>
    %172 = vector.extract_strided_slice %153 {offsets = [0, 384], sizes = [8, 128], strides = [1, 1]} : vector<8x512xf32> to vector<8x128xf32>
    %cst_77 = arith.constant 5.000000e-01 : f32
    %173 = vector.broadcast %cst_77 : f32 to vector<8x128xf32>
    %174 = arith.mulf %173, %172 : vector<8x128xf32>
    %175 = math.tanh %174 : vector<8x128xf32>
    %cst_78 = arith.constant 5.000000e-01 : f32
    %176 = vector.broadcast %cst_78 : f32 to vector<8x128xf32>
    %177 = arith.mulf %176, %175 : vector<8x128xf32>
    %cst_79 = arith.constant 5.000000e-01 : f32
    %178 = vector.broadcast %cst_79 : f32 to vector<8x128xf32>
    %179 = arith.addf %177, %178 : vector<8x128xf32>
    %180 = arith.mulf %169, %136 : vector<8x128xf32>
    %181 = arith.mulf %161, %171 : vector<8x128xf32>
    %182 = arith.addf %180, %181 : vector<8x128xf32>
    %183 = math.tanh %182 : vector<8x128xf32>
    %184 = arith.mulf %179, %183 : vector<8x128xf32>
    %185 = arith.truncf %184 : vector<8x128xf32> to vector<8x128xbf16>
    %186 = arith.index_cast %c3_i32 : i32 to index
    %c0_80 = arith.constant 0 : index
    %c0_81 = arith.constant 0 : index
    %187 = vector.load %arg6[%186, %c0_80, %c0_81] : memref<8x8x128xbf16, #tpu.memory_space<vmem>>, vector<1x8x128xbf16>
    %188 = vector.shape_cast %187 : vector<1x8x128xbf16> to vector<8x128xbf16>
    %189 = vector.shape_cast %185 : vector<8x128xbf16> to vector<1x8x128xbf16>
    tpu.vector_store %arg6[%186, %c0_80, %c0_81], %189 {strides = array<i32>} : memref<8x8x128xbf16, #tpu.memory_space<vmem>>, vector<1x8x128xbf16>,
    %c4_i32 = arith.constant 4 : i32
    %190 = arith.index_cast %c4_i32 : i32 to index
    %c0_82 = arith.constant 0 : index
    %c0_83 = arith.constant 0 : index
    %191 = vector.load %arg2[%190, %c0_82, %c0_83] : memref<8x8x128xbf16, #tpu.memory_space<vmem>>, vector<1x8x128xbf16>
    %192 = vector.shape_cast %191 : vector<1x8x128xbf16> to vector<8x128xbf16>
    %c0_84 = arith.constant 0 : index
    %c0_85 = arith.constant 0 : index
    %193 = vector.load %arg3[%c0_84, %c0_85] : memref<128x512xbf16, #tpu.memory_space<vmem>>, vector<128x512xbf16>
    %cst_86 = arith.constant dense<0.000000e+00> : vector<8x512xf32>
    %194 = tpu.matmul %192, %193, %cst_86 {dimension_numbers = #tpu.dot_dimension_numbers<[1], [0], [0], [1], [0, 0, 1, 1], [], []>} : vector<8x128xbf16>, vector<128x512xbf16>, vector<8x512xf32> -> vector<8x512xf32>
    %c0_87 = arith.constant 0 : index
    %c0_88 = arith.constant 0 : index
    %195 = vector.load %arg4[%c0_87, %c0_88] : memref<128x512xbf16, #tpu.memory_space<vmem>>, vector<128x512xbf16>
    %cst_89 = arith.constant dense<0.000000e+00> : vector<8x512xf32>
    %196 = tpu.matmul %185, %195, %cst_89 {dimension_numbers = #tpu.dot_dimension_numbers<[1], [0], [0], [1], [0, 0, 1, 1], [], []>} : vector<8x128xbf16>, vector<128x512xbf16>, vector<8x512xf32> -> vector<8x512xf32>
    %197 = arith.addf %194, %196 : vector<8x512xf32>
    %198 = vector.broadcast %3 : vector<1x512xf32> to vector<8x512xf32>
    %199 = arith.addf %197, %198 : vector<8x512xf32>
    %200 = vector.extract_strided_slice %199 {offsets = [0, 0], sizes = [8, 128], strides = [1, 1]} : vector<8x512xf32> to vector<8x128xf32>
    %cst_90 = arith.constant 5.000000e-01 : f32
    %201 = vector.broadcast %cst_90 : f32 to vector<8x128xf32>
    %202 = arith.mulf %201, %200 : vector<8x128xf32>
    %203 = math.tanh %202 : vector<8x128xf32>
    %cst_91 = arith.constant 5.000000e-01 : f32
    %204 = vector.broadcast %cst_91 : f32 to vector<8x128xf32>
    %205 = arith.mulf %204, %203 : vector<8x128xf32>
    %cst_92 = arith.constant 5.000000e-01 : f32
    %206 = vector.broadcast %cst_92 : f32 to vector<8x128xf32>
    %207 = arith.addf %205, %206 : vector<8x128xf32>
    %208 = vector.extract_strided_slice %199 {offsets = [0, 128], sizes = [8, 128], strides = [1, 1]} : vector<8x512xf32> to vector<8x128xf32>
    %cst_93 = arith.constant 5.000000e-01 : f32
    %209 = vector.broadcast %cst_93 : f32 to vector<8x128xf32>
    %210 = arith.mulf %209, %208 : vector<8x128xf32>
    %211 = math.tanh %210 : vector<8x128xf32>
    %cst_94 = arith.constant 5.000000e-01 : f32
    %212 = vector.broadcast %cst_94 : f32 to vector<8x128xf32>
    %213 = arith.mulf %212, %211 : vector<8x128xf32>
    %cst_95 = arith.constant 5.000000e-01 : f32
    %214 = vector.broadcast %cst_95 : f32 to vector<8x128xf32>
    %215 = arith.addf %213, %214 : vector<8x128xf32>
    %216 = vector.extract_strided_slice %199 {offsets = [0, 256], sizes = [8, 128], strides = [1, 1]} : vector<8x512xf32> to vector<8x128xf32>
    %217 = math.tanh %216 : vector<8x128xf32>
    %218 = vector.extract_strided_slice %199 {offsets = [0, 384], sizes = [8, 128], strides = [1, 1]} : vector<8x512xf32> to vector<8x128xf32>
    %cst_96 = arith.constant 5.000000e-01 : f32
    %219 = vector.broadcast %cst_96 : f32 to vector<8x128xf32>
    %220 = arith.mulf %219, %218 : vector<8x128xf32>
    %221 = math.tanh %220 : vector<8x128xf32>
    %cst_97 = arith.constant 5.000000e-01 : f32
    %222 = vector.broadcast %cst_97 : f32 to vector<8x128xf32>
    %223 = arith.mulf %222, %221 : vector<8x128xf32>
    %cst_98 = arith.constant 5.000000e-01 : f32
    %224 = vector.broadcast %cst_98 : f32 to vector<8x128xf32>
    %225 = arith.addf %223, %224 : vector<8x128xf32>
    %226 = arith.mulf %215, %182 : vector<8x128xf32>
    %227 = arith.mulf %207, %217 : vector<8x128xf32>
    %228 = arith.addf %226, %227 : vector<8x128xf32>
    %229 = math.tanh %228 : vector<8x128xf32>
    %230 = arith.mulf %225, %229 : vector<8x128xf32>
    %231 = arith.truncf %230 : vector<8x128xf32> to vector<8x128xbf16>
    %232 = arith.index_cast %c4_i32 : i32 to index
    %c0_99 = arith.constant 0 : index
    %c0_100 = arith.constant 0 : index
    %233 = vector.load %arg6[%232, %c0_99, %c0_100] : memref<8x8x128xbf16, #tpu.memory_space<vmem>>, vector<1x8x128xbf16>
    %234 = vector.shape_cast %233 : vector<1x8x128xbf16> to vector<8x128xbf16>
    %235 = vector.shape_cast %231 : vector<8x128xbf16> to vector<1x8x128xbf16>
    tpu.vector_store %arg6[%232, %c0_99, %c0_100], %235 {strides = array<i32>} : memref<8x8x128xbf16, #tpu.memory_space<vmem>>, vector<1x8x128xbf16>,
    %c5_i32 = arith.constant 5 : i32
    %236 = arith.index_cast %c5_i32 : i32 to index
    %c0_101 = arith.constant 0 : index
    %c0_102 = arith.constant 0 : index
    %237 = vector.load %arg2[%236, %c0_101, %c0_102] : memref<8x8x128xbf16, #tpu.memory_space<vmem>>, vector<1x8x128xbf16>
    %238 = vector.shape_cast %237 : vector<1x8x128xbf16> to vector<8x128xbf16>
    %c0_103 = arith.constant 0 : index
    %c0_104 = arith.constant 0 : index
    %239 = vector.load %arg3[%c0_103, %c0_104] : memref<128x512xbf16, #tpu.memory_space<vmem>>, vector<128x512xbf16>
    %cst_105 = arith.constant dense<0.000000e+00> : vector<8x512xf32>
    %240 = tpu.matmul %238, %239, %cst_105 {dimension_numbers = #tpu.dot_dimension_numbers<[1], [0], [0], [1], [0, 0, 1, 1], [], []>} : vector<8x128xbf16>, vector<128x512xbf16>, vector<8x512xf32> -> vector<8x512xf32>
    %c0_106 = arith.constant 0 : index
    %c0_107 = arith.constant 0 : index
    %241 = vector.load %arg4[%c0_106, %c0_107] : memref<128x512xbf16, #tpu.memory_space<vmem>>, vector<128x512xbf16>
    %cst_108 = arith.constant dense<0.000000e+00> : vector<8x512xf32>
    %242 = tpu.matmul %231, %241, %cst_108 {dimension_numbers = #tpu.dot_dimension_numbers<[1], [0], [0], [1], [0, 0, 1, 1], [], []>} : vector<8x128xbf16>, vector<128x512xbf16>, vector<8x512xf32> -> vector<8x512xf32>
    %243 = arith.addf %240, %242 : vector<8x512xf32>
    %244 = vector.broadcast %3 : vector<1x512xf32> to vector<8x512xf32>
    %245 = arith.addf %243, %244 : vector<8x512xf32>
    %246 = vector.extract_strided_slice %245 {offsets = [0, 0], sizes = [8, 128], strides = [1, 1]} : vector<8x512xf32> to vector<8x128xf32>
    %cst_109 = arith.constant 5.000000e-01 : f32
    %247 = vector.broadcast %cst_109 : f32 to vector<8x128xf32>
    %248 = arith.mulf %247, %246 : vector<8x128xf32>
    %249 = math.tanh %248 : vector<8x128xf32>
    %cst_110 = arith.constant 5.000000e-01 : f32
    %250 = vector.broadcast %cst_110 : f32 to vector<8x128xf32>
    %251 = arith.mulf %250, %249 : vector<8x128xf32>
    %cst_111 = arith.constant 5.000000e-01 : f32
    %252 = vector.broadcast %cst_111 : f32 to vector<8x128xf32>
    %253 = arith.addf %251, %252 : vector<8x128xf32>
    %254 = vector.extract_strided_slice %245 {offsets = [0, 128], sizes = [8, 128], strides = [1, 1]} : vector<8x512xf32> to vector<8x128xf32>
    %cst_112 = arith.constant 5.000000e-01 : f32
    %255 = vector.broadcast %cst_112 : f32 to vector<8x128xf32>
    %256 = arith.mulf %255, %254 : vector<8x128xf32>
    %257 = math.tanh %256 : vector<8x128xf32>
    %cst_113 = arith.constant 5.000000e-01 : f32
    %258 = vector.broadcast %cst_113 : f32 to vector<8x128xf32>
    %259 = arith.mulf %258, %257 : vector<8x128xf32>
    %cst_114 = arith.constant 5.000000e-01 : f32
    %260 = vector.broadcast %cst_114 : f32 to vector<8x128xf32>
    %261 = arith.addf %259, %260 : vector<8x128xf32>
    %262 = vector.extract_strided_slice %245 {offsets = [0, 256], sizes = [8, 128], strides = [1, 1]} : vector<8x512xf32> to vector<8x128xf32>
    %263 = math.tanh %262 : vector<8x128xf32>
    %264 = vector.extract_strided_slice %245 {offsets = [0, 384], sizes = [8, 128], strides = [1, 1]} : vector<8x512xf32> to vector<8x128xf32>
    %cst_115 = arith.constant 5.000000e-01 : f32
    %265 = vector.broadcast %cst_115 : f32 to vector<8x128xf32>
    %266 = arith.mulf %265, %264 : vector<8x128xf32>
    %267 = math.tanh %266 : vector<8x128xf32>
    %cst_116 = arith.constant 5.000000e-01 : f32
    %268 = vector.broadcast %cst_116 : f32 to vector<8x128xf32>
    %269 = arith.mulf %268, %267 : vector<8x128xf32>
    %cst_117 = arith.constant 5.000000e-01 : f32
    %270 = vector.broadcast %cst_117 : f32 to vector<8x128xf32>
    %271 = arith.addf %269, %270 : vector<8x128xf32>
    %272 = arith.mulf %261, %228 : vector<8x128xf32>
    %273 = arith.mulf %253, %263 : vector<8x128xf32>
    %274 = arith.addf %272, %273 : vector<8x128xf32>
    %275 = math.tanh %274 : vector<8x128xf32>
    %276 = arith.mulf %271, %275 : vector<8x128xf32>
    %277 = arith.truncf %276 : vector<8x128xf32> to vector<8x128xbf16>
    %278 = arith.index_cast %c5_i32 : i32 to index
    %c0_118 = arith.constant 0 : index
    %c0_119 = arith.constant 0 : index
    %279 = vector.load %arg6[%278, %c0_118, %c0_119] : memref<8x8x128xbf16, #tpu.memory_space<vmem>>, vector<1x8x128xbf16>
    %280 = vector.shape_cast %279 : vector<1x8x128xbf16> to vector<8x128xbf16>
    %281 = vector.shape_cast %277 : vector<8x128xbf16> to vector<1x8x128xbf16>
    tpu.vector_store %arg6[%278, %c0_118, %c0_119], %281 {strides = array<i32>} : memref<8x8x128xbf16, #tpu.memory_space<vmem>>, vector<1x8x128xbf16>,
    %c6_i32 = arith.constant 6 : i32
    %282 = arith.index_cast %c6_i32 : i32 to index
    %c0_120 = arith.constant 0 : index
    %c0_121 = arith.constant 0 : index
    %283 = vector.load %arg2[%282, %c0_120, %c0_121] : memref<8x8x128xbf16, #tpu.memory_space<vmem>>, vector<1x8x128xbf16>
    %284 = vector.shape_cast %283 : vector<1x8x128xbf16> to vector<8x128xbf16>
    %c0_122 = arith.constant 0 : index
    %c0_123 = arith.constant 0 : index
    %285 = vector.load %arg3[%c0_122, %c0_123] : memref<128x512xbf16, #tpu.memory_space<vmem>>, vector<128x512xbf16>
    %cst_124 = arith.constant dense<0.000000e+00> : vector<8x512xf32>
    %286 = tpu.matmul %284, %285, %cst_124 {dimension_numbers = #tpu.dot_dimension_numbers<[1], [0], [0], [1], [0, 0, 1, 1], [], []>} : vector<8x128xbf16>, vector<128x512xbf16>, vector<8x512xf32> -> vector<8x512xf32>
    %c0_125 = arith.constant 0 : index
    %c0_126 = arith.constant 0 : index
    %287 = vector.load %arg4[%c0_125, %c0_126] : memref<128x512xbf16, #tpu.memory_space<vmem>>, vector<128x512xbf16>
    %cst_127 = arith.constant dense<0.000000e+00> : vector<8x512xf32>
    %288 = tpu.matmul %277, %287, %cst_127 {dimension_numbers = #tpu.dot_dimension_numbers<[1], [0], [0], [1], [0, 0, 1, 1], [], []>} : vector<8x128xbf16>, vector<128x512xbf16>, vector<8x512xf32> -> vector<8x512xf32>
    %289 = arith.addf %286, %288 : vector<8x512xf32>
    %290 = vector.broadcast %3 : vector<1x512xf32> to vector<8x512xf32>
    %291 = arith.addf %289, %290 : vector<8x512xf32>
    %292 = vector.extract_strided_slice %291 {offsets = [0, 0], sizes = [8, 128], strides = [1, 1]} : vector<8x512xf32> to vector<8x128xf32>
    %cst_128 = arith.constant 5.000000e-01 : f32
    %293 = vector.broadcast %cst_128 : f32 to vector<8x128xf32>
    %294 = arith.mulf %293, %292 : vector<8x128xf32>
    %295 = math.tanh %294 : vector<8x128xf32>
    %cst_129 = arith.constant 5.000000e-01 : f32
    %296 = vector.broadcast %cst_129 : f32 to vector<8x128xf32>
    %297 = arith.mulf %296, %295 : vector<8x128xf32>
    %cst_130 = arith.constant 5.000000e-01 : f32
    %298 = vector.broadcast %cst_130 : f32 to vector<8x128xf32>
    %299 = arith.addf %297, %298 : vector<8x128xf32>
    %300 = vector.extract_strided_slice %291 {offsets = [0, 128], sizes = [8, 128], strides = [1, 1]} : vector<8x512xf32> to vector<8x128xf32>
    %cst_131 = arith.constant 5.000000e-01 : f32
    %301 = vector.broadcast %cst_131 : f32 to vector<8x128xf32>
    %302 = arith.mulf %301, %300 : vector<8x128xf32>
    %303 = math.tanh %302 : vector<8x128xf32>
    %cst_132 = arith.constant 5.000000e-01 : f32
    %304 = vector.broadcast %cst_132 : f32 to vector<8x128xf32>
    %305 = arith.mulf %304, %303 : vector<8x128xf32>
    %cst_133 = arith.constant 5.000000e-01 : f32
    %306 = vector.broadcast %cst_133 : f32 to vector<8x128xf32>
    %307 = arith.addf %305, %306 : vector<8x128xf32>
    %308 = vector.extract_strided_slice %291 {offsets = [0, 256], sizes = [8, 128], strides = [1, 1]} : vector<8x512xf32> to vector<8x128xf32>
    %309 = math.tanh %308 : vector<8x128xf32>
    %310 = vector.extract_strided_slice %291 {offsets = [0, 384], sizes = [8, 128], strides = [1, 1]} : vector<8x512xf32> to vector<8x128xf32>
    %cst_134 = arith.constant 5.000000e-01 : f32
    %311 = vector.broadcast %cst_134 : f32 to vector<8x128xf32>
    %312 = arith.mulf %311, %310 : vector<8x128xf32>
    %313 = math.tanh %312 : vector<8x128xf32>
    %cst_135 = arith.constant 5.000000e-01 : f32
    %314 = vector.broadcast %cst_135 : f32 to vector<8x128xf32>
    %315 = arith.mulf %314, %313 : vector<8x128xf32>
    %cst_136 = arith.constant 5.000000e-01 : f32
    %316 = vector.broadcast %cst_136 : f32 to vector<8x128xf32>
    %317 = arith.addf %315, %316 : vector<8x128xf32>
    %318 = arith.mulf %307, %274 : vector<8x128xf32>
    %319 = arith.mulf %299, %309 : vector<8x128xf32>
    %320 = arith.addf %318, %319 : vector<8x128xf32>
    %321 = math.tanh %320 : vector<8x128xf32>
    %322 = arith.mulf %317, %321 : vector<8x128xf32>
    %323 = arith.truncf %322 : vector<8x128xf32> to vector<8x128xbf16>
    %324 = arith.index_cast %c6_i32 : i32 to index
    %c0_137 = arith.constant 0 : index
    %c0_138 = arith.constant 0 : index
    %325 = vector.load %arg6[%324, %c0_137, %c0_138] : memref<8x8x128xbf16, #tpu.memory_space<vmem>>, vector<1x8x128xbf16>
    %326 = vector.shape_cast %325 : vector<1x8x128xbf16> to vector<8x128xbf16>
    %327 = vector.shape_cast %323 : vector<8x128xbf16> to vector<1x8x128xbf16>
    tpu.vector_store %arg6[%324, %c0_137, %c0_138], %327 {strides = array<i32>} : memref<8x8x128xbf16, #tpu.memory_space<vmem>>, vector<1x8x128xbf16>,
    %c7_i32 = arith.constant 7 : i32
    %328 = arith.index_cast %c7_i32 : i32 to index
    %c0_139 = arith.constant 0 : index
    %c0_140 = arith.constant 0 : index
    %329 = vector.load %arg2[%328, %c0_139, %c0_140] : memref<8x8x128xbf16, #tpu.memory_space<vmem>>, vector<1x8x128xbf16>
    %330 = vector.shape_cast %329 : vector<1x8x128xbf16> to vector<8x128xbf16>
    %c0_141 = arith.constant 0 : index
    %c0_142 = arith.constant 0 : index
    %331 = vector.load %arg3[%c0_141, %c0_142] : memref<128x512xbf16, #tpu.memory_space<vmem>>, vector<128x512xbf16>
    %cst_143 = arith.constant dense<0.000000e+00> : vector<8x512xf32>
    %332 = tpu.matmul %330, %331, %cst_143 {dimension_numbers = #tpu.dot_dimension_numbers<[1], [0], [0], [1], [0, 0, 1, 1], [], []>} : vector<8x128xbf16>, vector<128x512xbf16>, vector<8x512xf32> -> vector<8x512xf32>
    %c0_144 = arith.constant 0 : index
    %c0_145 = arith.constant 0 : index
    %333 = vector.load %arg4[%c0_144, %c0_145] : memref<128x512xbf16, #tpu.memory_space<vmem>>, vector<128x512xbf16>
    %cst_146 = arith.constant dense<0.000000e+00> : vector<8x512xf32>
    %334 = tpu.matmul %323, %333, %cst_146 {dimension_numbers = #tpu.dot_dimension_numbers<[1], [0], [0], [1], [0, 0, 1, 1], [], []>} : vector<8x128xbf16>, vector<128x512xbf16>, vector<8x512xf32> -> vector<8x512xf32>
    %335 = arith.addf %332, %334 : vector<8x512xf32>
    %336 = vector.broadcast %3 : vector<1x512xf32> to vector<8x512xf32>
    %337 = arith.addf %335, %336 : vector<8x512xf32>
    %338 = vector.extract_strided_slice %337 {offsets = [0, 0], sizes = [8, 128], strides = [1, 1]} : vector<8x512xf32> to vector<8x128xf32>
    %cst_147 = arith.constant 5.000000e-01 : f32
    %339 = vector.broadcast %cst_147 : f32 to vector<8x128xf32>
    %340 = arith.mulf %339, %338 : vector<8x128xf32>
    %341 = math.tanh %340 : vector<8x128xf32>
    %cst_148 = arith.constant 5.000000e-01 : f32
    %342 = vector.broadcast %cst_148 : f32 to vector<8x128xf32>
    %343 = arith.mulf %342, %341 : vector<8x128xf32>
    %cst_149 = arith.constant 5.000000e-01 : f32
    %344 = vector.broadcast %cst_149 : f32 to vector<8x128xf32>
    %345 = arith.addf %343, %344 : vector<8x128xf32>
    %346 = vector.extract_strided_slice %337 {offsets = [0, 128], sizes = [8, 128], strides = [1, 1]} : vector<8x512xf32> to vector<8x128xf32>
    %cst_150 = arith.constant 5.000000e-01 : f32
    %347 = vector.broadcast %cst_150 : f32 to vector<8x128xf32>
    %348 = arith.mulf %347, %346 : vector<8x128xf32>
    %349 = math.tanh %348 : vector<8x128xf32>
    %cst_151 = arith.constant 5.000000e-01 : f32
    %350 = vector.broadcast %cst_151 : f32 to vector<8x128xf32>
    %351 = arith.mulf %350, %349 : vector<8x128xf32>
    %cst_152 = arith.constant 5.000000e-01 : f32
    %352 = vector.broadcast %cst_152 : f32 to vector<8x128xf32>
    %353 = arith.addf %351, %352 : vector<8x128xf32>
    %354 = vector.extract_strided_slice %337 {offsets = [0, 256], sizes = [8, 128], strides = [1, 1]} : vector<8x512xf32> to vector<8x128xf32>
    %355 = math.tanh %354 : vector<8x128xf32>
    %356 = vector.extract_strided_slice %337 {offsets = [0, 384], sizes = [8, 128], strides = [1, 1]} : vector<8x512xf32> to vector<8x128xf32>
    %cst_153 = arith.constant 5.000000e-01 : f32
    %357 = vector.broadcast %cst_153 : f32 to vector<8x128xf32>
    %358 = arith.mulf %357, %356 : vector<8x128xf32>
    %359 = math.tanh %358 : vector<8x128xf32>
    %cst_154 = arith.constant 5.000000e-01 : f32
    %360 = vector.broadcast %cst_154 : f32 to vector<8x128xf32>
    %361 = arith.mulf %360, %359 : vector<8x128xf32>
    %cst_155 = arith.constant 5.000000e-01 : f32
    %362 = vector.broadcast %cst_155 : f32 to vector<8x128xf32>
    %363 = arith.addf %361, %362 : vector<8x128xf32>
    %364 = arith.mulf %353, %320 : vector<8x128xf32>
    %365 = arith.mulf %345, %355 : vector<8x128xf32>
    %366 = arith.addf %364, %365 : vector<8x128xf32>
    %367 = math.tanh %366 : vector<8x128xf32>
    %368 = arith.mulf %363, %367 : vector<8x128xf32>
    %369 = arith.truncf %368 : vector<8x128xf32> to vector<8x128xbf16>
    %370 = arith.index_cast %c7_i32 : i32 to index
    %c0_156 = arith.constant 0 : index
    %c0_157 = arith.constant 0 : index
    %371 = vector.load %arg6[%370, %c0_156, %c0_157] : memref<8x8x128xbf16, #tpu.memory_space<vmem>>, vector<1x8x128xbf16>
    %372 = vector.shape_cast %371 : vector<1x8x128xbf16> to vector<8x128xbf16>
    %373 = vector.shape_cast %369 : vector<8x128xbf16> to vector<1x8x128xbf16>
    tpu.vector_store %arg6[%370, %c0_156, %c0_157], %373 {strides = array<i32>} : memref<8x8x128xbf16, #tpu.memory_space<vmem>>, vector<1x8x128xbf16>,
    %c8_i32 = arith.constant 8 : i32
    %c0_158 = arith.constant 0 : index
    %c0_159 = arith.constant 0 : index
    %374 = vector.load %arg7[%c0_158, %c0_159] : memref<8x128xbf16, #tpu.memory_space<vmem>>, vector<8x128xbf16>
    tpu.vector_store %arg7[%c0_158, %c0_159], %369 {strides = array<i32>} : memref<8x128xbf16, #tpu.memory_space<vmem>>, vector<8x128xbf16>,
    %c0_160 = arith.constant 0 : index
    %c0_161 = arith.constant 0 : index
    %375 = vector.load %arg8[%c0_160, %c0_161] : memref<8x128xf32, #tpu.memory_space<vmem>>, vector<8x128xf32>
    tpu.vector_store %arg8[%c0_160, %c0_161], %366 {strides = array<i32>} : memref<8x128xf32, #tpu.memory_space<vmem>>, vector<8x128xf32>,
    return
  }
  func.func @transform_0(%arg0: i32, %arg1: i32) -> (i32, i32, i32) {
    %c0_i32 = arith.constant 0 : i32
    %c0_i32_0 = arith.constant 0 : i32
    return %arg1, %arg0, %c0_i32 : i32, i32, i32
  }
  func.func @transform_1(%arg0: i32, %arg1: i32) -> (i32, i32) {
    %c0_i32 = arith.constant 0 : i32
    %c0_i32_0 = arith.constant 0 : i32
    %c0_i32_1 = arith.constant 0 : i32
    return %c0_i32, %c0_i32_0 : i32, i32
  }
  func.func @transform_2(%arg0: i32, %arg1: i32) -> (i32, i32) {
    %c0_i32 = arith.constant 0 : i32
    %c0_i32_0 = arith.constant 0 : i32
    %c0_i32_1 = arith.constant 0 : i32
    return %c0_i32, %c0_i32_0 : i32, i32
  }
  func.func @transform_3(%arg0: i32, %arg1: i32) -> (i32, i32) {
    %c0_i32 = arith.constant 0 : i32
    %c0_i32_0 = arith.constant 0 : i32
    %c0_i32_1 = arith.constant 0 : i32
    return %c0_i32, %c0_i32_0 : i32, i32
  }
  func.func @transform_4(%arg0: i32, %arg1: i32) -> (i32, i32, i32) {
    %c0_i32 = arith.constant 0 : i32
    %c0_i32_0 = arith.constant 0 : i32
    return %arg1, %arg0, %c0_i32 : i32, i32, i32
  }
}

module attributes {stable_mosaic.version = 11 : i64} {
  func.func @_lstm_final_kernel(%arg0: i32, %arg1: i32, %arg2: memref<8x8x128xbf16, #tpu.memory_space<vmem>>, %arg3: memref<128x512xbf16, #tpu.memory_space<vmem>>, %arg4: memref<128x512xbf16, #tpu.memory_space<vmem>>, %arg5: memref<1x512xf32, #tpu.memory_space<vmem>>, %arg6: memref<128x128xbf16, #tpu.memory_space<vmem>>, %arg7: memref<1x128xf32, #tpu.memory_space<vmem>>, %arg8: memref<8x128xf32, #tpu.memory_space<vmem>>, %arg9: memref<8x128xbf16, #tpu.memory_space<vmem>>, %arg10: memref<8x128xf32, #tpu.memory_space<vmem>>) attributes {dimension_semantics = [#tpu.dimension_semantics<parallel>, #tpu.dimension_semantics<arbitrary>], iteration_bounds = array<i64: 1, 1>, scalar_prefetch = 0 : i64, scratch_operands = 2 : i64, tpu.core_type = #tpu.core_type<tc>, window_params = [{transform_indices = @transform_0, window_bounds = array<i64: 8, 8, 128>}, {pipeline_mode = #tpu.pipeline_mode<synchronous>, transform_indices = @transform_1, window_bounds = array<i64: 128, 512>}, {pipeline_mode = #tpu.pipeline_mode<synchronous>, transform_indices = @transform_2, window_bounds = array<i64: 128, 512>}, {pipeline_mode = #tpu.pipeline_mode<synchronous>, transform_indices = @transform_3, window_bounds = array<i64: 1, 512>}, {pipeline_mode = #tpu.pipeline_mode<synchronous>, transform_indices = @transform_4, window_bounds = array<i64: 128, 128>}, {pipeline_mode = #tpu.pipeline_mode<synchronous>, transform_indices = @transform_5, window_bounds = array<i64: 1, 128>}, {transform_indices = @transform_6, window_bounds = array<i64: 8, 128>}]} {
    %c0_i32 = arith.constant 0 : i32
    %0 = arith.cmpi eq, %arg1, %c0_i32 : i32
    %1 = arith.extui %0 : i1 to i32
    %c0_i32_0 = arith.constant 0 : i32
    %2 = arith.cmpi ne, %1, %c0_i32_0 : i32
    scf.if %2 {
      %cst_148 = arith.constant 0.000000e+00 : bf16
      %347 = vector.broadcast %cst_148 : bf16 to vector<8x128xbf16>
      %c0_149 = arith.constant 0 : index
      %c0_150 = arith.constant 0 : index
      %348 = vector.load %arg9[%c0_149, %c0_150] : memref<8x128xbf16, #tpu.memory_space<vmem>>, vector<8x128xbf16>
      tpu.vector_store %arg9[%c0_149, %c0_150], %347 {strides = array<i32>} : memref<8x128xbf16, #tpu.memory_space<vmem>>, vector<8x128xbf16>,
      %cst_151 = arith.constant 0.000000e+00 : f32
      %349 = vector.broadcast %cst_151 : f32 to vector<8x128xf32>
      %c0_152 = arith.constant 0 : index
      %c0_153 = arith.constant 0 : index
      %350 = vector.load %arg10[%c0_152, %c0_153] : memref<8x128xf32, #tpu.memory_space<vmem>>, vector<8x128xf32>
      tpu.vector_store %arg10[%c0_152, %c0_153], %349 {strides = array<i32>} : memref<8x128xf32, #tpu.memory_space<vmem>>, vector<8x128xf32>,
    } else {
    }
    %c0 = arith.constant 0 : index
    %c0_1 = arith.constant 0 : index
    %3 = vector.load %arg5[%c0, %c0_1] : memref<1x512xf32, #tpu.memory_space<vmem>>, vector<1x512xf32>
    %c0_2 = arith.constant 0 : index
    %c0_3 = arith.constant 0 : index
    %4 = vector.load %arg9[%c0_2, %c0_3] : memref<8x128xbf16, #tpu.memory_space<vmem>>, vector<8x128xbf16>
    %c0_4 = arith.constant 0 : index
    %c0_5 = arith.constant 0 : index
    %5 = vector.load %arg10[%c0_4, %c0_5] : memref<8x128xf32, #tpu.memory_space<vmem>>, vector<8x128xf32>
    %c0_i32_6 = arith.constant 0 : i32
    %6 = arith.index_cast %c0_i32_6 : i32 to index
    %c0_7 = arith.constant 0 : index
    %c0_8 = arith.constant 0 : index
    %7 = vector.load %arg2[%6, %c0_7, %c0_8] : memref<8x8x128xbf16, #tpu.memory_space<vmem>>, vector<1x8x128xbf16>
    %8 = vector.shape_cast %7 : vector<1x8x128xbf16> to vector<8x128xbf16>
    %c0_9 = arith.constant 0 : index
    %c0_10 = arith.constant 0 : index
    %9 = vector.load %arg3[%c0_9, %c0_10] : memref<128x512xbf16, #tpu.memory_space<vmem>>, vector<128x512xbf16>
    %cst = arith.constant dense<0.000000e+00> : vector<8x512xf32>
    %10 = tpu.matmul %8, %9, %cst {dimension_numbers = #tpu.dot_dimension_numbers<[1], [0], [0], [1], [0, 0, 1, 1], [], []>} : vector<8x128xbf16>, vector<128x512xbf16>, vector<8x512xf32> -> vector<8x512xf32>
    %c0_11 = arith.constant 0 : index
    %c0_12 = arith.constant 0 : index
    %11 = vector.load %arg4[%c0_11, %c0_12] : memref<128x512xbf16, #tpu.memory_space<vmem>>, vector<128x512xbf16>
    %cst_13 = arith.constant dense<0.000000e+00> : vector<8x512xf32>
    %12 = tpu.matmul %4, %11, %cst_13 {dimension_numbers = #tpu.dot_dimension_numbers<[1], [0], [0], [1], [0, 0, 1, 1], [], []>} : vector<8x128xbf16>, vector<128x512xbf16>, vector<8x512xf32> -> vector<8x512xf32>
    %13 = arith.addf %10, %12 : vector<8x512xf32>
    %14 = vector.broadcast %3 : vector<1x512xf32> to vector<8x512xf32>
    %15 = arith.addf %13, %14 : vector<8x512xf32>
    %16 = vector.extract_strided_slice %15 {offsets = [0, 0], sizes = [8, 128], strides = [1, 1]} : vector<8x512xf32> to vector<8x128xf32>
    %cst_14 = arith.constant 5.000000e-01 : f32
    %17 = vector.broadcast %cst_14 : f32 to vector<8x128xf32>
    %18 = arith.mulf %17, %16 : vector<8x128xf32>
    %19 = math.tanh %18 : vector<8x128xf32>
    %cst_15 = arith.constant 5.000000e-01 : f32
    %20 = vector.broadcast %cst_15 : f32 to vector<8x128xf32>
    %21 = arith.mulf %20, %19 : vector<8x128xf32>
    %cst_16 = arith.constant 5.000000e-01 : f32
    %22 = vector.broadcast %cst_16 : f32 to vector<8x128xf32>
    %23 = arith.addf %21, %22 : vector<8x128xf32>
    %24 = vector.extract_strided_slice %15 {offsets = [0, 128], sizes = [8, 128], strides = [1, 1]} : vector<8x512xf32> to vector<8x128xf32>
    %cst_17 = arith.constant 5.000000e-01 : f32
    %25 = vector.broadcast %cst_17 : f32 to vector<8x128xf32>
    %26 = arith.mulf %25, %24 : vector<8x128xf32>
    %27 = math.tanh %26 : vector<8x128xf32>
    %cst_18 = arith.constant 5.000000e-01 : f32
    %28 = vector.broadcast %cst_18 : f32 to vector<8x128xf32>
    %29 = arith.mulf %28, %27 : vector<8x128xf32>
    %cst_19 = arith.constant 5.000000e-01 : f32
    %30 = vector.broadcast %cst_19 : f32 to vector<8x128xf32>
    %31 = arith.addf %29, %30 : vector<8x128xf32>
    %32 = vector.extract_strided_slice %15 {offsets = [0, 256], sizes = [8, 128], strides = [1, 1]} : vector<8x512xf32> to vector<8x128xf32>
    %33 = math.tanh %32 : vector<8x128xf32>
    %34 = vector.extract_strided_slice %15 {offsets = [0, 384], sizes = [8, 128], strides = [1, 1]} : vector<8x512xf32> to vector<8x128xf32>
    %cst_20 = arith.constant 5.000000e-01 : f32
    %35 = vector.broadcast %cst_20 : f32 to vector<8x128xf32>
    %36 = arith.mulf %35, %34 : vector<8x128xf32>
    %37 = math.tanh %36 : vector<8x128xf32>
    %cst_21 = arith.constant 5.000000e-01 : f32
    %38 = vector.broadcast %cst_21 : f32 to vector<8x128xf32>
    %39 = arith.mulf %38, %37 : vector<8x128xf32>
    %cst_22 = arith.constant 5.000000e-01 : f32
    %40 = vector.broadcast %cst_22 : f32 to vector<8x128xf32>
    %41 = arith.addf %39, %40 : vector<8x128xf32>
    %42 = arith.mulf %31, %5 : vector<8x128xf32>
    %43 = arith.mulf %23, %33 : vector<8x128xf32>
    %44 = arith.addf %42, %43 : vector<8x128xf32>
    %45 = math.tanh %44 : vector<8x128xf32>
    %46 = arith.mulf %41, %45 : vector<8x128xf32>
    %47 = arith.truncf %46 : vector<8x128xf32> to vector<8x128xbf16>
    %c1_i32 = arith.constant 1 : i32
    %48 = arith.index_cast %c1_i32 : i32 to index
    %c0_23 = arith.constant 0 : index
    %c0_24 = arith.constant 0 : index
    %49 = vector.load %arg2[%48, %c0_23, %c0_24] : memref<8x8x128xbf16, #tpu.memory_space<vmem>>, vector<1x8x128xbf16>
    %50 = vector.shape_cast %49 : vector<1x8x128xbf16> to vector<8x128xbf16>
    %c0_25 = arith.constant 0 : index
    %c0_26 = arith.constant 0 : index
    %51 = vector.load %arg3[%c0_25, %c0_26] : memref<128x512xbf16, #tpu.memory_space<vmem>>, vector<128x512xbf16>
    %cst_27 = arith.constant dense<0.000000e+00> : vector<8x512xf32>
    %52 = tpu.matmul %50, %51, %cst_27 {dimension_numbers = #tpu.dot_dimension_numbers<[1], [0], [0], [1], [0, 0, 1, 1], [], []>} : vector<8x128xbf16>, vector<128x512xbf16>, vector<8x512xf32> -> vector<8x512xf32>
    %c0_28 = arith.constant 0 : index
    %c0_29 = arith.constant 0 : index
    %53 = vector.load %arg4[%c0_28, %c0_29] : memref<128x512xbf16, #tpu.memory_space<vmem>>, vector<128x512xbf16>
    %cst_30 = arith.constant dense<0.000000e+00> : vector<8x512xf32>
    %54 = tpu.matmul %47, %53, %cst_30 {dimension_numbers = #tpu.dot_dimension_numbers<[1], [0], [0], [1], [0, 0, 1, 1], [], []>} : vector<8x128xbf16>, vector<128x512xbf16>, vector<8x512xf32> -> vector<8x512xf32>
    %55 = arith.addf %52, %54 : vector<8x512xf32>
    %56 = vector.broadcast %3 : vector<1x512xf32> to vector<8x512xf32>
    %57 = arith.addf %55, %56 : vector<8x512xf32>
    %58 = vector.extract_strided_slice %57 {offsets = [0, 0], sizes = [8, 128], strides = [1, 1]} : vector<8x512xf32> to vector<8x128xf32>
    %cst_31 = arith.constant 5.000000e-01 : f32
    %59 = vector.broadcast %cst_31 : f32 to vector<8x128xf32>
    %60 = arith.mulf %59, %58 : vector<8x128xf32>
    %61 = math.tanh %60 : vector<8x128xf32>
    %cst_32 = arith.constant 5.000000e-01 : f32
    %62 = vector.broadcast %cst_32 : f32 to vector<8x128xf32>
    %63 = arith.mulf %62, %61 : vector<8x128xf32>
    %cst_33 = arith.constant 5.000000e-01 : f32
    %64 = vector.broadcast %cst_33 : f32 to vector<8x128xf32>
    %65 = arith.addf %63, %64 : vector<8x128xf32>
    %66 = vector.extract_strided_slice %57 {offsets = [0, 128], sizes = [8, 128], strides = [1, 1]} : vector<8x512xf32> to vector<8x128xf32>
    %cst_34 = arith.constant 5.000000e-01 : f32
    %67 = vector.broadcast %cst_34 : f32 to vector<8x128xf32>
    %68 = arith.mulf %67, %66 : vector<8x128xf32>
    %69 = math.tanh %68 : vector<8x128xf32>
    %cst_35 = arith.constant 5.000000e-01 : f32
    %70 = vector.broadcast %cst_35 : f32 to vector<8x128xf32>
    %71 = arith.mulf %70, %69 : vector<8x128xf32>
    %cst_36 = arith.constant 5.000000e-01 : f32
    %72 = vector.broadcast %cst_36 : f32 to vector<8x128xf32>
    %73 = arith.addf %71, %72 : vector<8x128xf32>
    %74 = vector.extract_strided_slice %57 {offsets = [0, 256], sizes = [8, 128], strides = [1, 1]} : vector<8x512xf32> to vector<8x128xf32>
    %75 = math.tanh %74 : vector<8x128xf32>
    %76 = vector.extract_strided_slice %57 {offsets = [0, 384], sizes = [8, 128], strides = [1, 1]} : vector<8x512xf32> to vector<8x128xf32>
    %cst_37 = arith.constant 5.000000e-01 : f32
    %77 = vector.broadcast %cst_37 : f32 to vector<8x128xf32>
    %78 = arith.mulf %77, %76 : vector<8x128xf32>
    %79 = math.tanh %78 : vector<8x128xf32>
    %cst_38 = arith.constant 5.000000e-01 : f32
    %80 = vector.broadcast %cst_38 : f32 to vector<8x128xf32>
    %81 = arith.mulf %80, %79 : vector<8x128xf32>
    %cst_39 = arith.constant 5.000000e-01 : f32
    %82 = vector.broadcast %cst_39 : f32 to vector<8x128xf32>
    %83 = arith.addf %81, %82 : vector<8x128xf32>
    %84 = arith.mulf %73, %44 : vector<8x128xf32>
    %85 = arith.mulf %65, %75 : vector<8x128xf32>
    %86 = arith.addf %84, %85 : vector<8x128xf32>
    %87 = math.tanh %86 : vector<8x128xf32>
    %88 = arith.mulf %83, %87 : vector<8x128xf32>
    %89 = arith.truncf %88 : vector<8x128xf32> to vector<8x128xbf16>
    %c2_i32 = arith.constant 2 : i32
    %90 = arith.index_cast %c2_i32 : i32 to index
    %c0_40 = arith.constant 0 : index
    %c0_41 = arith.constant 0 : index
    %91 = vector.load %arg2[%90, %c0_40, %c0_41] : memref<8x8x128xbf16, #tpu.memory_space<vmem>>, vector<1x8x128xbf16>
    %92 = vector.shape_cast %91 : vector<1x8x128xbf16> to vector<8x128xbf16>
    %c0_42 = arith.constant 0 : index
    %c0_43 = arith.constant 0 : index
    %93 = vector.load %arg3[%c0_42, %c0_43] : memref<128x512xbf16, #tpu.memory_space<vmem>>, vector<128x512xbf16>
    %cst_44 = arith.constant dense<0.000000e+00> : vector<8x512xf32>
    %94 = tpu.matmul %92, %93, %cst_44 {dimension_numbers = #tpu.dot_dimension_numbers<[1], [0], [0], [1], [0, 0, 1, 1], [], []>} : vector<8x128xbf16>, vector<128x512xbf16>, vector<8x512xf32> -> vector<8x512xf32>
    %c0_45 = arith.constant 0 : index
    %c0_46 = arith.constant 0 : index
    %95 = vector.load %arg4[%c0_45, %c0_46] : memref<128x512xbf16, #tpu.memory_space<vmem>>, vector<128x512xbf16>
    %cst_47 = arith.constant dense<0.000000e+00> : vector<8x512xf32>
    %96 = tpu.matmul %89, %95, %cst_47 {dimension_numbers = #tpu.dot_dimension_numbers<[1], [0], [0], [1], [0, 0, 1, 1], [], []>} : vector<8x128xbf16>, vector<128x512xbf16>, vector<8x512xf32> -> vector<8x512xf32>
    %97 = arith.addf %94, %96 : vector<8x512xf32>
    %98 = vector.broadcast %3 : vector<1x512xf32> to vector<8x512xf32>
    %99 = arith.addf %97, %98 : vector<8x512xf32>
    %100 = vector.extract_strided_slice %99 {offsets = [0, 0], sizes = [8, 128], strides = [1, 1]} : vector<8x512xf32> to vector<8x128xf32>
    %cst_48 = arith.constant 5.000000e-01 : f32
    %101 = vector.broadcast %cst_48 : f32 to vector<8x128xf32>
    %102 = arith.mulf %101, %100 : vector<8x128xf32>
    %103 = math.tanh %102 : vector<8x128xf32>
    %cst_49 = arith.constant 5.000000e-01 : f32
    %104 = vector.broadcast %cst_49 : f32 to vector<8x128xf32>
    %105 = arith.mulf %104, %103 : vector<8x128xf32>
    %cst_50 = arith.constant 5.000000e-01 : f32
    %106 = vector.broadcast %cst_50 : f32 to vector<8x128xf32>
    %107 = arith.addf %105, %106 : vector<8x128xf32>
    %108 = vector.extract_strided_slice %99 {offsets = [0, 128], sizes = [8, 128], strides = [1, 1]} : vector<8x512xf32> to vector<8x128xf32>
    %cst_51 = arith.constant 5.000000e-01 : f32
    %109 = vector.broadcast %cst_51 : f32 to vector<8x128xf32>
    %110 = arith.mulf %109, %108 : vector<8x128xf32>
    %111 = math.tanh %110 : vector<8x128xf32>
    %cst_52 = arith.constant 5.000000e-01 : f32
    %112 = vector.broadcast %cst_52 : f32 to vector<8x128xf32>
    %113 = arith.mulf %112, %111 : vector<8x128xf32>
    %cst_53 = arith.constant 5.000000e-01 : f32
    %114 = vector.broadcast %cst_53 : f32 to vector<8x128xf32>
    %115 = arith.addf %113, %114 : vector<8x128xf32>
    %116 = vector.extract_strided_slice %99 {offsets = [0, 256], sizes = [8, 128], strides = [1, 1]} : vector<8x512xf32> to vector<8x128xf32>
    %117 = math.tanh %116 : vector<8x128xf32>
    %118 = vector.extract_strided_slice %99 {offsets = [0, 384], sizes = [8, 128], strides = [1, 1]} : vector<8x512xf32> to vector<8x128xf32>
    %cst_54 = arith.constant 5.000000e-01 : f32
    %119 = vector.broadcast %cst_54 : f32 to vector<8x128xf32>
    %120 = arith.mulf %119, %118 : vector<8x128xf32>
    %121 = math.tanh %120 : vector<8x128xf32>
    %cst_55 = arith.constant 5.000000e-01 : f32
    %122 = vector.broadcast %cst_55 : f32 to vector<8x128xf32>
    %123 = arith.mulf %122, %121 : vector<8x128xf32>
    %cst_56 = arith.constant 5.000000e-01 : f32
    %124 = vector.broadcast %cst_56 : f32 to vector<8x128xf32>
    %125 = arith.addf %123, %124 : vector<8x128xf32>
    %126 = arith.mulf %115, %86 : vector<8x128xf32>
    %127 = arith.mulf %107, %117 : vector<8x128xf32>
    %128 = arith.addf %126, %127 : vector<8x128xf32>
    %129 = math.tanh %128 : vector<8x128xf32>
    %130 = arith.mulf %125, %129 : vector<8x128xf32>
    %131 = arith.truncf %130 : vector<8x128xf32> to vector<8x128xbf16>
    %c3_i32 = arith.constant 3 : i32
    %132 = arith.index_cast %c3_i32 : i32 to index
    %c0_57 = arith.constant 0 : index
    %c0_58 = arith.constant 0 : index
    %133 = vector.load %arg2[%132, %c0_57, %c0_58] : memref<8x8x128xbf16, #tpu.memory_space<vmem>>, vector<1x8x128xbf16>
    %134 = vector.shape_cast %133 : vector<1x8x128xbf16> to vector<8x128xbf16>
    %c0_59 = arith.constant 0 : index
    %c0_60 = arith.constant 0 : index
    %135 = vector.load %arg3[%c0_59, %c0_60] : memref<128x512xbf16, #tpu.memory_space<vmem>>, vector<128x512xbf16>
    %cst_61 = arith.constant dense<0.000000e+00> : vector<8x512xf32>
    %136 = tpu.matmul %134, %135, %cst_61 {dimension_numbers = #tpu.dot_dimension_numbers<[1], [0], [0], [1], [0, 0, 1, 1], [], []>} : vector<8x128xbf16>, vector<128x512xbf16>, vector<8x512xf32> -> vector<8x512xf32>
    %c0_62 = arith.constant 0 : index
    %c0_63 = arith.constant 0 : index
    %137 = vector.load %arg4[%c0_62, %c0_63] : memref<128x512xbf16, #tpu.memory_space<vmem>>, vector<128x512xbf16>
    %cst_64 = arith.constant dense<0.000000e+00> : vector<8x512xf32>
    %138 = tpu.matmul %131, %137, %cst_64 {dimension_numbers = #tpu.dot_dimension_numbers<[1], [0], [0], [1], [0, 0, 1, 1], [], []>} : vector<8x128xbf16>, vector<128x512xbf16>, vector<8x512xf32> -> vector<8x512xf32>
    %139 = arith.addf %136, %138 : vector<8x512xf32>
    %140 = vector.broadcast %3 : vector<1x512xf32> to vector<8x512xf32>
    %141 = arith.addf %139, %140 : vector<8x512xf32>
    %142 = vector.extract_strided_slice %141 {offsets = [0, 0], sizes = [8, 128], strides = [1, 1]} : vector<8x512xf32> to vector<8x128xf32>
    %cst_65 = arith.constant 5.000000e-01 : f32
    %143 = vector.broadcast %cst_65 : f32 to vector<8x128xf32>
    %144 = arith.mulf %143, %142 : vector<8x128xf32>
    %145 = math.tanh %144 : vector<8x128xf32>
    %cst_66 = arith.constant 5.000000e-01 : f32
    %146 = vector.broadcast %cst_66 : f32 to vector<8x128xf32>
    %147 = arith.mulf %146, %145 : vector<8x128xf32>
    %cst_67 = arith.constant 5.000000e-01 : f32
    %148 = vector.broadcast %cst_67 : f32 to vector<8x128xf32>
    %149 = arith.addf %147, %148 : vector<8x128xf32>
    %150 = vector.extract_strided_slice %141 {offsets = [0, 128], sizes = [8, 128], strides = [1, 1]} : vector<8x512xf32> to vector<8x128xf32>
    %cst_68 = arith.constant 5.000000e-01 : f32
    %151 = vector.broadcast %cst_68 : f32 to vector<8x128xf32>
    %152 = arith.mulf %151, %150 : vector<8x128xf32>
    %153 = math.tanh %152 : vector<8x128xf32>
    %cst_69 = arith.constant 5.000000e-01 : f32
    %154 = vector.broadcast %cst_69 : f32 to vector<8x128xf32>
    %155 = arith.mulf %154, %153 : vector<8x128xf32>
    %cst_70 = arith.constant 5.000000e-01 : f32
    %156 = vector.broadcast %cst_70 : f32 to vector<8x128xf32>
    %157 = arith.addf %155, %156 : vector<8x128xf32>
    %158 = vector.extract_strided_slice %141 {offsets = [0, 256], sizes = [8, 128], strides = [1, 1]} : vector<8x512xf32> to vector<8x128xf32>
    %159 = math.tanh %158 : vector<8x128xf32>
    %160 = vector.extract_strided_slice %141 {offsets = [0, 384], sizes = [8, 128], strides = [1, 1]} : vector<8x512xf32> to vector<8x128xf32>
    %cst_71 = arith.constant 5.000000e-01 : f32
    %161 = vector.broadcast %cst_71 : f32 to vector<8x128xf32>
    %162 = arith.mulf %161, %160 : vector<8x128xf32>
    %163 = math.tanh %162 : vector<8x128xf32>
    %cst_72 = arith.constant 5.000000e-01 : f32
    %164 = vector.broadcast %cst_72 : f32 to vector<8x128xf32>
    %165 = arith.mulf %164, %163 : vector<8x128xf32>
    %cst_73 = arith.constant 5.000000e-01 : f32
    %166 = vector.broadcast %cst_73 : f32 to vector<8x128xf32>
    %167 = arith.addf %165, %166 : vector<8x128xf32>
    %168 = arith.mulf %157, %128 : vector<8x128xf32>
    %169 = arith.mulf %149, %159 : vector<8x128xf32>
    %170 = arith.addf %168, %169 : vector<8x128xf32>
    %171 = math.tanh %170 : vector<8x128xf32>
    %172 = arith.mulf %167, %171 : vector<8x128xf32>
    %173 = arith.truncf %172 : vector<8x128xf32> to vector<8x128xbf16>
    %c4_i32 = arith.constant 4 : i32
    %174 = arith.index_cast %c4_i32 : i32 to index
    %c0_74 = arith.constant 0 : index
    %c0_75 = arith.constant 0 : index
    %175 = vector.load %arg2[%174, %c0_74, %c0_75] : memref<8x8x128xbf16, #tpu.memory_space<vmem>>, vector<1x8x128xbf16>
    %176 = vector.shape_cast %175 : vector<1x8x128xbf16> to vector<8x128xbf16>
    %c0_76 = arith.constant 0 : index
    %c0_77 = arith.constant 0 : index
    %177 = vector.load %arg3[%c0_76, %c0_77] : memref<128x512xbf16, #tpu.memory_space<vmem>>, vector<128x512xbf16>
    %cst_78 = arith.constant dense<0.000000e+00> : vector<8x512xf32>
    %178 = tpu.matmul %176, %177, %cst_78 {dimension_numbers = #tpu.dot_dimension_numbers<[1], [0], [0], [1], [0, 0, 1, 1], [], []>} : vector<8x128xbf16>, vector<128x512xbf16>, vector<8x512xf32> -> vector<8x512xf32>
    %c0_79 = arith.constant 0 : index
    %c0_80 = arith.constant 0 : index
    %179 = vector.load %arg4[%c0_79, %c0_80] : memref<128x512xbf16, #tpu.memory_space<vmem>>, vector<128x512xbf16>
    %cst_81 = arith.constant dense<0.000000e+00> : vector<8x512xf32>
    %180 = tpu.matmul %173, %179, %cst_81 {dimension_numbers = #tpu.dot_dimension_numbers<[1], [0], [0], [1], [0, 0, 1, 1], [], []>} : vector<8x128xbf16>, vector<128x512xbf16>, vector<8x512xf32> -> vector<8x512xf32>
    %181 = arith.addf %178, %180 : vector<8x512xf32>
    %182 = vector.broadcast %3 : vector<1x512xf32> to vector<8x512xf32>
    %183 = arith.addf %181, %182 : vector<8x512xf32>
    %184 = vector.extract_strided_slice %183 {offsets = [0, 0], sizes = [8, 128], strides = [1, 1]} : vector<8x512xf32> to vector<8x128xf32>
    %cst_82 = arith.constant 5.000000e-01 : f32
    %185 = vector.broadcast %cst_82 : f32 to vector<8x128xf32>
    %186 = arith.mulf %185, %184 : vector<8x128xf32>
    %187 = math.tanh %186 : vector<8x128xf32>
    %cst_83 = arith.constant 5.000000e-01 : f32
    %188 = vector.broadcast %cst_83 : f32 to vector<8x128xf32>
    %189 = arith.mulf %188, %187 : vector<8x128xf32>
    %cst_84 = arith.constant 5.000000e-01 : f32
    %190 = vector.broadcast %cst_84 : f32 to vector<8x128xf32>
    %191 = arith.addf %189, %190 : vector<8x128xf32>
    %192 = vector.extract_strided_slice %183 {offsets = [0, 128], sizes = [8, 128], strides = [1, 1]} : vector<8x512xf32> to vector<8x128xf32>
    %cst_85 = arith.constant 5.000000e-01 : f32
    %193 = vector.broadcast %cst_85 : f32 to vector<8x128xf32>
    %194 = arith.mulf %193, %192 : vector<8x128xf32>
    %195 = math.tanh %194 : vector<8x128xf32>
    %cst_86 = arith.constant 5.000000e-01 : f32
    %196 = vector.broadcast %cst_86 : f32 to vector<8x128xf32>
    %197 = arith.mulf %196, %195 : vector<8x128xf32>
    %cst_87 = arith.constant 5.000000e-01 : f32
    %198 = vector.broadcast %cst_87 : f32 to vector<8x128xf32>
    %199 = arith.addf %197, %198 : vector<8x128xf32>
    %200 = vector.extract_strided_slice %183 {offsets = [0, 256], sizes = [8, 128], strides = [1, 1]} : vector<8x512xf32> to vector<8x128xf32>
    %201 = math.tanh %200 : vector<8x128xf32>
    %202 = vector.extract_strided_slice %183 {offsets = [0, 384], sizes = [8, 128], strides = [1, 1]} : vector<8x512xf32> to vector<8x128xf32>
    %cst_88 = arith.constant 5.000000e-01 : f32
    %203 = vector.broadcast %cst_88 : f32 to vector<8x128xf32>
    %204 = arith.mulf %203, %202 : vector<8x128xf32>
    %205 = math.tanh %204 : vector<8x128xf32>
    %cst_89 = arith.constant 5.000000e-01 : f32
    %206 = vector.broadcast %cst_89 : f32 to vector<8x128xf32>
    %207 = arith.mulf %206, %205 : vector<8x128xf32>
    %cst_90 = arith.constant 5.000000e-01 : f32
    %208 = vector.broadcast %cst_90 : f32 to vector<8x128xf32>
    %209 = arith.addf %207, %208 : vector<8x128xf32>
    %210 = arith.mulf %199, %170 : vector<8x128xf32>
    %211 = arith.mulf %191, %201 : vector<8x128xf32>
    %212 = arith.addf %210, %211 : vector<8x128xf32>
    %213 = math.tanh %212 : vector<8x128xf32>
    %214 = arith.mulf %209, %213 : vector<8x128xf32>
    %215 = arith.truncf %214 : vector<8x128xf32> to vector<8x128xbf16>
    %c5_i32 = arith.constant 5 : i32
    %216 = arith.index_cast %c5_i32 : i32 to index
    %c0_91 = arith.constant 0 : index
    %c0_92 = arith.constant 0 : index
    %217 = vector.load %arg2[%216, %c0_91, %c0_92] : memref<8x8x128xbf16, #tpu.memory_space<vmem>>, vector<1x8x128xbf16>
    %218 = vector.shape_cast %217 : vector<1x8x128xbf16> to vector<8x128xbf16>
    %c0_93 = arith.constant 0 : index
    %c0_94 = arith.constant 0 : index
    %219 = vector.load %arg3[%c0_93, %c0_94] : memref<128x512xbf16, #tpu.memory_space<vmem>>, vector<128x512xbf16>
    %cst_95 = arith.constant dense<0.000000e+00> : vector<8x512xf32>
    %220 = tpu.matmul %218, %219, %cst_95 {dimension_numbers = #tpu.dot_dimension_numbers<[1], [0], [0], [1], [0, 0, 1, 1], [], []>} : vector<8x128xbf16>, vector<128x512xbf16>, vector<8x512xf32> -> vector<8x512xf32>
    %c0_96 = arith.constant 0 : index
    %c0_97 = arith.constant 0 : index
    %221 = vector.load %arg4[%c0_96, %c0_97] : memref<128x512xbf16, #tpu.memory_space<vmem>>, vector<128x512xbf16>
    %cst_98 = arith.constant dense<0.000000e+00> : vector<8x512xf32>
    %222 = tpu.matmul %215, %221, %cst_98 {dimension_numbers = #tpu.dot_dimension_numbers<[1], [0], [0], [1], [0, 0, 1, 1], [], []>} : vector<8x128xbf16>, vector<128x512xbf16>, vector<8x512xf32> -> vector<8x512xf32>
    %223 = arith.addf %220, %222 : vector<8x512xf32>
    %224 = vector.broadcast %3 : vector<1x512xf32> to vector<8x512xf32>
    %225 = arith.addf %223, %224 : vector<8x512xf32>
    %226 = vector.extract_strided_slice %225 {offsets = [0, 0], sizes = [8, 128], strides = [1, 1]} : vector<8x512xf32> to vector<8x128xf32>
    %cst_99 = arith.constant 5.000000e-01 : f32
    %227 = vector.broadcast %cst_99 : f32 to vector<8x128xf32>
    %228 = arith.mulf %227, %226 : vector<8x128xf32>
    %229 = math.tanh %228 : vector<8x128xf32>
    %cst_100 = arith.constant 5.000000e-01 : f32
    %230 = vector.broadcast %cst_100 : f32 to vector<8x128xf32>
    %231 = arith.mulf %230, %229 : vector<8x128xf32>
    %cst_101 = arith.constant 5.000000e-01 : f32
    %232 = vector.broadcast %cst_101 : f32 to vector<8x128xf32>
    %233 = arith.addf %231, %232 : vector<8x128xf32>
    %234 = vector.extract_strided_slice %225 {offsets = [0, 128], sizes = [8, 128], strides = [1, 1]} : vector<8x512xf32> to vector<8x128xf32>
    %cst_102 = arith.constant 5.000000e-01 : f32
    %235 = vector.broadcast %cst_102 : f32 to vector<8x128xf32>
    %236 = arith.mulf %235, %234 : vector<8x128xf32>
    %237 = math.tanh %236 : vector<8x128xf32>
    %cst_103 = arith.constant 5.000000e-01 : f32
    %238 = vector.broadcast %cst_103 : f32 to vector<8x128xf32>
    %239 = arith.mulf %238, %237 : vector<8x128xf32>
    %cst_104 = arith.constant 5.000000e-01 : f32
    %240 = vector.broadcast %cst_104 : f32 to vector<8x128xf32>
    %241 = arith.addf %239, %240 : vector<8x128xf32>
    %242 = vector.extract_strided_slice %225 {offsets = [0, 256], sizes = [8, 128], strides = [1, 1]} : vector<8x512xf32> to vector<8x128xf32>
    %243 = math.tanh %242 : vector<8x128xf32>
    %244 = vector.extract_strided_slice %225 {offsets = [0, 384], sizes = [8, 128], strides = [1, 1]} : vector<8x512xf32> to vector<8x128xf32>
    %cst_105 = arith.constant 5.000000e-01 : f32
    %245 = vector.broadcast %cst_105 : f32 to vector<8x128xf32>
    %246 = arith.mulf %245, %244 : vector<8x128xf32>
    %247 = math.tanh %246 : vector<8x128xf32>
    %cst_106 = arith.constant 5.000000e-01 : f32
    %248 = vector.broadcast %cst_106 : f32 to vector<8x128xf32>
    %249 = arith.mulf %248, %247 : vector<8x128xf32>
    %cst_107 = arith.constant 5.000000e-01 : f32
    %250 = vector.broadcast %cst_107 : f32 to vector<8x128xf32>
    %251 = arith.addf %249, %250 : vector<8x128xf32>
    %252 = arith.mulf %241, %212 : vector<8x128xf32>
    %253 = arith.mulf %233, %243 : vector<8x128xf32>
    %254 = arith.addf %252, %253 : vector<8x128xf32>
    %255 = math.tanh %254 : vector<8x128xf32>
    %256 = arith.mulf %251, %255 : vector<8x128xf32>
    %257 = arith.truncf %256 : vector<8x128xf32> to vector<8x128xbf16>
    %c6_i32 = arith.constant 6 : i32
    %258 = arith.index_cast %c6_i32 : i32 to index
    %c0_108 = arith.constant 0 : index
    %c0_109 = arith.constant 0 : index
    %259 = vector.load %arg2[%258, %c0_108, %c0_109] : memref<8x8x128xbf16, #tpu.memory_space<vmem>>, vector<1x8x128xbf16>
    %260 = vector.shape_cast %259 : vector<1x8x128xbf16> to vector<8x128xbf16>
    %c0_110 = arith.constant 0 : index
    %c0_111 = arith.constant 0 : index
    %261 = vector.load %arg3[%c0_110, %c0_111] : memref<128x512xbf16, #tpu.memory_space<vmem>>, vector<128x512xbf16>
    %cst_112 = arith.constant dense<0.000000e+00> : vector<8x512xf32>
    %262 = tpu.matmul %260, %261, %cst_112 {dimension_numbers = #tpu.dot_dimension_numbers<[1], [0], [0], [1], [0, 0, 1, 1], [], []>} : vector<8x128xbf16>, vector<128x512xbf16>, vector<8x512xf32> -> vector<8x512xf32>
    %c0_113 = arith.constant 0 : index
    %c0_114 = arith.constant 0 : index
    %263 = vector.load %arg4[%c0_113, %c0_114] : memref<128x512xbf16, #tpu.memory_space<vmem>>, vector<128x512xbf16>
    %cst_115 = arith.constant dense<0.000000e+00> : vector<8x512xf32>
    %264 = tpu.matmul %257, %263, %cst_115 {dimension_numbers = #tpu.dot_dimension_numbers<[1], [0], [0], [1], [0, 0, 1, 1], [], []>} : vector<8x128xbf16>, vector<128x512xbf16>, vector<8x512xf32> -> vector<8x512xf32>
    %265 = arith.addf %262, %264 : vector<8x512xf32>
    %266 = vector.broadcast %3 : vector<1x512xf32> to vector<8x512xf32>
    %267 = arith.addf %265, %266 : vector<8x512xf32>
    %268 = vector.extract_strided_slice %267 {offsets = [0, 0], sizes = [8, 128], strides = [1, 1]} : vector<8x512xf32> to vector<8x128xf32>
    %cst_116 = arith.constant 5.000000e-01 : f32
    %269 = vector.broadcast %cst_116 : f32 to vector<8x128xf32>
    %270 = arith.mulf %269, %268 : vector<8x128xf32>
    %271 = math.tanh %270 : vector<8x128xf32>
    %cst_117 = arith.constant 5.000000e-01 : f32
    %272 = vector.broadcast %cst_117 : f32 to vector<8x128xf32>
    %273 = arith.mulf %272, %271 : vector<8x128xf32>
    %cst_118 = arith.constant 5.000000e-01 : f32
    %274 = vector.broadcast %cst_118 : f32 to vector<8x128xf32>
    %275 = arith.addf %273, %274 : vector<8x128xf32>
    %276 = vector.extract_strided_slice %267 {offsets = [0, 128], sizes = [8, 128], strides = [1, 1]} : vector<8x512xf32> to vector<8x128xf32>
    %cst_119 = arith.constant 5.000000e-01 : f32
    %277 = vector.broadcast %cst_119 : f32 to vector<8x128xf32>
    %278 = arith.mulf %277, %276 : vector<8x128xf32>
    %279 = math.tanh %278 : vector<8x128xf32>
    %cst_120 = arith.constant 5.000000e-01 : f32
    %280 = vector.broadcast %cst_120 : f32 to vector<8x128xf32>
    %281 = arith.mulf %280, %279 : vector<8x128xf32>
    %cst_121 = arith.constant 5.000000e-01 : f32
    %282 = vector.broadcast %cst_121 : f32 to vector<8x128xf32>
    %283 = arith.addf %281, %282 : vector<8x128xf32>
    %284 = vector.extract_strided_slice %267 {offsets = [0, 256], sizes = [8, 128], strides = [1, 1]} : vector<8x512xf32> to vector<8x128xf32>
    %285 = math.tanh %284 : vector<8x128xf32>
    %286 = vector.extract_strided_slice %267 {offsets = [0, 384], sizes = [8, 128], strides = [1, 1]} : vector<8x512xf32> to vector<8x128xf32>
    %cst_122 = arith.constant 5.000000e-01 : f32
    %287 = vector.broadcast %cst_122 : f32 to vector<8x128xf32>
    %288 = arith.mulf %287, %286 : vector<8x128xf32>
    %289 = math.tanh %288 : vector<8x128xf32>
    %cst_123 = arith.constant 5.000000e-01 : f32
    %290 = vector.broadcast %cst_123 : f32 to vector<8x128xf32>
    %291 = arith.mulf %290, %289 : vector<8x128xf32>
    %cst_124 = arith.constant 5.000000e-01 : f32
    %292 = vector.broadcast %cst_124 : f32 to vector<8x128xf32>
    %293 = arith.addf %291, %292 : vector<8x128xf32>
    %294 = arith.mulf %283, %254 : vector<8x128xf32>
    %295 = arith.mulf %275, %285 : vector<8x128xf32>
    %296 = arith.addf %294, %295 : vector<8x128xf32>
    %297 = math.tanh %296 : vector<8x128xf32>
    %298 = arith.mulf %293, %297 : vector<8x128xf32>
    %299 = arith.truncf %298 : vector<8x128xf32> to vector<8x128xbf16>
    %c7_i32 = arith.constant 7 : i32
    %300 = arith.index_cast %c7_i32 : i32 to index
    %c0_125 = arith.constant 0 : index
    %c0_126 = arith.constant 0 : index
    %301 = vector.load %arg2[%300, %c0_125, %c0_126] : memref<8x8x128xbf16, #tpu.memory_space<vmem>>, vector<1x8x128xbf16>
    %302 = vector.shape_cast %301 : vector<1x8x128xbf16> to vector<8x128xbf16>
    %c0_127 = arith.constant 0 : index
    %c0_128 = arith.constant 0 : index
    %303 = vector.load %arg3[%c0_127, %c0_128] : memref<128x512xbf16, #tpu.memory_space<vmem>>, vector<128x512xbf16>
    %cst_129 = arith.constant dense<0.000000e+00> : vector<8x512xf32>
    %304 = tpu.matmul %302, %303, %cst_129 {dimension_numbers = #tpu.dot_dimension_numbers<[1], [0], [0], [1], [0, 0, 1, 1], [], []>} : vector<8x128xbf16>, vector<128x512xbf16>, vector<8x512xf32> -> vector<8x512xf32>
    %c0_130 = arith.constant 0 : index
    %c0_131 = arith.constant 0 : index
    %305 = vector.load %arg4[%c0_130, %c0_131] : memref<128x512xbf16, #tpu.memory_space<vmem>>, vector<128x512xbf16>
    %cst_132 = arith.constant dense<0.000000e+00> : vector<8x512xf32>
    %306 = tpu.matmul %299, %305, %cst_132 {dimension_numbers = #tpu.dot_dimension_numbers<[1], [0], [0], [1], [0, 0, 1, 1], [], []>} : vector<8x128xbf16>, vector<128x512xbf16>, vector<8x512xf32> -> vector<8x512xf32>
    %307 = arith.addf %304, %306 : vector<8x512xf32>
    %308 = vector.broadcast %3 : vector<1x512xf32> to vector<8x512xf32>
    %309 = arith.addf %307, %308 : vector<8x512xf32>
    %310 = vector.extract_strided_slice %309 {offsets = [0, 0], sizes = [8, 128], strides = [1, 1]} : vector<8x512xf32> to vector<8x128xf32>
    %cst_133 = arith.constant 5.000000e-01 : f32
    %311 = vector.broadcast %cst_133 : f32 to vector<8x128xf32>
    %312 = arith.mulf %311, %310 : vector<8x128xf32>
    %313 = math.tanh %312 : vector<8x128xf32>
    %cst_134 = arith.constant 5.000000e-01 : f32
    %314 = vector.broadcast %cst_134 : f32 to vector<8x128xf32>
    %315 = arith.mulf %314, %313 : vector<8x128xf32>
    %cst_135 = arith.constant 5.000000e-01 : f32
    %316 = vector.broadcast %cst_135 : f32 to vector<8x128xf32>
    %317 = arith.addf %315, %316 : vector<8x128xf32>
    %318 = vector.extract_strided_slice %309 {offsets = [0, 128], sizes = [8, 128], strides = [1, 1]} : vector<8x512xf32> to vector<8x128xf32>
    %cst_136 = arith.constant 5.000000e-01 : f32
    %319 = vector.broadcast %cst_136 : f32 to vector<8x128xf32>
    %320 = arith.mulf %319, %318 : vector<8x128xf32>
    %321 = math.tanh %320 : vector<8x128xf32>
    %cst_137 = arith.constant 5.000000e-01 : f32
    %322 = vector.broadcast %cst_137 : f32 to vector<8x128xf32>
    %323 = arith.mulf %322, %321 : vector<8x128xf32>
    %cst_138 = arith.constant 5.000000e-01 : f32
    %324 = vector.broadcast %cst_138 : f32 to vector<8x128xf32>
    %325 = arith.addf %323, %324 : vector<8x128xf32>
    %326 = vector.extract_strided_slice %309 {offsets = [0, 256], sizes = [8, 128], strides = [1, 1]} : vector<8x512xf32> to vector<8x128xf32>
    %327 = math.tanh %326 : vector<8x128xf32>
    %328 = vector.extract_strided_slice %309 {offsets = [0, 384], sizes = [8, 128], strides = [1, 1]} : vector<8x512xf32> to vector<8x128xf32>
    %cst_139 = arith.constant 5.000000e-01 : f32
    %329 = vector.broadcast %cst_139 : f32 to vector<8x128xf32>
    %330 = arith.mulf %329, %328 : vector<8x128xf32>
    %331 = math.tanh %330 : vector<8x128xf32>
    %cst_140 = arith.constant 5.000000e-01 : f32
    %332 = vector.broadcast %cst_140 : f32 to vector<8x128xf32>
    %333 = arith.mulf %332, %331 : vector<8x128xf32>
    %cst_141 = arith.constant 5.000000e-01 : f32
    %334 = vector.broadcast %cst_141 : f32 to vector<8x128xf32>
    %335 = arith.addf %333, %334 : vector<8x128xf32>
    %336 = arith.mulf %325, %296 : vector<8x128xf32>
    %337 = arith.mulf %317, %327 : vector<8x128xf32>
    %338 = arith.addf %336, %337 : vector<8x128xf32>
    %339 = math.tanh %338 : vector<8x128xf32>
    %340 = arith.mulf %335, %339 : vector<8x128xf32>
    %341 = arith.truncf %340 : vector<8x128xf32> to vector<8x128xbf16>
    %c8_i32 = arith.constant 8 : i32
    %c0_142 = arith.constant 0 : index
    %c0_143 = arith.constant 0 : index
    %342 = vector.load %arg9[%c0_142, %c0_143] : memref<8x128xbf16, #tpu.memory_space<vmem>>, vector<8x128xbf16>
    tpu.vector_store %arg9[%c0_142, %c0_143], %341 {strides = array<i32>} : memref<8x128xbf16, #tpu.memory_space<vmem>>, vector<8x128xbf16>,
    %c0_144 = arith.constant 0 : index
    %c0_145 = arith.constant 0 : index
    %343 = vector.load %arg10[%c0_144, %c0_145] : memref<8x128xf32, #tpu.memory_space<vmem>>, vector<8x128xf32>
    tpu.vector_store %arg10[%c0_144, %c0_145], %338 {strides = array<i32>} : memref<8x128xf32, #tpu.memory_space<vmem>>, vector<8x128xf32>,
    %c0_i32_146 = arith.constant 0 : i32
    %344 = arith.cmpi eq, %arg1, %c0_i32_146 : i32
    %345 = arith.extui %344 : i1 to i32
    %c0_i32_147 = arith.constant 0 : i32
    %346 = arith.cmpi ne, %345, %c0_i32_147 : i32
    scf.if %346 {
      %c0_148 = arith.constant 0 : index
      %c0_149 = arith.constant 0 : index
      %347 = vector.load %arg6[%c0_148, %c0_149] : memref<128x128xbf16, #tpu.memory_space<vmem>>, vector<128x128xbf16>
      %cst_150 = arith.constant dense<0.000000e+00> : vector<8x128xf32>
      %348 = tpu.matmul %341, %347, %cst_150 {dimension_numbers = #tpu.dot_dimension_numbers<[1], [0], [0], [1], [0, 0, 1, 1], [], []>} : vector<8x128xbf16>, vector<128x128xbf16>, vector<8x128xf32> -> vector<8x128xf32>
      %c0_151 = arith.constant 0 : index
      %c0_152 = arith.constant 0 : index
      %349 = vector.load %arg7[%c0_151, %c0_152] : memref<1x128xf32, #tpu.memory_space<vmem>>, vector<1x128xf32>
      %350 = vector.broadcast %349 : vector<1x128xf32> to vector<8x128xf32>
      %351 = arith.addf %348, %350 : vector<8x128xf32>
      %c0_153 = arith.constant 0 : index
      %c0_154 = arith.constant 0 : index
      %352 = vector.load %arg8[%c0_153, %c0_154] : memref<8x128xf32, #tpu.memory_space<vmem>>, vector<8x128xf32>
      tpu.vector_store %arg8[%c0_153, %c0_154], %351 {strides = array<i32>} : memref<8x128xf32, #tpu.memory_space<vmem>>, vector<8x128xf32>,
    } else {
    }
    return
  }
  func.func @transform_0(%arg0: i32, %arg1: i32) -> (i32, i32, i32) {
    %c0_i32 = arith.constant 0 : i32
    %c0_i32_0 = arith.constant 0 : i32
    return %arg1, %arg0, %c0_i32 : i32, i32, i32
  }
  func.func @transform_1(%arg0: i32, %arg1: i32) -> (i32, i32) {
    %c0_i32 = arith.constant 0 : i32
    %c0_i32_0 = arith.constant 0 : i32
    %c0_i32_1 = arith.constant 0 : i32
    return %c0_i32, %c0_i32_0 : i32, i32
  }
  func.func @transform_2(%arg0: i32, %arg1: i32) -> (i32, i32) {
    %c0_i32 = arith.constant 0 : i32
    %c0_i32_0 = arith.constant 0 : i32
    %c0_i32_1 = arith.constant 0 : i32
    return %c0_i32, %c0_i32_0 : i32, i32
  }
  func.func @transform_3(%arg0: i32, %arg1: i32) -> (i32, i32) {
    %c0_i32 = arith.constant 0 : i32
    %c0_i32_0 = arith.constant 0 : i32
    %c0_i32_1 = arith.constant 0 : i32
    return %c0_i32, %c0_i32_0 : i32, i32
  }
  func.func @transform_4(%arg0: i32, %arg1: i32) -> (i32, i32) {
    %c0_i32 = arith.constant 0 : i32
    %c0_i32_0 = arith.constant 0 : i32
    %c0_i32_1 = arith.constant 0 : i32
    return %c0_i32, %c0_i32_0 : i32, i32
  }
  func.func @transform_5(%arg0: i32, %arg1: i32) -> (i32, i32) {
    %c0_i32 = arith.constant 0 : i32
    %c0_i32_0 = arith.constant 0 : i32
    %c0_i32_1 = arith.constant 0 : i32
    return %c0_i32, %c0_i32_0 : i32, i32
  }
  func.func @transform_6(%arg0: i32, %arg1: i32) -> (i32, i32) {
    %c0_i32 = arith.constant 0 : i32
    %c0_i32_0 = arith.constant 0 : i32
    return %arg0, %c0_i32 : i32, i32
  }
}

</mosaic_0001>

<bundles_post_ra>
// kernel: rnn_forward.3
= control target key start
LH: loop header
LB: loop body
LE: loop exit
PB: predicated region body
PF: predicated region fallthrough
CT: control target
= control target key end

     0   :  { %v3785_v1 = vmov 0   ;;  %vm2432_vm0 = vmmov 0   ;;  %s3778_s2 = inlined_call_operand.vmem [shape: bf16[128,512], index: 2, kind: input, shape index: {}]   ;;  %s3779_s1 = inlined_call_operand.vmem [shape: bf16[128,512], index: 1, kind: input, shape index: {}]   ;;  %s3780_s0 = inlined_call_operand.vmem [shape: bf16[8,8,128], index: 0, kind: input, shape index: {}]   ;;  %s3781_s3 = inlined_call_operand.vmem [shape: f32[1,512], index: 3, kind: input, shape index: {}]   ;;  %s3782_s4 = inlined_call_operand.vmem [shape: bf16[128,128], index: 4, kind: input, shape index: {}]   ;;  %s3783_s5 = inlined_call_operand.vmem [shape: f32[1,128], index: 5, kind: input, shape index: {}]   ;;  %s3784_s6 = inlined_call_operand.vmem [shape: f32[8,128], index: 6, kind: output, shape index: {}]  }
   0x1   :  { %v2471_v0 = vld [vmem:[%s3778_s2 + $0x4] ss:$16 sps:$4 sm:$0xff]   ;;  %290 = vmatprep.mubr.bf16.mxu0 %v3785_v1  ;;  %28 = vst [vmem:[#allocation2] sm:$0xf] %v3785_v1  ;;  %331 = vmatprep.mubr.bf16.mxu1 %v3785_v1  ;;  %v2479_v2 = vld [vmem:[%s3778_s2 + $0xc] ss:$16 sps:$4 sm:$0xff]  }
   0x2   :  { %258 = vmatprep.subr.bf16.mxu0 %v2471_v0  ;;  %v2485_v3 = vld [vmem:[%s3778_s2] ss:$16 sps:$4 sm:$0xff]   ;;  %v2490_v4 = vld [vmem:[%s3778_s2 + $0x8] ss:$16 sps:$4 sm:$0xff]   ;;  %299 = vmatprep.subr.bf16.mxu1 %v2479_v2  ;;  %v2496_v5 = vld [vmem:[%s3778_s2 + $0x24] ss:$16 sps:$4 sm:$0xff]  }
   0x3   :  { %259 = vmatpush1.bf16.msra.mxu0 %v2485_v3  ;;  %300 = vmatpush1.bf16.msra.mxu1 %v2490_v4  ;;  %v2503_v6 = vld [vmem:[%s3778_s2 + $0x2c] ss:$16 sps:$4 sm:$0xff]   ;;  %v2508_v7 = vld [vmem:[%s3778_s2 + $0x20] ss:$16 sps:$4 sm:$0xff]   ;;  %v2514_v8 = vld [vmem:[%s3778_s2 + $0x28] ss:$16 sps:$4 sm:$0xff]  }
   0x4   :  { %3889 = vst [vmem:[#allocation4_spill] sm:$0xff] %v2508_v7  ;;  %260 = vmatprep.subr.bf16.mxu0 %v2496_v5  ;;  %3890 = vst [vmem:[#allocation5_spill] sm:$0xff] %v2514_v8  ;;  %301 = vmatprep.subr.bf16.mxu1 %v2503_v6  ;;  %v2520_v9 = vld [vmem:[%s3778_s2 + $0x44] ss:$16 sps:$4 sm:$0xff]   ;;  %v2525_v10 = vld [vmem:[%s3778_s2 + $0x4c] ss:$16 sps:$4 sm:$0xff]  }
   0x5   :  { %3891 = vst [vmem:[#allocation6_spill] sm:$0xff] %v2520_v9  ;;  %3892 = vst [vmem:[#allocation7_spill] sm:$0xff] %v2525_v10  ;;  %v2530_v11 = vld [vmem:[%s3778_s2 + $0x40] ss:$16 sps:$4 sm:$0xff]   ;;  %v2535_v12 = vld [vmem:[%s3778_s2 + $0x48] ss:$16 sps:$4 sm:$0xff]  }
   0x6   :  { %3893 = vst [vmem:[#allocation8_spill] sm:$0xff] %v2530_v11  ;;  %3894 = vst [vmem:[#allocation9_spill] sm:$0xff] %v2535_v12  ;;  %v2542_v13 = vld [vmem:[%s3778_s2 + $0x64] ss:$16 sps:$4 sm:$0xff]   ;;  %v2549_v14 = vld [vmem:[%s3778_s2 + $0x6c] ss:$16 sps:$4 sm:$0xff]  }
   0x7   :  { %261 = vmatpush1.bf16.msra.mxu0 %v2508_v7  ;;  %302 = vmatpush1.bf16.msra.mxu1 %v2514_v8  ;;  %3895 = vst [vmem:[#allocation10_spill] sm:$0xff] %v2542_v13  ;;  %3896 = vst [vmem:[#allocation11_spill] sm:$0xff] %v2549_v14  ;;  %v2554_v15 = vld [vmem:[%s3778_s2 + $0x60] ss:$16 sps:$4 sm:$0xff]   ;;  %v2561_v16 = vld [vmem:[%s3778_s2 + $0x68] ss:$16 sps:$4 sm:$0xff]  }
   0x8   :  { %262 = vmatprep.subr.bf16.mxu0 %v2520_v9  ;;  %303 = vmatprep.subr.bf16.mxu1 %v2525_v10  ;;  %3897 = vst [vmem:[#allocation12_spill] sm:$0xff] %v2554_v15  ;;  %3898 = vst [vmem:[#allocation13_spill] sm:$0xff] %v2561_v16  ;;  %v2566_v17 = vld [vmem:[%s3778_s2 + $0x84] ss:$16 sps:$4 sm:$0xff]   ;;  %v2573_v18 = vld [vmem:[%s3778_s2 + $0x8c] ss:$16 sps:$4 sm:$0xff]  }
   0x9   :  { %3899 = vst [vmem:[#allocation14_spill] sm:$0xff] %v2566_v17  ;;  %3900 = vst [vmem:[#allocation15_spill] sm:$0xff] %v2573_v18  ;;  %v2578_v19 = vld [vmem:[%s3778_s2 + $0x80] ss:$16 sps:$4 sm:$0xff]   ;;  %v2583_v20 = vld [vmem:[%s3778_s2 + $0x88] ss:$16 sps:$4 sm:$0xff]  }
   0xa   :  { %3901 = vst [vmem:[#allocation16_spill] sm:$0xff] %v2578_v19  ;;  %3902 = vst [vmem:[#allocation17_spill] sm:$0xff] %v2583_v20  ;;  %v2590_v21 = vld [vmem:[%s3778_s2 + $0xa4] ss:$16 sps:$4 sm:$0xff]   ;;  %v2597_v22 = vld [vmem:[%s3778_s2 + $0xac] ss:$16 sps:$4 sm:$0xff]  }
   0xb   :  { %263 = vmatpush1.bf16.msra.mxu0 %v2530_v11  ;;  %304 = vmatpush1.bf16.msra.mxu1 %v2535_v12  ;;  %3903 = vst [vmem:[#allocation18_spill] sm:$0xff] %v2590_v21  ;;  %3904 = vst [vmem:[#allocation19_spill] sm:$0xff] %v2597_v22  ;;  %v2604_v23 = vld [vmem:[%s3778_s2 + $0xa0] ss:$16 sps:$4 sm:$0xff]   ;;  %v2609_v24 = vld [vmem:[%s3778_s2 + $0xa8] ss:$16 sps:$4 sm:$0xff]  }
   0xc   :  { %264 = vmatprep.subr.bf16.mxu0 %v2542_v13  ;;  %305 = vmatprep.subr.bf16.mxu1 %v2549_v14  ;;  %3905 = vst [vmem:[#allocation20_spill] sm:$0xff] %v2604_v23  ;;  %3906 = vst [vmem:[#allocation21_spill] sm:$0xff] %v2609_v24  ;;  %v2616_v25 = vld [vmem:[%s3778_s2 + $0xc4] ss:$16 sps:$4 sm:$0xff]   ;;  %v2621_v26 = vld [vmem:[%s3778_s2 + $0xcc] ss:$16 sps:$4 sm:$0xff]  }
   0xd   :  { %3907 = vst [vmem:[#allocation22_spill] sm:$0xff] %v2616_v25  ;;  %3908 = vst [vmem:[#allocation23_spill] sm:$0xff] %v2621_v26  ;;  %v2626_v27 = vld [vmem:[%s3778_s2 + $0xc0] ss:$16 sps:$4 sm:$0xff]   ;;  %v2631_v28 = vld [vmem:[%s3778_s2 + $0xc8] ss:$16 sps:$4 sm:$0xff]  }
   0xe   :  { %3909 = vst [vmem:[#allocation24_spill] sm:$0xff] %v2626_v27  ;;  %3910 = vst [vmem:[#allocation25_spill] sm:$0xff] %v2631_v28  ;;  %v2638_v29 = vld [vmem:[%s3778_s2 + $0xe4] ss:$16 sps:$4 sm:$0xff]   ;;  %v2645_v30 = vld [vmem:[%s3778_s2 + $0xec] ss:$16 sps:$4 sm:$0xff]  }
   0xf   :  { %265 = vmatpush1.bf16.msra.mxu0 %v2554_v15  ;;  %306 = vmatpush1.bf16.msra.mxu1 %v2561_v16  ;;  %3911 = vst [vmem:[#allocation26_spill] sm:$0xff] %v2638_v29  ;;  %3912 = vst [vmem:[#allocation27_spill] sm:$0xff] %v2645_v30  ;;  %v2650_v31 = vld [vmem:[%s3778_s2 + $0xe0] ss:$16 sps:$4 sm:$0xff]   ;;  %v2657_v32 = vld [vmem:[%s3778_s2 + $0xe8] ss:$16 sps:$4 sm:$0xff]  }
  0x10   :  { %266 = vmatprep.subr.bf16.mxu0 %v2566_v17  ;;  %307 = vmatprep.subr.bf16.mxu1 %v2573_v18  ;;  %3913 = vst [vmem:[#allocation28_spill] sm:$0xff] %v2650_v31  ;;  %3914 = vst [vmem:[#allocation29_spill] sm:$0xff] %v2657_v32  ;;  %v2664_v33 = vld [vmem:[%s3779_s1 + $0x4] ss:$16 sps:$4 sm:$0xff]   ;;  %v2669_v34 = vld [vmem:[%s3779_s1 + $0xc] ss:$16 sps:$4 sm:$0xff]  }
  0x11   :  { %3915 = vst [vmem:[#allocation30_spill] sm:$0xff] %v2664_v33  ;;  %3916 = vst [vmem:[#allocation31_spill] sm:$0xff] %v2669_v34  ;;  %v31_v35 = vld [vmem:[#allocation2] sm:$0xf]  ;;  %v2679_v37 = vld [vmem:[%s3779_s1 + $0x8] ss:$16 sps:$4 sm:$0xff]  }
  0x12   :  { %v2674_v36 = vld [vmem:[%s3779_s1] ss:$16 sps:$4 sm:$0xff]   ;;  %v2686_v38 = vld [vmem:[%s3779_s1 + $0x24] ss:$16 sps:$4 sm:$0xff]   ;;  %v2693_v39 = vld [vmem:[%s3779_s1 + $0x2c] ss:$16 sps:$4 sm:$0xff]  }
  0x13   :  { %267 = vmatpush1.bf16.msra.mxu0 %v2578_v19  ;;  %308 = vmatpush1.bf16.msra.mxu1 %v2583_v20  ;;  %v2698_v40 = vld [vmem:[%s3779_s1 + $0x20] ss:$16 sps:$4 sm:$0xff]   ;;  %v2705_v41 = vld [vmem:[%s3779_s1 + $0x28] ss:$16 sps:$4 sm:$0xff]   ;;  %v2712_v42 = vld [vmem:[%s3779_s1 + $0x44] ss:$16 sps:$4 sm:$0xff]  }
  0x14   :  { %268 = vmatprep.subr.bf16.mxu0 %v2590_v21  ;;  %309 = vmatprep.subr.bf16.mxu1 %v2597_v22  ;;  %v2717_v43 = vld [vmem:[%s3779_s1 + $0x4c] ss:$16 sps:$4 sm:$0xff]   ;;  %v2724_v44 = vld [vmem:[%s3779_s1 + $0x40] ss:$16 sps:$4 sm:$0xff]   ;;  %v2729_v45 = vld [vmem:[%s3779_s1 + $0x48] ss:$16 sps:$4 sm:$0xff]  }
  0x15   :  { %v2736_v46 = vld [vmem:[%s3779_s1 + $0x64] ss:$16 sps:$4 sm:$0xff]   ;;  %v2743_v47 = vld [vmem:[%s3779_s1 + $0x6c] ss:$16 sps:$4 sm:$0xff]   ;;  %v2750_v48 = vld [vmem:[%s3779_s1 + $0x60] ss:$16 sps:$4 sm:$0xff]  }
  0x16   :  { %v2755_v49 = vld [vmem:[%s3779_s1 + $0x68] ss:$16 sps:$4 sm:$0xff]   ;;  %v2762_v50 = vld [vmem:[%s3779_s1 + $0x84] ss:$16 sps:$4 sm:$0xff]   ;;  %v2767_v51 = vld [vmem:[%s3779_s1 + $0x8c] ss:$16 sps:$4 sm:$0xff]  }
  0x17   :  { %269 = vmatpush1.bf16.msra.mxu0 %v2604_v23  ;;  %310 = vmatpush1.bf16.msra.mxu1 %v2609_v24  ;;  %v2774_v52 = vld [vmem:[%s3779_s1 + $0x80] ss:$16 sps:$4 sm:$0xff]   ;;  %v2779_v53 = vld [vmem:[%s3779_s1 + $0x88] ss:$16 sps:$4 sm:$0xff]   ;;  %v2786_v54 = vld [vmem:[%s3779_s1 + $0xa4] ss:$16 sps:$4 sm:$0xff]  }
  0x18   :  { %270 = vmatprep.subr.bf16.mxu0 %v2616_v25  ;;  %311 = vmatprep.subr.bf16.mxu1 %v2621_v26  ;;  %v2791_v55 = vld [vmem:[%s3779_s1 + $0xac] ss:$16 sps:$4 sm:$0xff]   ;;  %v2798_v56 = vld [vmem:[%s3779_s1 + $0xa0] ss:$16 sps:$4 sm:$0xff]   ;;  %v2803_v57 = vld [vmem:[%s3779_s1 + $0xa8] ss:$16 sps:$4 sm:$0xff]  }
  0x19   :  { %v2810_v58 = vld [vmem:[%s3779_s1 + $0xc4] ss:$16 sps:$4 sm:$0xff]   ;;  %v2815_v59 = vld [vmem:[%s3779_s1 + $0xcc] ss:$16 sps:$4 sm:$0xff]   ;;  %v2822_v60 = vld [vmem:[%s3779_s1 + $0xc0] ss:$16 sps:$4 sm:$0xff]  }
  0x1a   :  { %v2827_v61 = vld [vmem:[%s3779_s1 + $0xc8] ss:$16 sps:$4 sm:$0xff]   ;;  %v2834_v62 = vld [vmem:[%s3779_s1 + $0xe4] ss:$16 sps:$4 sm:$0xff]   ;;  %v2839_v63 = vld [vmem:[%s3779_s1 + $0xec] ss:$16 sps:$4 sm:$0xff]  }
  0x1b   :  { %271 = vmatpush1.bf16.msra.mxu0 %v2626_v27  ;;  %312 = vmatpush1.bf16.msra.mxu1 %v2631_v28  ;;  %3917 = vst [vmem:[#allocation32_spill] sm:$0xff] %v2827_v61 }
  0x1c   :  { %272 = vmatprep.subr.bf16.mxu0 %v2638_v29  ;;  %313 = vmatprep.subr.bf16.mxu1 %v2645_v30 }
  0x1f   :  { %273 = vmatpush1.bf16.msra.mxu0 %v2650_v31  ;;  %314 = vmatpush1.bf16.msra.mxu1 %v2657_v32 }
  0x20   :  { %500 = vmatprep.subr.bf16.mxu0 %v2664_v33  ;;  %541 = vmatprep.subr.bf16.mxu1 %v2669_v34 }
  0x22   :  { %291 = vmatmul.mubr.bf16.vlgmr.msra.gmra.mrb[0].mxu0 %v31_v35  ;;  %332 = vmatmul.mubr.bf16.vlgmr.msra.gmra.mrb[0].mxu1 %v31_v35  ;;  %v2846_v35 = vld [vmem:[%s3779_s1 + $0xe0] ss:$16 sps:$4 sm:$0xff]  }
  0x23   :  { %501 = vmatpush1.bf16.msra.mxu0 %v2674_v36  ;;  %542 = vmatpush1.bf16.msra.mxu1 %v2679_v37  ;;  %3918 = vst [vmem:[#allocation33_spill] sm:$0xff] %v2846_v35 }
  0x24   :  { %502 = vmatprep.subr.bf16.mxu0 %v2686_v38  ;;  %543 = vmatprep.subr.bf16.mxu1 %v2693_v39 }
  0x25   :  { %532 = vmatprep.mubr.bf16.mxu0 %v3785_v1  ;;  %573 = vmatprep.mubr.bf16.mxu1 %v3785_v1  ;;  %v2851_v1 = vld [vmem:[%s3779_s1 + $0xe8] ss:$16 sps:$4 sm:$0xff]  }
  0x27   :  { %503 = vmatpush1.bf16.msra.mxu0 %v2698_v40  ;;  %544 = vmatpush1.bf16.msra.mxu1 %v2705_v41 }
  0x28   :  { %504 = vmatprep.subr.bf16.mxu0 %v2712_v42  ;;  %545 = vmatprep.subr.bf16.mxu1 %v2717_v43 }
  0x2b   :  { %505 = vmatpush1.bf16.msra.mxu0 %v2724_v44  ;;  %546 = vmatpush1.bf16.msra.mxu1 %v2729_v45 }
  0x2c   :  { %506 = vmatprep.subr.bf16.mxu0 %v2736_v46  ;;  %547 = vmatprep.subr.bf16.mxu1 %v2743_v47 }
  0x2f   :  { %507 = vmatpush1.bf16.msra.mxu0 %v2750_v48  ;;  %548 = vmatpush1.bf16.msra.mxu1 %v2755_v49 }
  0x30   :  { %508 = vmatprep.subr.bf16.mxu0 %v2762_v50  ;;  %549 = vmatprep.subr.bf16.mxu1 %v2767_v51 }
  0x33   :  { %509 = vmatpush1.bf16.msra.mxu0 %v2774_v52  ;;  %550 = vmatpush1.bf16.msra.mxu1 %v2779_v53 }
  0x34   :  { %510 = vmatprep.subr.bf16.mxu0 %v2786_v54  ;;  %551 = vmatprep.subr.bf16.mxu1 %v2791_v55 }
  0x37   :  { %511 = vmatpush1.bf16.msra.mxu0 %v2798_v56  ;;  %552 = vmatpush1.bf16.msra.mxu1 %v2803_v57 }
  0x38   :  { %512 = vmatprep.subr.bf16.mxu0 %v2810_v58  ;;  %553 = vmatprep.subr.bf16.mxu1 %v2815_v59 }
  0x3b   :  { %513 = vmatpush1.bf16.msra.mxu0 %v2822_v60  ;;  %554 = vmatpush1.bf16.msra.mxu1 %v2827_v61  ;;  %v33_v61 = vld [vmem:[%s3780_s0] sm:$0xf] }
  0x3c   :  { %514 = vmatprep.subr.bf16.mxu0 %v2834_v62  ;;  %555 = vmatprep.subr.bf16.mxu1 %v2839_v63 }
  0x3f   :  { %515 = vmatpush1.bf16.msra.mxu0 %v2846_v35  ;;  %556 = vmatpush1.bf16.msra.mxu1 %v2851_v1  ;;  %v3919_v35 = vmov 0  }
  0x40   :  { %628 = vmatprep.subr.bf16.mxu0 %v2471_v0  ;;  %669 = vmatprep.subr.bf16.mxu1 %v2479_v2 }
  0x42   :  { %533 = vmatmul.mubr.bf16.vlgmr.msra.gmra.mrb[4].mxu0 %v33_v61  ;;  %574 = vmatmul.mubr.bf16.vlgmr.msra.gmra.mrb[4].mxu1 %v33_v61 }
  0x43   :  { %629 = vmatpush1.bf16.msra.mxu0 %v2485_v3  ;;  %670 = vmatpush1.bf16.msra.mxu1 %v2490_v4 }
  0x44   :  { %630 = vmatprep.subr.bf16.mxu0 %v2496_v5  ;;  %671 = vmatprep.subr.bf16.mxu1 %v2503_v6 }
  0x45   :  { %660 = vmatprep.mubr.bf16.mxu0 %v3919_v35  ;;  %701 = vmatprep.mubr.bf16.mxu1 %v3919_v35 }
  0x47   :  { %631 = vmatpush1.bf16.msra.mxu0 %v2508_v7  ;;  %672 = vmatpush1.bf16.msra.mxu1 %v2514_v8 }
  0x48   :  { %632 = vmatprep.subr.bf16.mxu0 %v2520_v9  ;;  %673 = vmatprep.subr.bf16.mxu1 %v2525_v10 }
  0x4b   :  { %633 = vmatpush1.bf16.msra.mxu0 %v2530_v11  ;;  %674 = vmatpush1.bf16.msra.mxu1 %v2535_v12 }
  0x4c   :  { %634 = vmatprep.subr.bf16.mxu0 %v2542_v13  ;;  %675 = vmatprep.subr.bf16.mxu1 %v2549_v14 }
  0x4f   :  { %635 = vmatpush1.bf16.msra.mxu0 %v2554_v15  ;;  %676 = vmatpush1.bf16.msra.mxu1 %v2561_v16 }
  0x50   :  { %636 = vmatprep.subr.bf16.mxu0 %v2566_v17  ;;  %677 = vmatprep.subr.bf16.mxu1 %v2573_v18 }
  0x53   :  { %637 = vmatpush1.bf16.msra.mxu0 %v2578_v19  ;;  %678 = vmatpush1.bf16.msra.mxu1 %v2583_v20 }
  0x54   :  { %638 = vmatprep.subr.bf16.mxu0 %v2590_v21  ;;  %679 = vmatprep.subr.bf16.mxu1 %v2597_v22  ;;  %v583_v21 = vlaneseq }
  0x57   :  { %639 = vmatpush1.bf16.msra.mxu0 %v2604_v23  ;;  %680 = vmatpush1.bf16.msra.mxu1 %v2609_v24 }
  0x58   :  { %640 = vmatprep.subr.bf16.mxu0 %v2616_v25  ;;  %681 = vmatprep.subr.bf16.mxu1 %v2621_v26 }
  0x5b   :  { %641 = vmatpush1.bf16.msra.mxu0 %v2626_v27  ;;  %682 = vmatpush1.bf16.msra.mxu1 %v2631_v28 }
  0x5c   :  { %642 = vmatprep.subr.bf16.mxu0 %v2638_v29  ;;  %683 = vmatprep.subr.bf16.mxu1 %v2645_v30  ;;  %v584_v29 = vshrl.u32 %v583_v21, 7 }
  0x5e   :  { %v585_v20 = vsub.s32 0, %v584_v29  ;;  %v597_v12 = vsub.s32 3, %v584_v29 }
  0x5f   :  { %643 = vmatpush1.bf16.msra.mxu0 %v2650_v31  ;;  %684 = vmatpush1.bf16.msra.mxu1 %v2657_v32  ;;  %v30_v31 = vld [vmem:[%s3781_s3] sm:$0xf]  ;;  %v589_v32 = vsub.s32 1, %v584_v29 }
  0x60   :  { %710 = vmatprep.subr.bf16.mxu0 %v2664_v33  ;;  %751 = vmatprep.subr.bf16.mxu1 %v2669_v34  ;;  %v2899_v30 = vrot.slane %v30_v31, %v585_v20  ;;  %v593_v33 = vsub.s32 2, %v584_v29 }
  0x61   :  { %v2901_v18 = vrot.slane %v30_v31, %v589_v32 }
  0x62   :  { %v2904_v13 = vrot.slane %v30_v31, %v593_v33 }
  0xf5   :  { %v292_v61 = vpop.f32.mrb[0].mxu0  ;;  %v333_v25 = vpop.f32.mrb[0].mxu1 }
  0xf6   :  { %v294_v24 = vpop.f32.mrb[1].mxu0  ;;  %v335_v26 = vpop.f32.mrb[1].mxu1 }
  0xf7   :  { %v296_v23 = vpop.f32.mrb[2].mxu0  ;;  %v337_v27 = vpop.f32.mrb[2].mxu1 }
  0xf8   :  { %v297_v22 = vpop.f32.mrb[3].mxu0  ;;  %v338_v28 = vpop.f32.mrb[3].mxu1 }
 0x115   :  { %v534_v34 = vpop.f32.mrb[4].mxu0  ;;  %v575_v19 = vpop.f32.mrb[4].mxu1 }
 0x116   :  { %v535_v17 = vadd.f32 %v534_v34, %v292_v61  ;;  %v576_v23 = vadd.f32 %v575_v19, %v333_v25  ;;  %v536_v27 = vpop.f32.mrb[5].mxu0  ;;  %v577_v22 = vpop.f32.mrb[5].mxu1  ;;  %v2908_v25 = vrot.slane %v30_v31, %v597_v12 }
 0x117   :  { %v537_v28 = vadd.f32 %v536_v27, %v294_v24  ;;  %v578_v16 = vadd.f32 %v577_v22, %v335_v26  ;;  %v538_v21 = vpop.f32.mrb[6].mxu0  ;;  %v579_v15 = vpop.f32.mrb[6].mxu1 }
 0x118   :  { %v603_v14 = vadd.f32 %v2899_v30, %v535_v17  ;;  %v539_v20 = vpop.f32.mrb[7].mxu0  ;;  %v580_v11 = vpop.f32.mrb[7].mxu1  ;;  %v605_v19 = vadd.f32 %v2904_v13, %v576_v23  ;;  %v3921_v21 = vld [vmem:[#allocation33_spill] sm:$0xff] }
 0x119   :  { %v604_v10 = vadd.f32 %v2901_v18, %v537_v28  ;;  %v606_v15 = vadd.f32 %v2908_v25, %v578_v16  ;;  %v3920_v28 = vld [vmem:[#allocation32_spill] sm:$0xff] }
 0x11a   :  { %v607_v9 = vmul.f32 0.5, %v603_v14  ;;  %v2134_v20 = vld [vmem:[%s3780_s0 + $0x4] sm:$0xf] }
 0x11b   :  { %v611_v32 = vmul.f32 0.5, %v604_v10  ;;  %v616_v24 = vmul.f32 0.5, %v606_v15  ;;  %v3924_v15 = vld [vmem:[#allocation8_spill] sm:$0xff] }
 0x11c   :  { %2286 = vtanh.f32 %v607_v9 }
 0x11d   :  { %2288 = vtanh.f32 %v611_v32  ;;  %v3922_v32 = vld [vmem:[#allocation6_spill] sm:$0xff] }
 0x11e   :  { %2290 = vtanh.f32 %v605_v19  ;;  %v3923_v19 = vld [vmem:[#allocation7_spill] sm:$0xff] }
 0x11f   :  { %2292 = vtanh.f32 %v616_v24  ;;  %v3925_v24 = vld [vmem:[#allocation9_spill] sm:$0xff] }
 0x126   :  { %v2287_v17 = vpop.eup %2286 }
 0x127   :  { %v2289_v26 = vpop.eup %2288  ;;  %v609_v33 = vmul.f32 0.5, %v2287_v17  ;;  %v3926_v17 = vld [vmem:[#allocation10_spill] sm:$0xff] }
 0x128   :  { %v613_v29 = vmul.f32 0.5, %v2289_v26  ;;  %v2291_v34 = vpop.eup %2290  ;;  %v3927_v26 = vld [vmem:[#allocation11_spill] sm:$0xff] }
 0x129   :  { %v610_v11 = vadd.f32 0.5, %v609_v33  ;;  %v2293_v12 = vpop.eup %2292  ;;  %v3928_v33 = vld [vmem:[#allocation12_spill] sm:$0xff] }
 0x12a   :  { %v614_v61 = vadd.f32 0.5, %v613_v29  ;;  %v618_v31 = vmul.f32 0.5, %v2293_v12  ;;  %v3929_v29 = vld [vmem:[#allocation13_spill] sm:$0xff]  ;;  %v3935_v12 = vld [vmem:[#allocation19_spill] sm:$0xff] }
 0x12b   :  { %v621_v14 = vmul.f32 %v2291_v34, %v610_v11  ;;  %v3930_v11 = vld [vmem:[#allocation14_spill] sm:$0xff]  ;;  %v3931_v34 = vld [vmem:[#allocation15_spill] sm:$0xff] }
 0x12c   :  { %v620_v10 = vmul.f32 0.0, %v614_v61  ;;  %v619_v23 = vadd.f32 0.5, %v618_v31  ;;  %v3932_v61 = vld [vmem:[#allocation16_spill] sm:$0xff] }
 0x12d   :  { %v3936_v31 = vld [vmem:[#allocation20_spill] sm:$0xff] }
 0x12e   :  { %v2911_v9 = vadd.f32 %v621_v14, %v620_v10  ;;  %v3933_v14 = vld [vmem:[#allocation17_spill] sm:$0xff]  ;;  %v3934_v10 = vld [vmem:[#allocation18_spill] sm:$0xff] }
 0x130   :  { %2294 = vtanh.f32 %v2911_v9 }
 0x13a   :  { %v2295_v27 = vpop.eup %2294 }
 0x13b   :  { %v624_v16 = vmul.f32 %v2295_v27, %v619_v23  ;;  %v3937_v23 = vld [vmem:[#allocation21_spill] sm:$0xff]  ;;  %v3938_v27 = vld [vmem:[#allocation22_spill] sm:$0xff] }
 0x13d   :  { %v625_v22 = vpack.c.bf16 %v624_v16, %v624_v16  ;;  %v3939_v16 = vld [vmem:[#allocation23_spill] sm:$0xff] }
 0x13f   :  { %661 = vmatmul.mubr.bf16.vlgmr.msra.gmra.mrb[8].mxu0 %v625_v22  ;;  %702 = vmatmul.mubr.bf16.vlgmr.msra.gmra.mrb[8].mxu1 %v625_v22  ;;  %v3940_v22 = vld [vmem:[#allocation24_spill] sm:$0xff] }
 0x140   :  { %711 = vmatpush1.bf16.msra.mxu0 %v2674_v36  ;;  %752 = vmatpush1.bf16.msra.mxu1 %v2679_v37 }
 0x141   :  { %712 = vmatprep.subr.bf16.mxu0 %v2686_v38  ;;  %753 = vmatprep.subr.bf16.mxu1 %v2693_v39 }
 0x142   :  { %742 = vmatprep.mubr.bf16.mxu0 %v3919_v35  ;;  %783 = vmatprep.mubr.bf16.mxu1 %v3919_v35 }
 0x144   :  { %713 = vmatpush1.bf16.msra.mxu0 %v2698_v40  ;;  %754 = vmatpush1.bf16.msra.mxu1 %v2705_v41 }
 0x145   :  { %714 = vmatprep.subr.bf16.mxu0 %v2712_v42  ;;  %755 = vmatprep.subr.bf16.mxu1 %v2717_v43 }
 0x148   :  { %715 = vmatpush1.bf16.msra.mxu0 %v2724_v44  ;;  %756 = vmatpush1.bf16.msra.mxu1 %v2729_v45 }
 0x149   :  { %716 = vmatprep.subr.bf16.mxu0 %v2736_v46  ;;  %757 = vmatprep.subr.bf16.mxu1 %v2743_v47 }
 0x14c   :  { %717 = vmatpush1.bf16.msra.mxu0 %v2750_v48  ;;  %758 = vmatpush1.bf16.msra.mxu1 %v2755_v49 }
 0x14d   :  { %718 = vmatprep.subr.bf16.mxu0 %v2762_v50  ;;  %759 = vmatprep.subr.bf16.mxu1 %v2767_v51 }
 0x150   :  { %719 = vmatpush1.bf16.msra.mxu0 %v2774_v52  ;;  %760 = vmatpush1.bf16.msra.mxu1 %v2779_v53 }
 0x151   :  { %720 = vmatprep.subr.bf16.mxu0 %v2786_v54  ;;  %761 = vmatprep.subr.bf16.mxu1 %v2791_v55 }
 0x154   :  { %721 = vmatpush1.bf16.msra.mxu0 %v2798_v56  ;;  %762 = vmatpush1.bf16.msra.mxu1 %v2803_v57 }
 0x155   :  { %722 = vmatprep.subr.bf16.mxu0 %v2810_v58  ;;  %763 = vmatprep.subr.bf16.mxu1 %v2815_v59 }
 0x158   :  { %723 = vmatpush1.bf16.msra.mxu0 %v2822_v60  ;;  %764 = vmatpush1.bf16.msra.mxu1 %v3920_v28 }
 0x159   :  { %724 = vmatprep.subr.bf16.mxu0 %v2834_v62  ;;  %765 = vmatprep.subr.bf16.mxu1 %v2839_v63 }
 0x15c   :  { %725 = vmatpush1.bf16.msra.mxu0 %v3921_v21  ;;  %766 = vmatpush1.bf16.msra.mxu1 %v2851_v1 }
 0x15d   :  { %817 = vmatprep.subr.bf16.mxu0 %v2471_v0  ;;  %858 = vmatprep.subr.bf16.mxu1 %v2479_v2 }
 0x15f   :  { %743 = vmatmul.mubr.bf16.vlgmr.msra.gmra.mrb[12].mxu0 %v2134_v20  ;;  %784 = vmatmul.mubr.bf16.vlgmr.msra.gmra.mrb[12].mxu1 %v2134_v20  ;;  %v3941_v20 = vld [vmem:[#allocation25_spill] sm:$0xff] }
 0x160   :  { %818 = vmatpush1.bf16.msra.mxu0 %v2485_v3  ;;  %859 = vmatpush1.bf16.msra.mxu1 %v2490_v4 }
 0x161   :  { %819 = vmatprep.subr.bf16.mxu0 %v2496_v5  ;;  %860 = vmatprep.subr.bf16.mxu1 %v2503_v6 }
 0x162   :  { %849 = vmatprep.mubr.bf16.mxu0 %v3919_v35  ;;  %890 = vmatprep.mubr.bf16.mxu1 %v3919_v35 }
 0x164   :  { %820 = vmatpush1.bf16.msra.mxu0 %v2508_v7  ;;  %861 = vmatpush1.bf16.msra.mxu1 %v2514_v8 }
 0x165   :  { %821 = vmatprep.subr.bf16.mxu0 %v3922_v32  ;;  %862 = vmatprep.subr.bf16.mxu1 %v3923_v19 }
 0x168   :  { %822 = vmatpush1.bf16.msra.mxu0 %v3924_v15  ;;  %863 = vmatpush1.bf16.msra.mxu1 %v3925_v24 }
 0x169   :  { %823 = vmatprep.subr.bf16.mxu0 %v3926_v17  ;;  %864 = vmatprep.subr.bf16.mxu1 %v3927_v26 }
 0x16c   :  { %824 = vmatpush1.bf16.msra.mxu0 %v3928_v33  ;;  %865 = vmatpush1.bf16.msra.mxu1 %v3929_v29 }
 0x16d   :  { %825 = vmatprep.subr.bf16.mxu0 %v3930_v11  ;;  %866 = vmatprep.subr.bf16.mxu1 %v3931_v34  ;;  %v3942_v34 = vld [vmem:[#allocation26_spill] sm:$0xff] }
 0x170   :  { %826 = vmatpush1.bf16.msra.mxu0 %v3932_v61  ;;  %867 = vmatpush1.bf16.msra.mxu1 %v3933_v14  ;;  %v3943_v61 = vld [vmem:[#allocation27_spill] sm:$0xff]  ;;  %v3944_v14 = vld [vmem:[#allocation28_spill] sm:$0xff] }
 0x171   :  { %827 = vmatprep.subr.bf16.mxu0 %v3934_v10  ;;  %868 = vmatprep.subr.bf16.mxu1 %v3935_v12  ;;  %v3945_v10 = vld [vmem:[#allocation29_spill] sm:$0xff]  ;;  %v3946_v12 = vld [vmem:[#allocation30_spill] sm:$0xff] }
 0x174   :  { %828 = vmatpush1.bf16.msra.mxu0 %v3936_v31  ;;  %869 = vmatpush1.bf16.msra.mxu1 %v3937_v23  ;;  %v3947_v31 = vld [vmem:[#allocation31_spill] sm:$0xff] }
 0x175   :  { %829 = vmatprep.subr.bf16.mxu0 %v3938_v27  ;;  %870 = vmatprep.subr.bf16.mxu1 %v3939_v16 }
 0x178   :  { %830 = vmatpush1.bf16.msra.mxu0 %v3940_v22  ;;  %871 = vmatpush1.bf16.msra.mxu1 %v3941_v20 }
 0x179   :  { %831 = vmatprep.subr.bf16.mxu0 %v3942_v34  ;;  %872 = vmatprep.subr.bf16.mxu1 %v3943_v61 }
 0x17c   :  { %832 = vmatpush1.bf16.msra.mxu0 %v3944_v14  ;;  %873 = vmatpush1.bf16.msra.mxu1 %v3945_v10 }
 0x17d   :  { %899 = vmatprep.subr.bf16.mxu0 %v3946_v12  ;;  %940 = vmatprep.subr.bf16.mxu1 %v3947_v31 }
 0x212   :  { %v662_v23 = vpop.f32.mrb[8].mxu0  ;;  %v703_v27 = vpop.f32.mrb[8].mxu1 }
 0x213   :  { %v664_v11 = vpop.f32.mrb[9].mxu0  ;;  %v705_v16 = vpop.f32.mrb[9].mxu1 }
 0x214   :  { %v666_v29 = vpop.f32.mrb[10].mxu0  ;;  %v707_v22 = vpop.f32.mrb[10].mxu1 }
 0x215   :  { %v667_v33 = vpop.f32.mrb[11].mxu0  ;;  %v708_v20 = vpop.f32.mrb[11].mxu1 }
 0x216   :  { %v3948_v20 = vld [vmem:[#allocation4_spill] sm:$0xff] }
 0x232   :  { %v744_v26 = vpop.f32.mrb[12].mxu0  ;;  %v785_v34 = vpop.f32.mrb[12].mxu1 }
 0x233   :  { %v745_v17 = vadd.f32 %v744_v26, %v662_v23  ;;  %v786_v61 = vadd.f32 %v785_v34, %v703_v27  ;;  %v746_v24 = vpop.f32.mrb[13].mxu0  ;;  %v787_v14 = vpop.f32.mrb[13].mxu1 }
 0x234   :  { %v747_v15 = vadd.f32 %v746_v24, %v664_v11  ;;  %v788_v10 = vadd.f32 %v787_v14, %v705_v16  ;;  %v748_v19 = vpop.f32.mrb[14].mxu0  ;;  %v789_v12 = vpop.f32.mrb[14].mxu1 }
 0x235   :  { %v792_v31 = vadd.f32 %v745_v17, %v2899_v30  ;;  %v749_v32 = vpop.f32.mrb[15].mxu0  ;;  %v790_v8 = vpop.f32.mrb[15].mxu1  ;;  %v794_v33 = vadd.f32 %v786_v61, %v2904_v13 }
 0x236   :  { %v793_v7 = vadd.f32 %v747_v15, %v2901_v18  ;;  %v795_v26 = vadd.f32 %v788_v10, %v2908_v25 }
 0x237   :  { %v796_v29 = vmul.f32 0.5, %v792_v31 }
 0x238   :  { %v800_v22 = vmul.f32 0.5, %v793_v7  ;;  %v805_v34 = vmul.f32 0.5, %v795_v26  ;;  %v3958_v26 = vld [vmem:[#allocation14_spill] sm:$0xff] }
 0x239   :  { %2296 = vtanh.f32 %v796_v29  ;;  %v3949_v29 = vld [vmem:[#allocation5_spill] sm:$0xff] }
 0x23a   :  { %2298 = vtanh.f32 %v800_v22  ;;  %v3952_v22 = vld [vmem:[#allocation8_spill] sm:$0xff] }
 0x23b   :  { %2300 = vtanh.f32 %v794_v33  ;;  %v3957_v33 = vld [vmem:[#allocation13_spill] sm:$0xff] }
 0x23c   :  { %2302 = vtanh.f32 %v805_v34  ;;  %v3959_v34 = vld [vmem:[#allocation15_spill] sm:$0xff] }
 0x243   :  { %v2297_v24 = vpop.eup %2296 }
 0x244   :  { %v2299_v11 = vpop.eup %2298  ;;  %v798_v19 = vmul.f32 0.5, %v2297_v24  ;;  %v3960_v24 = vld [vmem:[#allocation16_spill] sm:$0xff] }
 0x245   :  { %v802_v14 = vmul.f32 0.5, %v2299_v11  ;;  %v2301_v32 = vpop.eup %2300  ;;  %v3961_v11 = vld [vmem:[#allocation17_spill] sm:$0xff] }
 0x246   :  { %v799_v17 = vadd.f32 0.5, %v798_v19  ;;  %v2303_v61 = vpop.eup %2302  ;;  %v3962_v19 = vld [vmem:[#allocation18_spill] sm:$0xff] }
 0x247   :  { %v803_v8 = vadd.f32 0.5, %v802_v14  ;;  %v807_v31 = vmul.f32 0.5, %v2303_v61  ;;  %v3963_v14 = vld [vmem:[#allocation19_spill] sm:$0xff]  ;;  %v3969_v61 = vld [vmem:[#allocation25_spill] sm:$0xff] }
 0x248   :  { %v810_v12 = vmul.f32 %v2301_v32, %v799_v17  ;;  %v3964_v17 = vld [vmem:[#allocation20_spill] sm:$0xff]  ;;  %v3965_v32 = vld [vmem:[#allocation21_spill] sm:$0xff] }
 0x249   :  { %v809_v15 = vmul.f32 %v803_v8, %v2911_v9  ;;  %v808_v23 = vadd.f32 0.5, %v807_v31  ;;  %v2135_v9 = vld [vmem:[%s3780_s0 + $0x8] sm:$0xf]  ;;  %v3966_v8 = vld [vmem:[#allocation22_spill] sm:$0xff] }
 0x24a   :  { %v3970_v31 = vld [vmem:[#allocation26_spill] sm:$0xff] }
 0x24b   :  { %v2990_v7 = vadd.f32 %v810_v12, %v809_v15  ;;  %v3967_v12 = vld [vmem:[#allocation23_spill] sm:$0xff]  ;;  %v3968_v15 = vld [vmem:[#allocation24_spill] sm:$0xff] }
 0x24d   :  { %2304 = vtanh.f32 %v2990_v7 }
 0x257   :  { %v2305_v10 = vpop.eup %2304 }
 0x258   :  { %v813_v27 = vmul.f32 %v2305_v10, %v808_v23  ;;  %v3971_v23 = vld [vmem:[#allocation27_spill] sm:$0xff]  ;;  %v3972_v10 = vld [vmem:[#allocation28_spill] sm:$0xff] }
 0x25a   :  { %v814_v16 = vpack.c.bf16 %v813_v27, %v813_v27  ;;  %v3973_v27 = vld [vmem:[#allocation29_spill] sm:$0xff] }
 0x25c   :  { %850 = vmatmul.mubr.bf16.vlgmr.msra.gmra.mrb[16].mxu0 %v814_v16  ;;  %891 = vmatmul.mubr.bf16.vlgmr.msra.gmra.mrb[16].mxu1 %v814_v16  ;;  %v3974_v16 = vld [vmem:[#allocation30_spill] sm:$0xff] }
 0x25d   :  { %900 = vmatpush1.bf16.msra.mxu0 %v2674_v36  ;;  %941 = vmatpush1.bf16.msra.mxu1 %v2679_v37 }
 0x25e   :  { %901 = vmatprep.subr.bf16.mxu0 %v2686_v38  ;;  %942 = vmatprep.subr.bf16.mxu1 %v2693_v39 }
 0x25f   :  { %931 = vmatprep.mubr.bf16.mxu0 %v3919_v35  ;;  %972 = vmatprep.mubr.bf16.mxu1 %v3919_v35 }
 0x261   :  { %902 = vmatpush1.bf16.msra.mxu0 %v2698_v40  ;;  %943 = vmatpush1.bf16.msra.mxu1 %v2705_v41 }
 0x262   :  { %903 = vmatprep.subr.bf16.mxu0 %v2712_v42  ;;  %944 = vmatprep.subr.bf16.mxu1 %v2717_v43 }
 0x265   :  { %904 = vmatpush1.bf16.msra.mxu0 %v2724_v44  ;;  %945 = vmatpush1.bf16.msra.mxu1 %v2729_v45 }
 0x266   :  { %905 = vmatprep.subr.bf16.mxu0 %v2736_v46  ;;  %946 = vmatprep.subr.bf16.mxu1 %v2743_v47 }
 0x269   :  { %906 = vmatpush1.bf16.msra.mxu0 %v2750_v48  ;;  %947 = vmatpush1.bf16.msra.mxu1 %v2755_v49 }
 0x26a   :  { %907 = vmatprep.subr.bf16.mxu0 %v2762_v50  ;;  %948 = vmatprep.subr.bf16.mxu1 %v2767_v51 }
 0x26d   :  { %908 = vmatpush1.bf16.msra.mxu0 %v2774_v52  ;;  %949 = vmatpush1.bf16.msra.mxu1 %v2779_v53 }
 0x26e   :  { %909 = vmatprep.subr.bf16.mxu0 %v2786_v54  ;;  %950 = vmatprep.subr.bf16.mxu1 %v2791_v55 }
 0x271   :  { %910 = vmatpush1.bf16.msra.mxu0 %v2798_v56  ;;  %951 = vmatpush1.bf16.msra.mxu1 %v2803_v57 }
 0x272   :  { %911 = vmatprep.subr.bf16.mxu0 %v2810_v58  ;;  %952 = vmatprep.subr.bf16.mxu1 %v2815_v59 }
 0x275   :  { %912 = vmatpush1.bf16.msra.mxu0 %v2822_v60  ;;  %953 = vmatpush1.bf16.msra.mxu1 %v3920_v28 }
 0x276   :  { %913 = vmatprep.subr.bf16.mxu0 %v2834_v62  ;;  %954 = vmatprep.subr.bf16.mxu1 %v2839_v63 }
 0x279   :  { %914 = vmatpush1.bf16.msra.mxu0 %v3921_v21  ;;  %955 = vmatpush1.bf16.msra.mxu1 %v2851_v1 }
 0x27a   :  { %1006 = vmatprep.subr.bf16.mxu0 %v2471_v0  ;;  %1047 = vmatprep.subr.bf16.mxu1 %v2479_v2  ;;  %v3950_v0 = vld [vmem:[#allocation6_spill] sm:$0xff]  ;;  %v3951_v2 = vld [vmem:[#allocation7_spill] sm:$0xff] }
 0x27c   :  { %932 = vmatmul.mubr.bf16.vlgmr.msra.gmra.mrb[20].mxu0 %v2135_v9  ;;  %973 = vmatmul.mubr.bf16.vlgmr.msra.gmra.mrb[20].mxu1 %v2135_v9  ;;  %v3975_v9 = vld [vmem:[#allocation31_spill] sm:$0xff] }
 0x27d   :  { %1007 = vmatpush1.bf16.msra.mxu0 %v2485_v3  ;;  %1048 = vmatpush1.bf16.msra.mxu1 %v2490_v4  ;;  %v3953_v3 = vld [vmem:[#allocation9_spill] sm:$0xff]  ;;  %v3954_v4 = vld [vmem:[#allocation10_spill] sm:$0xff] }
 0x27e   :  { %1008 = vmatprep.subr.bf16.mxu0 %v2496_v5  ;;  %1049 = vmatprep.subr.bf16.mxu1 %v2503_v6  ;;  %v3955_v5 = vld [vmem:[#allocation11_spill] sm:$0xff]  ;;  %v3956_v6 = vld [vmem:[#allocation12_spill] sm:$0xff] }
 0x27f   :  { %1038 = vmatprep.mubr.bf16.mxu0 %v3919_v35  ;;  %1079 = vmatprep.mubr.bf16.mxu1 %v3919_v35 }
 0x281   :  { %1009 = vmatpush1.bf16.msra.mxu0 %v3948_v20  ;;  %1050 = vmatpush1.bf16.msra.mxu1 %v3949_v29 }
 0x282   :  { %1010 = vmatprep.subr.bf16.mxu0 %v3950_v0  ;;  %1051 = vmatprep.subr.bf16.mxu1 %v3951_v2 }
 0x285   :  { %1011 = vmatpush1.bf16.msra.mxu0 %v3952_v22  ;;  %1052 = vmatpush1.bf16.msra.mxu1 %v3953_v3 }
 0x286   :  { %1012 = vmatprep.subr.bf16.mxu0 %v3954_v4  ;;  %1053 = vmatprep.subr.bf16.mxu1 %v3955_v5 }
 0x289   :  { %1013 = vmatpush1.bf16.msra.mxu0 %v3956_v6  ;;  %1054 = vmatpush1.bf16.msra.mxu1 %v3957_v33 }
 0x28a   :  { %1014 = vmatprep.subr.bf16.mxu0 %v3958_v26  ;;  %1055 = vmatprep.subr.bf16.mxu1 %v3959_v34 }
 0x28d   :  { %1015 = vmatpush1.bf16.msra.mxu0 %v3960_v24  ;;  %1056 = vmatpush1.bf16.msra.mxu1 %v3961_v11 }
 0x28e   :  { %1016 = vmatprep.subr.bf16.mxu0 %v3962_v19  ;;  %1057 = vmatprep.subr.bf16.mxu1 %v3963_v14 }
 0x291   :  { %1017 = vmatpush1.bf16.msra.mxu0 %v3964_v17  ;;  %1058 = vmatpush1.bf16.msra.mxu1 %v3965_v32 }
 0x292   :  { %1018 = vmatprep.subr.bf16.mxu0 %v3966_v8  ;;  %1059 = vmatprep.subr.bf16.mxu1 %v3967_v12 }
 0x295   :  { %1019 = vmatpush1.bf16.msra.mxu0 %v3968_v15  ;;  %1060 = vmatpush1.bf16.msra.mxu1 %v3969_v61 }
 0x296   :  { %1020 = vmatprep.subr.bf16.mxu0 %v3970_v31  ;;  %1061 = vmatprep.subr.bf16.mxu1 %v3971_v23 }
 0x299   :  { %1021 = vmatpush1.bf16.msra.mxu0 %v3972_v10  ;;  %1062 = vmatpush1.bf16.msra.mxu1 %v3973_v27 }
 0x29a   :  { %1088 = vmatprep.subr.bf16.mxu0 %v3974_v16  ;;  %1129 = vmatprep.subr.bf16.mxu1 %v3975_v9 }
 0x32f   :  { %v851_v20 = vpop.f32.mrb[16].mxu0  ;;  %v892_v29 = vpop.f32.mrb[16].mxu1 }
 0x330   :  { %v853_v0 = vpop.f32.mrb[17].mxu0  ;;  %v894_v2 = vpop.f32.mrb[17].mxu1 }
 0x331   :  { %v855_v22 = vpop.f32.mrb[18].mxu0  ;;  %v896_v3 = vpop.f32.mrb[18].mxu1 }
 0x332   :  { %v856_v4 = vpop.f32.mrb[19].mxu0  ;;  %v897_v5 = vpop.f32.mrb[19].mxu1 }
 0x34f   :  { %v933_v6 = vpop.f32.mrb[20].mxu0  ;;  %v974_v33 = vpop.f32.mrb[20].mxu1 }
 0x350   :  { %v934_v26 = vadd.f32 %v933_v6, %v851_v20  ;;  %v975_v34 = vadd.f32 %v974_v33, %v892_v29  ;;  %v935_v24 = vpop.f32.mrb[21].mxu0  ;;  %v976_v11 = vpop.f32.mrb[21].mxu1 }
 0x351   :  { %v936_v19 = vadd.f32 %v935_v24, %v853_v0  ;;  %v977_v14 = vadd.f32 %v976_v11, %v894_v2  ;;  %v937_v17 = vpop.f32.mrb[22].mxu0  ;;  %v978_v32 = vpop.f32.mrb[22].mxu1 }
 0x352   :  { %v981_v8 = vadd.f32 %v934_v26, %v2899_v30  ;;  %v938_v12 = vpop.f32.mrb[23].mxu0  ;;  %v979_v15 = vpop.f32.mrb[23].mxu1  ;;  %v983_v10 = vadd.f32 %v975_v34, %v2904_v13 }
 0x353   :  { %v982_v61 = vadd.f32 %v936_v19, %v2901_v18  ;;  %v984_v20 = vadd.f32 %v977_v14, %v2908_v25  ;;  %v3226_v12 = vld [vmem:[%s3778_s2 + $0x88] ss:$16 sps:$4 sm:$0xff]   ;;  %v3232_v15 = vld [vmem:[%s3778_s2 + $0xa4] ss:$16 sps:$4 sm:$0xff]  }
 0x354   :  { %v985_v31 = vmul.f32 0.5, %v981_v8  ;;  %v3220_v8 = vld [vmem:[%s3778_s2 + $0x80] ss:$16 sps:$4 sm:$0xff]   ;;  %3989 = vst [vmem:[#allocation15_spill] sm:$0xff] %v3226_v12  ;;  %3990 = vst [vmem:[#allocation16_spill] sm:$0xff] %v3232_v15 }
 0x355   :  { %v989_v23 = vmul.f32 0.5, %v982_v61  ;;  %v994_v29 = vmul.f32 0.5, %v984_v20  ;;  %3988 = vst [vmem:[#allocation14_spill] sm:$0xff] %v3220_v8  ;;  %v3238_v61 = vld [vmem:[%s3778_s2 + $0xac] ss:$16 sps:$4 sm:$0xff]  }
 0x356   :  { %2306 = vtanh.f32 %v985_v31  ;;  %3991 = vst [vmem:[#allocation17_spill] sm:$0xff] %v3238_v61  ;;  %v3244_v31 = vld [vmem:[%s3778_s2 + $0xa0] ss:$16 sps:$4 sm:$0xff]   ;;  %v3262_v20 = vld [vmem:[%s3778_s2 + $0xcc] ss:$16 sps:$4 sm:$0xff]  }
 0x357   :  { %2308 = vtanh.f32 %v989_v23  ;;  %3992 = vst [vmem:[#allocation18_spill] sm:$0xff] %v3244_v31  ;;  %v3250_v23 = vld [vmem:[%s3778_s2 + $0xa8] ss:$16 sps:$4 sm:$0xff]   ;;  %3995 = vst [vmem:[#allocation21_spill] sm:$0xff] %v3262_v20 }
 0x358   :  { %2310 = vtanh.f32 %v983_v10  ;;  %3993 = vst [vmem:[#allocation19_spill] sm:$0xff] %v3250_v23  ;;  %v3256_v10 = vld [vmem:[%s3778_s2 + $0xc4] ss:$16 sps:$4 sm:$0xff]  }
 0x359   :  { %2312 = vtanh.f32 %v994_v29  ;;  %3994 = vst [vmem:[#allocation20_spill] sm:$0xff] %v3256_v10  ;;  %v3268_v29 = vld [vmem:[%s3778_s2 + $0xc0] ss:$16 sps:$4 sm:$0xff]  }
 0x35a   :  { %3996 = vst [vmem:[#allocation22_spill] sm:$0xff] %v3268_v29 }
 0x360   :  { %v2307_v0 = vpop.eup %2306 }
 0x361   :  { %v2309_v2 = vpop.eup %2308  ;;  %v987_v22 = vmul.f32 0.5, %v2307_v0  ;;  %v3274_v0 = vld [vmem:[%s3778_s2 + $0xc8] ss:$16 sps:$4 sm:$0xff]  }
 0x362   :  { %v991_v3 = vmul.f32 0.5, %v2309_v2  ;;  %v2311_v5 = vpop.eup %2310  ;;  %3997 = vst [vmem:[#allocation23_spill] sm:$0xff] %v3274_v0  ;;  %v3280_v2 = vld [vmem:[%s3778_s2 + $0xe4] ss:$16 sps:$4 sm:$0xff]  }
 0x363   :  { %v988_v4 = vadd.f32 0.5, %v987_v22  ;;  %v2313_v34 = vpop.eup %2312  ;;  %3998 = vst [vmem:[#allocation24_spill] sm:$0xff] %v3280_v2  ;;  %v3286_v22 = vld [vmem:[%s3778_s2 + $0xec] ss:$16 sps:$4 sm:$0xff]  }
 0x364   :  { %v992_v6 = vadd.f32 0.5, %v991_v3  ;;  %v996_v11 = vmul.f32 0.5, %v2313_v34  ;;  %3999 = vst [vmem:[#allocation25_spill] sm:$0xff] %v3286_v22  ;;  %v3292_v3 = vld [vmem:[%s3778_s2 + $0xe0] ss:$16 sps:$4 sm:$0xff]  }
 0x365   :  { %v999_v33 = vmul.f32 %v2311_v5, %v988_v4  ;;  %4000 = vst [vmem:[#allocation26_spill] sm:$0xff] %v3292_v3 }
 0x366   :  { %v998_v26 = vmul.f32 %v992_v6, %v2990_v7  ;;  %v997_v19 = vadd.f32 0.5, %v996_v11  ;;  %v3214_v7 = vld [vmem:[%s3778_s2 + $0x8c] ss:$16 sps:$4 sm:$0xff]  }
 0x367   :  { %3987 = vst [vmem:[#allocation13_spill] sm:$0xff] %v3214_v7 }
 0x368   :  { %v3069_v24 = vadd.f32 %v999_v33, %v998_v26 }
 0x36a   :  { %2314 = vtanh.f32 %v3069_v24 }
 0x374   :  { %v2315_v14 = vpop.eup %2314 }
 0x375   :  { %v1002_v17 = vmul.f32 %v2315_v14, %v997_v19 }
 0x377   :  { %v1003_v32 = vpack.c.bf16 %v1002_v17, %v1002_v17 }
 0x379   :  { %1039 = vmatmul.mubr.bf16.vlgmr.msra.gmra.mrb[24].mxu0 %v1003_v32  ;;  %1080 = vmatmul.mubr.bf16.vlgmr.msra.gmra.mrb[24].mxu1 %v1003_v32 }
 0x37a   :  { %1089 = vmatpush1.bf16.msra.mxu0 %v2674_v36  ;;  %1130 = vmatpush1.bf16.msra.mxu1 %v2679_v37  ;;  %v2136_v36 = vld [vmem:[%s3780_s0 + $0xc] sm:$0xf]  ;;  %v3110_v37 = vld [vmem:[%s3778_s2 + $0x4] ss:$16 sps:$4 sm:$0xff]  }
 0x37b   :  { %1090 = vmatprep.subr.bf16.mxu0 %v2686_v38  ;;  %1131 = vmatprep.subr.bf16.mxu1 %v2693_v39  ;;  %v3116_v38 = vld [vmem:[%s3778_s2 + $0xc] ss:$16 sps:$4 sm:$0xff]   ;;  %v3122_v39 = vld [vmem:[%s3778_s2] ss:$16 sps:$4 sm:$0xff]  }
 0x37c   :  { %1120 = vmatprep.mubr.bf16.mxu0 %v3919_v35  ;;  %1161 = vmatprep.mubr.bf16.mxu1 %v3919_v35 }
 0x37e   :  { %1091 = vmatpush1.bf16.msra.mxu0 %v2698_v40  ;;  %1132 = vmatpush1.bf16.msra.mxu1 %v2705_v41  ;;  %v3128_v40 = vld [vmem:[%s3778_s2 + $0x8] ss:$16 sps:$4 sm:$0xff]   ;;  %v3134_v41 = vld [vmem:[%s3778_s2 + $0x24] ss:$16 sps:$4 sm:$0xff]  }
 0x37f   :  { %1092 = vmatprep.subr.bf16.mxu0 %v2712_v42  ;;  %1133 = vmatprep.subr.bf16.mxu1 %v2717_v43  ;;  %v3140_v42 = vld [vmem:[%s3778_s2 + $0x2c] ss:$16 sps:$4 sm:$0xff]   ;;  %v3148_v43 = vld [vmem:[%s3778_s2 + $0x20] ss:$16 sps:$4 sm:$0xff]  }
 0x380   :  { %3976 = vst [vmem:[#allocation32_spill] sm:$0xff] %v3148_v43 }
 0x382   :  { %1093 = vmatpush1.bf16.msra.mxu0 %v2724_v44  ;;  %1134 = vmatpush1.bf16.msra.mxu1 %v2729_v45  ;;  %v3154_v44 = vld [vmem:[%s3778_s2 + $0x28] ss:$16 sps:$4 sm:$0xff]   ;;  %v3160_v45 = vld [vmem:[%s3778_s2 + $0x44] ss:$16 sps:$4 sm:$0xff]  }
 0x383   :  { %1094 = vmatprep.subr.bf16.mxu0 %v2736_v46  ;;  %1135 = vmatprep.subr.bf16.mxu1 %v2743_v47  ;;  %3977 = vst [vmem:[#allocation33_spill] sm:$0xff] %v3154_v44  ;;  %3978 = vst [vmem:[#allocation4_spill] sm:$0xff] %v3160_v45  ;;  %v3166_v46 = vld [vmem:[%s3778_s2 + $0x4c] ss:$16 sps:$4 sm:$0xff]   ;;  %v3172_v47 = vld [vmem:[%s3778_s2 + $0x40] ss:$16 sps:$4 sm:$0xff]  }
 0x384   :  { %3979 = vst [vmem:[#allocation5_spill] sm:$0xff] %v3166_v46  ;;  %3980 = vst [vmem:[#allocation6_spill] sm:$0xff] %v3172_v47 }
 0x386   :  { %1095 = vmatpush1.bf16.msra.mxu0 %v2750_v48  ;;  %1136 = vmatpush1.bf16.msra.mxu1 %v2755_v49  ;;  %v3178_v48 = vld [vmem:[%s3778_s2 + $0x48] ss:$16 sps:$4 sm:$0xff]   ;;  %v3184_v49 = vld [vmem:[%s3778_s2 + $0x64] ss:$16 sps:$4 sm:$0xff]  }
 0x387   :  { %1096 = vmatprep.subr.bf16.mxu0 %v2762_v50  ;;  %1137 = vmatprep.subr.bf16.mxu1 %v2767_v51  ;;  %3981 = vst [vmem:[#allocation7_spill] sm:$0xff] %v3178_v48  ;;  %3982 = vst [vmem:[#allocation8_spill] sm:$0xff] %v3184_v49  ;;  %v3190_v50 = vld [vmem:[%s3778_s2 + $0x6c] ss:$16 sps:$4 sm:$0xff]   ;;  %v3196_v51 = vld [vmem:[%s3778_s2 + $0x60] ss:$16 sps:$4 sm:$0xff]  }
 0x388   :  { %3983 = vst [vmem:[#allocation9_spill] sm:$0xff] %v3190_v50  ;;  %3984 = vst [vmem:[#allocation10_spill] sm:$0xff] %v3196_v51 }
 0x38a   :  { %1097 = vmatpush1.bf16.msra.mxu0 %v2774_v52  ;;  %1138 = vmatpush1.bf16.msra.mxu1 %v2779_v53  ;;  %v3202_v52 = vld [vmem:[%s3778_s2 + $0x68] ss:$16 sps:$4 sm:$0xff]   ;;  %v3208_v53 = vld [vmem:[%s3778_s2 + $0x84] ss:$16 sps:$4 sm:$0xff]  }
 0x38b   :  { %1098 = vmatprep.subr.bf16.mxu0 %v2786_v54  ;;  %1139 = vmatprep.subr.bf16.mxu1 %v2791_v55  ;;  %3985 = vst [vmem:[#allocation11_spill] sm:$0xff] %v3202_v52  ;;  %3986 = vst [vmem:[#allocation12_spill] sm:$0xff] %v3208_v53 }
 0x38e   :  { %1099 = vmatpush1.bf16.msra.mxu0 %v2798_v56  ;;  %1140 = vmatpush1.bf16.msra.mxu1 %v2803_v57 }
 0x38f   :  { %1100 = vmatprep.subr.bf16.mxu0 %v2810_v58  ;;  %1141 = vmatprep.subr.bf16.mxu1 %v2815_v59 }
 0x392   :  { %1101 = vmatpush1.bf16.msra.mxu0 %v2822_v60  ;;  %1142 = vmatpush1.bf16.msra.mxu1 %v3920_v28 }
 0x393   :  { %1102 = vmatprep.subr.bf16.mxu0 %v2834_v62  ;;  %1143 = vmatprep.subr.bf16.mxu1 %v2839_v63 }
 0x396   :  { %1103 = vmatpush1.bf16.msra.mxu0 %v3921_v21  ;;  %1144 = vmatpush1.bf16.msra.mxu1 %v2851_v1 }
 0x397   :  { %1195 = vmatprep.subr.bf16.mxu0 %v3110_v37  ;;  %1236 = vmatprep.subr.bf16.mxu1 %v3116_v38 }
 0x399   :  { %1121 = vmatmul.mubr.bf16.vlgmr.msra.gmra.mrb[28].mxu0 %v2136_v36  ;;  %1162 = vmatmul.mubr.bf16.vlgmr.msra.gmra.mrb[28].mxu1 %v2136_v36 }
 0x39a   :  { %1196 = vmatpush1.bf16.msra.mxu0 %v3122_v39  ;;  %1237 = vmatpush1.bf16.msra.mxu1 %v3128_v40 }
 0x39b   :  { %1197 = vmatprep.subr.bf16.mxu0 %v3134_v41  ;;  %1238 = vmatprep.subr.bf16.mxu1 %v3140_v42 }
 0x39c   :  { %1227 = vmatprep.mubr.bf16.mxu0 %v3919_v35  ;;  %1268 = vmatprep.mubr.bf16.mxu1 %v3919_v35 }
 0x39e   :  { %1198 = vmatpush1.bf16.msra.mxu0 %v3148_v43  ;;  %1239 = vmatpush1.bf16.msra.mxu1 %v3154_v44 }
 0x39f   :  { %1199 = vmatprep.subr.bf16.mxu0 %v3160_v45  ;;  %1240 = vmatprep.subr.bf16.mxu1 %v3166_v46 }
 0x3a2   :  { %1200 = vmatpush1.bf16.msra.mxu0 %v3172_v47  ;;  %1241 = vmatpush1.bf16.msra.mxu1 %v3178_v48 }
 0x3a3   :  { %1201 = vmatprep.subr.bf16.mxu0 %v3184_v49  ;;  %1242 = vmatprep.subr.bf16.mxu1 %v3190_v50 }
 0x3a6   :  { %1202 = vmatpush1.bf16.msra.mxu0 %v3196_v51  ;;  %1243 = vmatpush1.bf16.msra.mxu1 %v3202_v52 }
 0x3a7   :  { %1203 = vmatprep.subr.bf16.mxu0 %v3208_v53  ;;  %1244 = vmatprep.subr.bf16.mxu1 %v3214_v7 }
 0x3aa   :  { %1204 = vmatpush1.bf16.msra.mxu0 %v3220_v8  ;;  %1245 = vmatpush1.bf16.msra.mxu1 %v3226_v12 }
 0x3ab   :  { %1205 = vmatprep.subr.bf16.mxu0 %v3232_v15  ;;  %1246 = vmatprep.subr.bf16.mxu1 %v3238_v61 }
 0x3ae   :  { %1206 = vmatpush1.bf16.msra.mxu0 %v3244_v31  ;;  %1247 = vmatpush1.bf16.msra.mxu1 %v3250_v23 }
 0x3af   :  { %1207 = vmatprep.subr.bf16.mxu0 %v3256_v10  ;;  %1248 = vmatprep.subr.bf16.mxu1 %v3262_v20 }
 0x3b2   :  { %1208 = vmatpush1.bf16.msra.mxu0 %v3268_v29  ;;  %1249 = vmatpush1.bf16.msra.mxu1 %v3274_v0 }
 0x3b3   :  { %1209 = vmatprep.subr.bf16.mxu0 %v3280_v2  ;;  %1250 = vmatprep.subr.bf16.mxu1 %v3286_v22 }
 0x3b6   :  { %1210 = vmatpush1.bf16.msra.mxu0 %v3292_v3  ;;  %1251 = vmatpush1.bf16.msra.mxu1 %v3973_v27 }
 0x3b7   :  { %1277 = vmatprep.subr.bf16.mxu0 %v3974_v16  ;;  %1318 = vmatprep.subr.bf16.mxu1 %v3975_v9 }
 0x44c   :  { %v1040_v4 = vpop.f32.mrb[24].mxu0  ;;  %v1081_v5 = vpop.f32.mrb[24].mxu1 }
 0x44d   :  { %v1042_v6 = vpop.f32.mrb[25].mxu0  ;;  %v1083_v33 = vpop.f32.mrb[25].mxu1 }
 0x44e   :  { %v1044_v26 = vpop.f32.mrb[26].mxu0  ;;  %v1085_v34 = vpop.f32.mrb[26].mxu1 }
 0x44f   :  { %v1045_v11 = vpop.f32.mrb[27].mxu0  ;;  %v1086_v19 = vpop.f32.mrb[27].mxu1 }
 0x46c   :  { %v1122_v14 = vpop.f32.mrb[28].mxu0  ;;  %v1163_v17 = vpop.f32.mrb[28].mxu1 }
 0x46d   :  { %v1123_v32 = vadd.f32 %v1122_v14, %v1040_v4  ;;  %v1164_v36 = vadd.f32 %v1163_v17, %v1081_v5  ;;  %v1124_v22 = vpop.f32.mrb[29].mxu0  ;;  %v1165_v3 = vpop.f32.mrb[29].mxu1 }
 0x46e   :  { %v1125_v2 = vadd.f32 %v1124_v22, %v1042_v6  ;;  %v1166_v27 = vadd.f32 %v1165_v3, %v1083_v33  ;;  %v1126_v0 = vpop.f32.mrb[30].mxu0  ;;  %v1167_v16 = vpop.f32.mrb[30].mxu1 }
 0x46f   :  { %v1170_v9 = vadd.f32 %v1123_v32, %v2899_v30  ;;  %v1127_v29 = vpop.f32.mrb[31].mxu0  ;;  %v1168_v20 = vpop.f32.mrb[31].mxu1  ;;  %v1172_v11 = vadd.f32 %v1164_v36, %v2904_v13 }
 0x470   :  { %v1171_v10 = vadd.f32 %v1125_v2, %v2901_v18  ;;  %v1173_v4 = vadd.f32 %v1166_v27, %v2908_v25 }
 0x471   :  { %v1174_v26 = vmul.f32 0.5, %v1170_v9  ;;  %v3309_v9 = vld [vmem:[%s3779_s1] ss:$16 sps:$4 sm:$0xff]  }
 0x472   :  { %v1178_v34 = vmul.f32 0.5, %v1171_v10  ;;  %v1183_v5 = vmul.f32 0.5, %v1173_v4  ;;  %v3341_v4 = vld [vmem:[%s3779_s1 + $0x28] ss:$16 sps:$4 sm:$0xff]  }
 0x473   :  { %2316 = vtanh.f32 %v1174_v26  ;;  %v3321_v26 = vld [vmem:[%s3779_s1 + $0x24] ss:$16 sps:$4 sm:$0xff]  }
 0x474   :  { %2318 = vtanh.f32 %v1178_v34  ;;  %v3327_v34 = vld [vmem:[%s3779_s1 + $0x2c] ss:$16 sps:$4 sm:$0xff]  }
 0x475   :  { %2320 = vtanh.f32 %v1172_v11  ;;  %v3335_v11 = vld [vmem:[%s3779_s1 + $0x20] ss:$16 sps:$4 sm:$0xff]  }
 0x476   :  { %2322 = vtanh.f32 %v1183_v5  ;;  %v3347_v5 = vld [vmem:[%s3779_s1 + $0x44] ss:$16 sps:$4 sm:$0xff]  }
 0x47d   :  { %v2317_v22 = vpop.eup %2316 }
 0x47e   :  { %v2319_v3 = vpop.eup %2318  ;;  %v1176_v0 = vmul.f32 0.5, %v2317_v22  ;;  %v3353_v22 = vld [vmem:[%s3779_s1 + $0x4c] ss:$16 sps:$4 sm:$0xff]  }
 0x47f   :  { %v1180_v6 = vmul.f32 0.5, %v2319_v3  ;;  %v2321_v29 = vpop.eup %2320  ;;  %v3359_v3 = vld [vmem:[%s3779_s1 + $0x40] ss:$16 sps:$4 sm:$0xff]  }
 0x480   :  { %v1177_v33 = vadd.f32 0.5, %v1176_v0  ;;  %v2323_v14 = vpop.eup %2322  ;;  %v3365_v0 = vld [vmem:[%s3779_s1 + $0x48] ss:$16 sps:$4 sm:$0xff]  }
 0x481   :  { %v1181_v20 = vadd.f32 0.5, %v1180_v6  ;;  %v1185_v17 = vmul.f32 0.5, %v2323_v14  ;;  %v3371_v6 = vld [vmem:[%s3779_s1 + $0x64] ss:$16 sps:$4 sm:$0xff]   ;;  %v3407_v14 = vld [vmem:[%s3779_s1 + $0x80] ss:$16 sps:$4 sm:$0xff]  }
 0x482   :  { %v1188_v19 = vmul.f32 %v2321_v29, %v1177_v33  ;;  %v3377_v33 = vld [vmem:[%s3779_s1 + $0x6c] ss:$16 sps:$4 sm:$0xff]   ;;  %v3383_v29 = vld [vmem:[%s3779_s1 + $0x60] ss:$16 sps:$4 sm:$0xff]  }
 0x483   :  { %v1187_v2 = vmul.f32 %v1181_v20, %v3069_v24  ;;  %v1186_v32 = vadd.f32 0.5, %v1185_v17  ;;  %v3315_v24 = vld [vmem:[%s3779_s1 + $0x8] ss:$16 sps:$4 sm:$0xff]  }
 0x484   :  { %v3389_v20 = vld [vmem:[%s3779_s1 + $0x68] ss:$16 sps:$4 sm:$0xff]  }
 0x485   :  { %v3303_v10 = vadd.f32 %v1188_v19, %v1187_v2  ;;  %v3395_v19 = vld [vmem:[%s3779_s1 + $0x84] ss:$16 sps:$4 sm:$0xff]   ;;  %v3401_v2 = vld [vmem:[%s3779_s1 + $0x8c] ss:$16 sps:$4 sm:$0xff]   ;;  %v3413_v17 = vld [vmem:[%s3779_s1 + $0x88] ss:$16 sps:$4 sm:$0xff]  }
 0x487   :  { %2324 = vtanh.f32 %v3303_v10 }
 0x491   :  { %v2325_v36 = vpop.eup %2324 }
 0x492   :  { %v1191_v27 = vmul.f32 %v2325_v36, %v1186_v32 }
 0x494   :  { %v1192_v16 = vpack.c.bf16 %v1191_v27, %v1191_v27 }
 0x496   :  { %1228 = vmatmul.mubr.bf16.vlgmr.msra.gmra.mrb[32].mxu0 %v1192_v16  ;;  %1269 = vmatmul.mubr.bf16.vlgmr.msra.gmra.mrb[32].mxu1 %v1192_v16 }
 0x497   :  { %1278 = vmatpush1.bf16.msra.mxu0 %v3309_v9  ;;  %1319 = vmatpush1.bf16.msra.mxu1 %v3315_v24 }
 0x498   :  { %1279 = vmatprep.subr.bf16.mxu0 %v3321_v26  ;;  %1320 = vmatprep.subr.bf16.mxu1 %v3327_v34 }
 0x499   :  { %1309 = vmatprep.mubr.bf16.mxu0 %v3919_v35  ;;  %1350 = vmatprep.mubr.bf16.mxu1 %v3919_v35 }
 0x49b   :  { %1280 = vmatpush1.bf16.msra.mxu0 %v3335_v11  ;;  %1321 = vmatpush1.bf16.msra.mxu1 %v3341_v4 }
 0x49c   :  { %1281 = vmatprep.subr.bf16.mxu0 %v3347_v5  ;;  %1322 = vmatprep.subr.bf16.mxu1 %v3353_v22 }
 0x49f   :  { %1282 = vmatpush1.bf16.msra.mxu0 %v3359_v3  ;;  %1323 = vmatpush1.bf16.msra.mxu1 %v3365_v0 }
 0x4a0   :  { %1283 = vmatprep.subr.bf16.mxu0 %v3371_v6  ;;  %1324 = vmatprep.subr.bf16.mxu1 %v3377_v33 }
 0x4a3   :  { %1284 = vmatpush1.bf16.msra.mxu0 %v3383_v29  ;;  %1325 = vmatpush1.bf16.msra.mxu1 %v3389_v20 }
 0x4a4   :  { %1285 = vmatprep.subr.bf16.mxu0 %v3395_v19  ;;  %1326 = vmatprep.subr.bf16.mxu1 %v3401_v2 }
 0x4a7   :  { %1286 = vmatpush1.bf16.msra.mxu0 %v3407_v14  ;;  %1327 = vmatpush1.bf16.msra.mxu1 %v3413_v17 }
 0x4a8   :  { %1287 = vmatprep.subr.bf16.mxu0 %v2786_v54  ;;  %1328 = vmatprep.subr.bf16.mxu1 %v2791_v55  ;;  %v2137_v54 = vld [vmem:[%s3780_s0 + $0x10] sm:$0xf] }
 0x4a9   :  { %v4002_v55 = vld [vmem:[#allocation21_spill] sm:$0xff] }
 0x4ab   :  { %1288 = vmatpush1.bf16.msra.mxu0 %v2798_v56  ;;  %1329 = vmatpush1.bf16.msra.mxu1 %v2803_v57  ;;  %v4003_v56 = vld [vmem:[#allocation22_spill] sm:$0xff]  ;;  %v4004_v57 = vld [vmem:[#allocation23_spill] sm:$0xff] }
 0x4ac   :  { %1289 = vmatprep.subr.bf16.mxu0 %v2810_v58  ;;  %1330 = vmatprep.subr.bf16.mxu1 %v2815_v59  ;;  %v4005_v58 = vld [vmem:[#allocation24_spill] sm:$0xff]  ;;  %v4006_v59 = vld [vmem:[#allocation25_spill] sm:$0xff] }
 0x4af   :  { %1290 = vmatpush1.bf16.msra.mxu0 %v2822_v60  ;;  %1331 = vmatpush1.bf16.msra.mxu1 %v3920_v28  ;;  %v4007_v60 = vld [vmem:[#allocation26_spill] sm:$0xff]  ;;  %v3479_v28 = vld [vmem:[%s3779_s1 + $0xc] ss:$16 sps:$4 sm:$0xff]  }
 0x4b0   :  { %1291 = vmatprep.subr.bf16.mxu0 %v2834_v62  ;;  %1332 = vmatprep.subr.bf16.mxu1 %v2839_v63  ;;  %v3467_v62 = vld [vmem:[%s3778_s2 + $0xe8] ss:$16 sps:$4 sm:$0xff]   ;;  %v3473_v63 = vld [vmem:[%s3779_s1 + $0x4] ss:$16 sps:$4 sm:$0xff]   ;;  %4010 = vst [vmem:[#allocation29_spill] sm:$0xff] %v3479_v28 }
 0x4b1   :  { %4008 = vst [vmem:[#allocation27_spill] sm:$0xff] %v3467_v62  ;;  %4009 = vst [vmem:[#allocation28_spill] sm:$0xff] %v3473_v63 }
 0x4b3   :  { %1292 = vmatpush1.bf16.msra.mxu0 %v3921_v21  ;;  %1333 = vmatpush1.bf16.msra.mxu1 %v2851_v1  ;;  %v4001_v1 = vld [vmem:[#allocation20_spill] sm:$0xff] }
 0x4b4   :  { %1384 = vmatprep.subr.bf16.mxu0 %v3110_v37  ;;  %1425 = vmatprep.subr.bf16.mxu1 %v3116_v38 }
 0x4b6   :  { %1310 = vmatmul.mubr.bf16.vlgmr.msra.gmra.mrb[36].mxu0 %v2137_v54  ;;  %1351 = vmatmul.mubr.bf16.vlgmr.msra.gmra.mrb[36].mxu1 %v2137_v54 }
 0x4b7   :  { %1385 = vmatpush1.bf16.msra.mxu0 %v3122_v39  ;;  %1426 = vmatpush1.bf16.msra.mxu1 %v3128_v40 }
 0x4b8   :  { %1386 = vmatprep.subr.bf16.mxu0 %v3134_v41  ;;  %1427 = vmatprep.subr.bf16.mxu1 %v3140_v42 }
 0x4b9   :  { %1416 = vmatprep.mubr.bf16.mxu0 %v3919_v35  ;;  %1457 = vmatprep.mubr.bf16.mxu1 %v3919_v35 }
 0x4bb   :  { %1387 = vmatpush1.bf16.msra.mxu0 %v3148_v43  ;;  %1428 = vmatpush1.bf16.msra.mxu1 %v3154_v44 }
 0x4bc   :  { %1388 = vmatprep.subr.bf16.mxu0 %v3160_v45  ;;  %1429 = vmatprep.subr.bf16.mxu1 %v3166_v46 }
 0x4bf   :  { %1389 = vmatpush1.bf16.msra.mxu0 %v3172_v47  ;;  %1430 = vmatpush1.bf16.msra.mxu1 %v3178_v48 }
 0x4c0   :  { %1390 = vmatprep.subr.bf16.mxu0 %v3184_v49  ;;  %1431 = vmatprep.subr.bf16.mxu1 %v3190_v50 }
 0x4c3   :  { %1391 = vmatpush1.bf16.msra.mxu0 %v3196_v51  ;;  %1432 = vmatpush1.bf16.msra.mxu1 %v3202_v52 }
 0x4c4   :  { %1392 = vmatprep.subr.bf16.mxu0 %v3208_v53  ;;  %1433 = vmatprep.subr.bf16.mxu1 %v3214_v7 }
 0x4c7   :  { %1393 = vmatpush1.bf16.msra.mxu0 %v3220_v8  ;;  %1434 = vmatpush1.bf16.msra.mxu1 %v3226_v12 }
 0x4c8   :  { %1394 = vmatprep.subr.bf16.mxu0 %v3232_v15  ;;  %1435 = vmatprep.subr.bf16.mxu1 %v3238_v61 }
 0x4cb   :  { %1395 = vmatpush1.bf16.msra.mxu0 %v3244_v31  ;;  %1436 = vmatpush1.bf16.msra.mxu1 %v3250_v23 }
 0x4cc   :  { %1396 = vmatprep.subr.bf16.mxu0 %v4001_v1  ;;  %1437 = vmatprep.subr.bf16.mxu1 %v4002_v55 }
 0x4cf   :  { %1397 = vmatpush1.bf16.msra.mxu0 %v4003_v56  ;;  %1438 = vmatpush1.bf16.msra.mxu1 %v4004_v57 }
 0x4d0   :  { %1398 = vmatprep.subr.bf16.mxu0 %v4005_v58  ;;  %1439 = vmatprep.subr.bf16.mxu1 %v4006_v59 }
 0x4d3   :  { %1399 = vmatpush1.bf16.msra.mxu0 %v4007_v60  ;;  %1440 = vmatpush1.bf16.msra.mxu1 %v3467_v62 }
 0x4d4   :  { %1466 = vmatprep.subr.bf16.mxu0 %v3473_v63  ;;  %1507 = vmatprep.subr.bf16.mxu1 %v3479_v28 }
 0x569   :  { %v1229_v21 = vpop.f32.mrb[32].mxu0  ;;  %v1270_v32 = vpop.f32.mrb[32].mxu1 }
 0x56a   :  { %v1231_v36 = vpop.f32.mrb[33].mxu0  ;;  %v1272_v27 = vpop.f32.mrb[33].mxu1 }
 0x56b   :  { %v1233_v16 = vpop.f32.mrb[34].mxu0  ;;  %v1274_v54 = vpop.f32.mrb[34].mxu1 }
 0x56c   :  { %v1234_v62 = vpop.f32.mrb[35].mxu0  ;;  %v1275_v60 = vpop.f32.mrb[35].mxu1 }
 0x589   :  { %v1311_v59 = vpop.f32.mrb[36].mxu0  ;;  %v1352_v58 = vpop.f32.mrb[36].mxu1 }
 0x58a   :  { %v1312_v57 = vadd.f32 %v1311_v59, %v1229_v21  ;;  %v1353_v56 = vadd.f32 %v1352_v58, %v1270_v32  ;;  %v1313_v63 = vpop.f32.mrb[37].mxu0  ;;  %v1354_v55 = vpop.f32.mrb[37].mxu1 }
 0x58b   :  { %v1314_v1 = vadd.f32 %v1313_v63, %v1231_v36  ;;  %v1355_v23 = vadd.f32 %v1354_v55, %v1272_v27  ;;  %v1315_v31 = vpop.f32.mrb[38].mxu0  ;;  %v1356_v61 = vpop.f32.mrb[38].mxu1  ;;  %v3519_v27 = vld [vmem:[%s3779_s1 + $0xac] ss:$16 sps:$4 sm:$0xff]  }
 0x58c   :  { %v1359_v28 = vadd.f32 %v1312_v57, %v2899_v30  ;;  %v1316_v15 = vpop.f32.mrb[39].mxu0  ;;  %v1357_v12 = vpop.f32.mrb[39].mxu1  ;;  %v1361_v60 = vadd.f32 %v1353_v56, %v2904_v13 }
 0x58d   :  { %v1360_v8 = vadd.f32 %v1314_v1, %v2901_v18  ;;  %v1362_v58 = vadd.f32 %v1355_v23, %v2908_v25 }
 0x58e   :  { %v1363_v16 = vmul.f32 0.5, %v1359_v28 }
 0x58f   :  { %v1367_v54 = vmul.f32 0.5, %v1360_v8  ;;  %v1372_v59 = vmul.f32 0.5, %v1362_v58  ;;  %v3543_v58 = vld [vmem:[%s3779_s1 + $0xcc] ss:$16 sps:$4 sm:$0xff]  }
 0x590   :  { %2326 = vtanh.f32 %v1363_v16  ;;  %v3525_v16 = vld [vmem:[%s3779_s1 + $0xa0] ss:$16 sps:$4 sm:$0xff]  }
 0x591   :  { %2328 = vtanh.f32 %v1367_v54  ;;  %v3531_v54 = vld [vmem:[%s3779_s1 + $0xa8] ss:$16 sps:$4 sm:$0xff]  }
 0x592   :  { %2330 = vtanh.f32 %v1361_v60  ;;  %v3537_v60 = vld [vmem:[%s3779_s1 + $0xc4] ss:$16 sps:$4 sm:$0xff]  }
 0x593   :  { %2332 = vtanh.f32 %v1372_v59  ;;  %v3549_v59 = vld [vmem:[%s3779_s1 + $0xc0] ss:$16 sps:$4 sm:$0xff]  }
 0x59a   :  { %v2327_v62 = vpop.eup %2326 }
 0x59b   :  { %v2329_v55 = vpop.eup %2328  ;;  %v1365_v31 = vmul.f32 0.5, %v2327_v62  ;;  %v3555_v62 = vld [vmem:[%s3779_s1 + $0xc8] ss:$16 sps:$4 sm:$0xff]  }
 0x59c   :  { %v1369_v61 = vmul.f32 0.5, %v2329_v55  ;;  %v2331_v15 = vpop.eup %2330  ;;  %v3561_v55 = vld [vmem:[%s3779_s1 + $0xe4] ss:$16 sps:$4 sm:$0xff]  }
 0x59d   :  { %v1366_v57 = vadd.f32 0.5, %v1365_v31  ;;  %v2333_v56 = vpop.eup %2332  ;;  %v3567_v31 = vld [vmem:[%s3779_s1 + $0xec] ss:$16 sps:$4 sm:$0xff]  }
 0x59e   :  { %v1370_v12 = vadd.f32 0.5, %v1369_v61  ;;  %v1374_v28 = vmul.f32 0.5, %v2333_v56  ;;  %v3573_v61 = vld [vmem:[%s3779_s1 + $0xe0] ss:$16 sps:$4 sm:$0xff]  }
 0x59f   :  { %v1377_v63 = vmul.f32 %v2331_v15, %v1366_v57  ;;  %v3579_v57 = vld [vmem:[%s3779_s1 + $0xe8] ss:$16 sps:$4 sm:$0xff]   ;;  %v2138_v15 = vld [vmem:[%s3780_s0 + $0x14] sm:$0xf]  ;;  %v4014_v56 = vld [vmem:[#allocation17_spill] sm:$0xff] }
 0x5a0   :  { %v1376_v1 = vmul.f32 %v1370_v12, %v3303_v10  ;;  %v1375_v21 = vadd.f32 0.5, %v1374_v28  ;;  %v3513_v10 = vld [vmem:[%s3779_s1 + $0xa4] ss:$16 sps:$4 sm:$0xff]  }
 0x5a1   :  { %v4011_v12 = vld [vmem:[#allocation14_spill] sm:$0xff] }
 0x5a2   :  { %v3487_v8 = vadd.f32 %v1377_v63, %v1376_v1  ;;  %v4012_v63 = vld [vmem:[#allocation15_spill] sm:$0xff]  ;;  %v4013_v1 = vld [vmem:[#allocation16_spill] sm:$0xff]  ;;  %v4015_v28 = vld [vmem:[#allocation18_spill] sm:$0xff] }
 0x5a4   :  { %2334 = vtanh.f32 %v3487_v8 }
 0x5ae   :  { %v2335_v23 = vpop.eup %2334 }
 0x5af   :  { %v1380_v32 = vmul.f32 %v2335_v23, %v1375_v21  ;;  %v4016_v21 = vld [vmem:[#allocation19_spill] sm:$0xff]  ;;  %v4017_v23 = vld [vmem:[#allocation20_spill] sm:$0xff] }
 0x5b1   :  { %v1381_v36 = vpack.c.bf16 %v1380_v32, %v1380_v32  ;;  %v4018_v32 = vld [vmem:[#allocation21_spill] sm:$0xff] }
 0x5b3   :  { %1417 = vmatmul.mubr.bf16.vlgmr.msra.gmra.mrb[40].mxu0 %v1381_v36  ;;  %1458 = vmatmul.mubr.bf16.vlgmr.msra.gmra.mrb[40].mxu1 %v1381_v36  ;;  %v4019_v36 = vld [vmem:[#allocation22_spill] sm:$0xff] }
 0x5b4   :  { %1467 = vmatpush1.bf16.msra.mxu0 %v3309_v9  ;;  %1508 = vmatpush1.bf16.msra.mxu1 %v3315_v24 }
 0x5b5   :  { %1468 = vmatprep.subr.bf16.mxu0 %v3321_v26  ;;  %1509 = vmatprep.subr.bf16.mxu1 %v3327_v34 }
 0x5b6   :  { %1498 = vmatprep.mubr.bf16.mxu0 %v3919_v35  ;;  %1539 = vmatprep.mubr.bf16.mxu1 %v3919_v35 }
 0x5b8   :  { %1469 = vmatpush1.bf16.msra.mxu0 %v3335_v11  ;;  %1510 = vmatpush1.bf16.msra.mxu1 %v3341_v4 }
 0x5b9   :  { %1470 = vmatprep.subr.bf16.mxu0 %v3347_v5  ;;  %1511 = vmatprep.subr.bf16.mxu1 %v3353_v22 }
 0x5bc   :  { %1471 = vmatpush1.bf16.msra.mxu0 %v3359_v3  ;;  %1512 = vmatpush1.bf16.msra.mxu1 %v3365_v0 }
 0x5bd   :  { %1472 = vmatprep.subr.bf16.mxu0 %v3371_v6  ;;  %1513 = vmatprep.subr.bf16.mxu1 %v3377_v33 }
 0x5c0   :  { %1473 = vmatpush1.bf16.msra.mxu0 %v3383_v29  ;;  %1514 = vmatpush1.bf16.msra.mxu1 %v3389_v20 }
 0x5c1   :  { %1474 = vmatprep.subr.bf16.mxu0 %v3395_v19  ;;  %1515 = vmatprep.subr.bf16.mxu1 %v3401_v2 }
 0x5c4   :  { %1475 = vmatpush1.bf16.msra.mxu0 %v3407_v14  ;;  %1516 = vmatpush1.bf16.msra.mxu1 %v3413_v17 }
 0x5c5   :  { %1476 = vmatprep.subr.bf16.mxu0 %v3513_v10  ;;  %1517 = vmatprep.subr.bf16.mxu1 %v3519_v27 }
 0x5c8   :  { %1477 = vmatpush1.bf16.msra.mxu0 %v3525_v16  ;;  %1518 = vmatpush1.bf16.msra.mxu1 %v3531_v54 }
 0x5c9   :  { %1478 = vmatprep.subr.bf16.mxu0 %v3537_v60  ;;  %1519 = vmatprep.subr.bf16.mxu1 %v3543_v58 }
 0x5cc   :  { %1479 = vmatpush1.bf16.msra.mxu0 %v3549_v59  ;;  %1520 = vmatpush1.bf16.msra.mxu1 %v3555_v62 }
 0x5cd   :  { %1480 = vmatprep.subr.bf16.mxu0 %v3561_v55  ;;  %1521 = vmatprep.subr.bf16.mxu1 %v3567_v31 }
 0x5d0   :  { %1481 = vmatpush1.bf16.msra.mxu0 %v3573_v61  ;;  %1522 = vmatpush1.bf16.msra.mxu1 %v3579_v57 }
 0x5d1   :  { %1573 = vmatprep.subr.bf16.mxu0 %v3110_v37  ;;  %1614 = vmatprep.subr.bf16.mxu1 %v3116_v38 }
 0x5d3   :  { %1499 = vmatmul.mubr.bf16.vlgmr.msra.gmra.mrb[44].mxu0 %v2138_v15  ;;  %1540 = vmatmul.mubr.bf16.vlgmr.msra.gmra.mrb[44].mxu1 %v2138_v15  ;;  %v4020_v15 = vld [vmem:[#allocation23_spill] sm:$0xff] }
 0x5d4   :  { %1574 = vmatpush1.bf16.msra.mxu0 %v3122_v39  ;;  %1615 = vmatpush1.bf16.msra.mxu1 %v3128_v40 }
 0x5d5   :  { %1575 = vmatprep.subr.bf16.mxu0 %v3134_v41  ;;  %1616 = vmatprep.subr.bf16.mxu1 %v3140_v42 }
 0x5d6   :  { %1605 = vmatprep.mubr.bf16.mxu0 %v3919_v35  ;;  %1646 = vmatprep.mubr.bf16.mxu1 %v3919_v35 }
 0x5d8   :  { %1576 = vmatpush1.bf16.msra.mxu0 %v3148_v43  ;;  %1617 = vmatpush1.bf16.msra.mxu1 %v3154_v44 }
 0x5d9   :  { %1577 = vmatprep.subr.bf16.mxu0 %v3160_v45  ;;  %1618 = vmatprep.subr.bf16.mxu1 %v3166_v46 }
 0x5dc   :  { %1578 = vmatpush1.bf16.msra.mxu0 %v3172_v47  ;;  %1619 = vmatpush1.bf16.msra.mxu1 %v3178_v48 }
 0x5dd   :  { %1579 = vmatprep.subr.bf16.mxu0 %v3184_v49  ;;  %1620 = vmatprep.subr.bf16.mxu1 %v3190_v50 }
 0x5e0   :  { %1580 = vmatpush1.bf16.msra.mxu0 %v3196_v51  ;;  %1621 = vmatpush1.bf16.msra.mxu1 %v3202_v52 }
 0x5e1   :  { %1581 = vmatprep.subr.bf16.mxu0 %v3208_v53  ;;  %1622 = vmatprep.subr.bf16.mxu1 %v3214_v7  ;;  %v4021_v7 = vld [vmem:[#allocation24_spill] sm:$0xff] }
 0x5e4   :  { %1582 = vmatpush1.bf16.msra.mxu0 %v4011_v12  ;;  %1623 = vmatpush1.bf16.msra.mxu1 %v4012_v63  ;;  %v4022_v12 = vld [vmem:[#allocation25_spill] sm:$0xff]  ;;  %v4023_v63 = vld [vmem:[#allocation26_spill] sm:$0xff] }
 0x5e5   :  { %1583 = vmatprep.subr.bf16.mxu0 %v4013_v1  ;;  %1624 = vmatprep.subr.bf16.mxu1 %v4014_v56  ;;  %v4024_v1 = vld [vmem:[#allocation27_spill] sm:$0xff]  ;;  %v4025_v56 = vld [vmem:[#allocation28_spill] sm:$0xff] }
 0x5e8   :  { %1584 = vmatpush1.bf16.msra.mxu0 %v4015_v28  ;;  %1625 = vmatpush1.bf16.msra.mxu1 %v4016_v21  ;;  %v4026_v28 = vld [vmem:[#allocation29_spill] sm:$0xff] }
 0x5e9   :  { %1585 = vmatprep.subr.bf16.mxu0 %v4017_v23  ;;  %1626 = vmatprep.subr.bf16.mxu1 %v4018_v32 }
 0x5ec   :  { %1586 = vmatpush1.bf16.msra.mxu0 %v4019_v36  ;;  %1627 = vmatpush1.bf16.msra.mxu1 %v4020_v15 }
 0x5ed   :  { %1587 = vmatprep.subr.bf16.mxu0 %v4021_v7  ;;  %1628 = vmatprep.subr.bf16.mxu1 %v4022_v12 }
 0x5f0   :  { %1588 = vmatpush1.bf16.msra.mxu0 %v4023_v63  ;;  %1629 = vmatpush1.bf16.msra.mxu1 %v4024_v1 }
 0x5f1   :  { %1655 = vmatprep.subr.bf16.mxu0 %v4025_v56  ;;  %1696 = vmatprep.subr.bf16.mxu1 %v4026_v28 }
 0x686   :  { %v1418_v21 = vpop.f32.mrb[40].mxu0  ;;  %v1459_v23 = vpop.f32.mrb[40].mxu1 }
 0x687   :  { %v1420_v53 = vpop.f32.mrb[41].mxu0  ;;  %v1461_v32 = vpop.f32.mrb[41].mxu1 }
 0x688   :  { %v1422_v52 = vpop.f32.mrb[42].mxu0  ;;  %v1463_v36 = vpop.f32.mrb[42].mxu1 }
 0x689   :  { %v1423_v51 = vpop.f32.mrb[43].mxu0  ;;  %v1464_v15 = vpop.f32.mrb[43].mxu1 }
 0x68a   :  { %v4027_v15 = vld [vmem:[#allocation32_spill] sm:$0xff] }
 0x6a6   :  { %v1500_v50 = vpop.f32.mrb[44].mxu0  ;;  %v1541_v7 = vpop.f32.mrb[44].mxu1 }
 0x6a7   :  { %v1501_v49 = vadd.f32 %v1500_v50, %v1418_v21  ;;  %v1542_v12 = vadd.f32 %v1541_v7, %v1459_v23  ;;  %v1502_v48 = vpop.f32.mrb[45].mxu0  ;;  %v1543_v63 = vpop.f32.mrb[45].mxu1 }
 0x6a8   :  { %v1503_v47 = vadd.f32 %v1502_v48, %v1420_v53  ;;  %v1544_v1 = vadd.f32 %v1543_v63, %v1461_v32  ;;  %v1504_v46 = vpop.f32.mrb[46].mxu0  ;;  %v1545_v56 = vpop.f32.mrb[46].mxu1 }
 0x6a9   :  { %v1548_v28 = vadd.f32 %v1501_v49, %v2899_v30  ;;  %v1505_v45 = vpop.f32.mrb[47].mxu0  ;;  %v1546_v44 = vpop.f32.mrb[47].mxu1  ;;  %v1550_v51 = vadd.f32 %v1542_v12, %v2904_v13 }
 0x6aa   :  { %v1549_v43 = vadd.f32 %v1503_v47, %v2901_v18  ;;  %v1551_v50 = vadd.f32 %v1544_v1, %v2908_v25 }
 0x6ab   :  { %v1552_v52 = vmul.f32 0.5, %v1548_v28 }
 0x6ac   :  { %v1556_v36 = vmul.f32 0.5, %v1549_v43  ;;  %v1561_v7 = vmul.f32 0.5, %v1551_v50  ;;  %v4037_v50 = vld [vmem:[#allocation12_spill] sm:$0xff] }
 0x6ad   :  { %2336 = vtanh.f32 %v1552_v52  ;;  %v4028_v52 = vld [vmem:[#allocation33_spill] sm:$0xff] }
 0x6ae   :  { %2338 = vtanh.f32 %v1556_v36  ;;  %v4031_v36 = vld [vmem:[#allocation6_spill] sm:$0xff] }
 0x6af   :  { %2340 = vtanh.f32 %v1550_v51  ;;  %v4036_v51 = vld [vmem:[#allocation11_spill] sm:$0xff] }
 0x6b0   :  { %2342 = vtanh.f32 %v1561_v7  ;;  %v4038_v7 = vld [vmem:[#allocation13_spill] sm:$0xff] }
 0x6b7   :  { %v2337_v48 = vpop.eup %2336 }
 0x6b8   :  { %v2339_v53 = vpop.eup %2338  ;;  %v1554_v46 = vmul.f32 0.5, %v2337_v48  ;;  %v4039_v48 = vld [vmem:[#allocation14_spill] sm:$0xff] }
 0x6b9   :  { %v1558_v63 = vmul.f32 0.5, %v2339_v53  ;;  %v2341_v45 = vpop.eup %2340  ;;  %v4040_v53 = vld [vmem:[#allocation15_spill] sm:$0xff] }
 0x6ba   :  { %v1555_v49 = vadd.f32 0.5, %v1554_v46  ;;  %v2343_v12 = vpop.eup %2342  ;;  %v4041_v46 = vld [vmem:[#allocation16_spill] sm:$0xff] }
 0x6bb   :  { %v1559_v44 = vadd.f32 0.5, %v1558_v63  ;;  %v1563_v28 = vmul.f32 0.5, %v2343_v12  ;;  %v4042_v63 = vld [vmem:[#allocation17_spill] sm:$0xff]  ;;  %v4048_v12 = vld [vmem:[#allocation23_spill] sm:$0xff] }
 0x6bc   :  { %v1566_v56 = vmul.f32 %v2341_v45, %v1555_v49  ;;  %v4043_v49 = vld [vmem:[#allocation18_spill] sm:$0xff]  ;;  %v4044_v45 = vld [vmem:[#allocation19_spill] sm:$0xff] }
 0x6bd   :  { %v1565_v47 = vmul.f32 %v1559_v44, %v3487_v8  ;;  %v1564_v21 = vadd.f32 0.5, %v1563_v28  ;;  %v2139_v8 = vld [vmem:[%s3780_s0 + $0x18] sm:$0xf]  ;;  %v4045_v44 = vld [vmem:[#allocation20_spill] sm:$0xff] }
 0x6be   :  { %v4049_v28 = vld [vmem:[#allocation24_spill] sm:$0xff] }
 0x6bf   :  { %v3626_v43 = vadd.f32 %v1566_v56, %v1565_v47  ;;  %v4046_v56 = vld [vmem:[#allocation21_spill] sm:$0xff]  ;;  %v4047_v47 = vld [vmem:[#allocation22_spill] sm:$0xff] }
 0x6c1   :  { %2344 = vtanh.f32 %v3626_v43 }
 0x6cb   :  { %v2345_v1 = vpop.eup %2344 }
 0x6cc   :  { %v1569_v23 = vmul.f32 %v2345_v1, %v1564_v21  ;;  %v4050_v21 = vld [vmem:[#allocation25_spill] sm:$0xff]  ;;  %v4051_v1 = vld [vmem:[#allocation26_spill] sm:$0xff] }
 0x6ce   :  { %v1570_v32 = vpack.c.bf16 %v1569_v23, %v1569_v23  ;;  %v4052_v23 = vld [vmem:[#allocation27_spill] sm:$0xff] }
 0x6d0   :  { %1606 = vmatmul.mubr.bf16.vlgmr.msra.gmra.mrb[48].mxu0 %v1570_v32  ;;  %1647 = vmatmul.mubr.bf16.vlgmr.msra.gmra.mrb[48].mxu1 %v1570_v32  ;;  %v4053_v32 = vld [vmem:[#allocation28_spill] sm:$0xff] }
 0x6d1   :  { %1656 = vmatpush1.bf16.msra.mxu0 %v3309_v9  ;;  %1697 = vmatpush1.bf16.msra.mxu1 %v3315_v24 }
 0x6d2   :  { %1657 = vmatprep.subr.bf16.mxu0 %v3321_v26  ;;  %1698 = vmatprep.subr.bf16.mxu1 %v3327_v34 }
 0x6d3   :  { %1687 = vmatprep.mubr.bf16.mxu0 %v3919_v35  ;;  %1728 = vmatprep.mubr.bf16.mxu1 %v3919_v35 }
 0x6d5   :  { %1658 = vmatpush1.bf16.msra.mxu0 %v3335_v11  ;;  %1699 = vmatpush1.bf16.msra.mxu1 %v3341_v4 }
 0x6d6   :  { %1659 = vmatprep.subr.bf16.mxu0 %v3347_v5  ;;  %1700 = vmatprep.subr.bf16.mxu1 %v3353_v22 }
 0x6d9   :  { %1660 = vmatpush1.bf16.msra.mxu0 %v3359_v3  ;;  %1701 = vmatpush1.bf16.msra.mxu1 %v3365_v0 }
 0x6da   :  { %1661 = vmatprep.subr.bf16.mxu0 %v3371_v6  ;;  %1702 = vmatprep.subr.bf16.mxu1 %v3377_v33 }
 0x6dd   :  { %1662 = vmatpush1.bf16.msra.mxu0 %v3383_v29  ;;  %1703 = vmatpush1.bf16.msra.mxu1 %v3389_v20 }
 0x6de   :  { %1663 = vmatprep.subr.bf16.mxu0 %v3395_v19  ;;  %1704 = vmatprep.subr.bf16.mxu1 %v3401_v2 }
 0x6e1   :  { %1664 = vmatpush1.bf16.msra.mxu0 %v3407_v14  ;;  %1705 = vmatpush1.bf16.msra.mxu1 %v3413_v17 }
 0x6e2   :  { %1665 = vmatprep.subr.bf16.mxu0 %v3513_v10  ;;  %1706 = vmatprep.subr.bf16.mxu1 %v3519_v27 }
 0x6e5   :  { %1666 = vmatpush1.bf16.msra.mxu0 %v3525_v16  ;;  %1707 = vmatpush1.bf16.msra.mxu1 %v3531_v54 }
 0x6e6   :  { %1667 = vmatprep.subr.bf16.mxu0 %v3537_v60  ;;  %1708 = vmatprep.subr.bf16.mxu1 %v3543_v58 }
 0x6e9   :  { %1668 = vmatpush1.bf16.msra.mxu0 %v3549_v59  ;;  %1709 = vmatpush1.bf16.msra.mxu1 %v3555_v62 }
 0x6ea   :  { %1669 = vmatprep.subr.bf16.mxu0 %v3561_v55  ;;  %1710 = vmatprep.subr.bf16.mxu1 %v3567_v31 }
 0x6ed   :  { %1670 = vmatpush1.bf16.msra.mxu0 %v3573_v61  ;;  %1711 = vmatpush1.bf16.msra.mxu1 %v3579_v57 }
 0x6ee   :  { %1762 = vmatprep.subr.bf16.mxu0 %v3110_v37  ;;  %1803 = vmatprep.subr.bf16.mxu1 %v3116_v38  ;;  %v4029_v37 = vld [vmem:[#allocation4_spill] sm:$0xff]  ;;  %v4030_v38 = vld [vmem:[#allocation5_spill] sm:$0xff] }
 0x6f0   :  { %1688 = vmatmul.mubr.bf16.vlgmr.msra.gmra.mrb[52].mxu0 %v2139_v8  ;;  %1729 = vmatmul.mubr.bf16.vlgmr.msra.gmra.mrb[52].mxu1 %v2139_v8  ;;  %v4054_v8 = vld [vmem:[#allocation29_spill] sm:$0xff] }
 0x6f1   :  { %1763 = vmatpush1.bf16.msra.mxu0 %v3122_v39  ;;  %1804 = vmatpush1.bf16.msra.mxu1 %v3128_v40  ;;  %v4032_v39 = vld [vmem:[#allocation7_spill] sm:$0xff]  ;;  %v4033_v40 = vld [vmem:[#allocation8_spill] sm:$0xff] }
 0x6f2   :  { %1764 = vmatprep.subr.bf16.mxu0 %v3134_v41  ;;  %1805 = vmatprep.subr.bf16.mxu1 %v3140_v42  ;;  %v4034_v41 = vld [vmem:[#allocation9_spill] sm:$0xff]  ;;  %v4035_v42 = vld [vmem:[#allocation10_spill] sm:$0xff] }
 0x6f3   :  { %1794 = vmatprep.mubr.bf16.mxu0 %v3919_v35  ;;  %1835 = vmatprep.mubr.bf16.mxu1 %v3919_v35 }
 0x6f5   :  { %1765 = vmatpush1.bf16.msra.mxu0 %v4027_v15  ;;  %1806 = vmatpush1.bf16.msra.mxu1 %v4028_v52 }
 0x6f6   :  { %1766 = vmatprep.subr.bf16.mxu0 %v4029_v37  ;;  %1807 = vmatprep.subr.bf16.mxu1 %v4030_v38 }
 0x6f9   :  { %1767 = vmatpush1.bf16.msra.mxu0 %v4031_v36  ;;  %1808 = vmatpush1.bf16.msra.mxu1 %v4032_v39 }
 0x6fa   :  { %1768 = vmatprep.subr.bf16.mxu0 %v4033_v40  ;;  %1809 = vmatprep.subr.bf16.mxu1 %v4034_v41 }
 0x6fd   :  { %1769 = vmatpush1.bf16.msra.mxu0 %v4035_v42  ;;  %1810 = vmatpush1.bf16.msra.mxu1 %v4036_v51 }
 0x6fe   :  { %1770 = vmatprep.subr.bf16.mxu0 %v4037_v50  ;;  %1811 = vmatprep.subr.bf16.mxu1 %v4038_v7 }
 0x701   :  { %1771 = vmatpush1.bf16.msra.mxu0 %v4039_v48  ;;  %1812 = vmatpush1.bf16.msra.mxu1 %v4040_v53 }
 0x702   :  { %1772 = vmatprep.subr.bf16.mxu0 %v4041_v46  ;;  %1813 = vmatprep.subr.bf16.mxu1 %v4042_v63 }
 0x705   :  { %1773 = vmatpush1.bf16.msra.mxu0 %v4043_v49  ;;  %1814 = vmatpush1.bf16.msra.mxu1 %v4044_v45 }
 0x706   :  { %1774 = vmatprep.subr.bf16.mxu0 %v4045_v44  ;;  %1815 = vmatprep.subr.bf16.mxu1 %v4046_v56 }
 0x709   :  { %1775 = vmatpush1.bf16.msra.mxu0 %v4047_v47  ;;  %1816 = vmatpush1.bf16.msra.mxu1 %v4048_v12 }
 0x70a   :  { %1776 = vmatprep.subr.bf16.mxu0 %v4049_v28  ;;  %1817 = vmatprep.subr.bf16.mxu1 %v4050_v21 }
 0x70d   :  { %1777 = vmatpush1.bf16.msra.mxu0 %v4051_v1  ;;  %1818 = vmatpush1.bf16.msra.mxu1 %v4052_v23 }
 0x70e   :  { %1844 = vmatprep.subr.bf16.mxu0 %v4053_v32  ;;  %1885 = vmatprep.subr.bf16.mxu1 %v4054_v8 }
 0x7a3   :  { %v1607_v15 = vpop.f32.mrb[48].mxu0  ;;  %v1648_v52 = vpop.f32.mrb[48].mxu1 }
 0x7a4   :  { %v1609_v37 = vpop.f32.mrb[49].mxu0  ;;  %v1650_v38 = vpop.f32.mrb[49].mxu1 }
 0x7a5   :  { %v1611_v36 = vpop.f32.mrb[50].mxu0  ;;  %v1652_v39 = vpop.f32.mrb[50].mxu1 }
 0x7a6   :  { %v1612_v40 = vpop.f32.mrb[51].mxu0  ;;  %v1653_v41 = vpop.f32.mrb[51].mxu1 }
 0x7c3   :  { %v1689_v42 = vpop.f32.mrb[52].mxu0  ;;  %v1730_v51 = vpop.f32.mrb[52].mxu1 }
 0x7c4   :  { %v1690_v50 = vadd.f32 %v1689_v42, %v1607_v15  ;;  %v1731_v7 = vadd.f32 %v1730_v51, %v1648_v52  ;;  %v1691_v48 = vpop.f32.mrb[53].mxu0  ;;  %v1732_v53 = vpop.f32.mrb[53].mxu1 }
 0x7c5   :  { %v1692_v46 = vadd.f32 %v1691_v48, %v1609_v37  ;;  %v1733_v63 = vadd.f32 %v1732_v53, %v1650_v38  ;;  %v1693_v49 = vpop.f32.mrb[54].mxu0  ;;  %v1734_v45 = vpop.f32.mrb[54].mxu1 }
 0x7c6   :  { %v1737_v44 = vadd.f32 %v1690_v50, %v2899_v30  ;;  %v1694_v56 = vpop.f32.mrb[55].mxu0  ;;  %v1735_v47 = vpop.f32.mrb[55].mxu1  ;;  %v1739_v1 = vadd.f32 %v1731_v7, %v2904_v13 }
 0x7c7   :  { %v1738_v12 = vadd.f32 %v1692_v46, %v2901_v18  ;;  %v1740_v23 = vadd.f32 %v1733_v63, %v2908_v25 }
 0x7c8   :  { %v1741_v28 = vmul.f32 0.5, %v1737_v44 }
 0x7c9   :  { %v1745_v21 = vmul.f32 0.5, %v1738_v12  ;;  %v1750_v32 = vmul.f32 0.5, %v1740_v23 }
 0x7ca   :  { %2346 = vtanh.f32 %v1741_v28 }
 0x7cb   :  { %2348 = vtanh.f32 %v1745_v21 }
 0x7cc   :  { %2350 = vtanh.f32 %v1739_v1 }
 0x7cd   :  { %2352 = vtanh.f32 %v1750_v32 }
 0x7d4   :  { %v2347_v8 = vpop.eup %2346 }
 0x7d5   :  { %v2349_v15 = vpop.eup %2348  ;;  %v1743_v52 = vmul.f32 0.5, %v2347_v8 }
 0x7d6   :  { %v1747_v37 = vmul.f32 0.5, %v2349_v15  ;;  %v2351_v36 = vpop.eup %2350 }
 0x7d7   :  { %v1744_v38 = vadd.f32 0.5, %v1743_v52  ;;  %v2353_v51 = vpop.eup %2352 }
 0x7d8   :  { %v1748_v39 = vadd.f32 0.5, %v1747_v37  ;;  %v1752_v50 = vmul.f32 0.5, %v2353_v51 }
 0x7d9   :  { %v1755_v40 = vmul.f32 %v2351_v36, %v1744_v38  ;;  %v2141_v36 = vld [vmem:[%s3783_s5] ss:$0 sm:$0xff] }
 0x7da   :  { %v1754_v41 = vmul.f32 %v1748_v39, %v3626_v43  ;;  %v1753_v7 = vadd.f32 0.5, %v1752_v50 }
 0x7dc   :  { %v3705_v42 = vadd.f32 %v1755_v40, %v1754_v41 }
 0x7de   :  { %2354 = vtanh.f32 %v3705_v42 }
 0x7e8   :  { %v2355_v48 = vpop.eup %2354 }
 0x7e9   :  { %v1758_v53 = vmul.f32 %v2355_v48, %v1753_v7 }
 0x7eb   :  { %v1759_v46 = vpack.c.bf16 %v1758_v53, %v1758_v53 }
 0x7ed   :  { %1795 = vmatmul.mubr.bf16.vlgmr.msra.gmra.mrb[56].mxu0 %v1759_v46  ;;  %1836 = vmatmul.mubr.bf16.vlgmr.msra.gmra.mrb[56].mxu1 %v1759_v46 }
 0x7ee   :  { %1845 = vmatpush1.bf16.msra.mxu0 %v3309_v9  ;;  %1886 = vmatpush1.bf16.msra.mxu1 %v3315_v24  ;;  %v2278_v9 = vld [vmem:[%s3782_s4] sm:$0xff]   ;;  %v2431_v24 = vmov 0.0  }
 0x7ef   :  { %1846 = vmatprep.subr.bf16.mxu0 %v3321_v26  ;;  %1887 = vmatprep.subr.bf16.mxu1 %v3327_v34  ;;  %v2279_v26 = vld [vmem:[%s3782_s4 + $0x8] sm:$0xff]   ;;  %v2280_v34 = vld [vmem:[%s3782_s4 + $0x10] sm:$0xff]  }
 0x7f0   :  { %1876 = vmatprep.mubr.bf16.mxu0 %v3919_v35  ;;  %1917 = vmatprep.mubr.bf16.mxu1 %v3919_v35  ;;  %v2140_v35 = vld [vmem:[%s3780_s0 + $0x1c] sm:$0xf] }
 0x7f2   :  { %1847 = vmatpush1.bf16.msra.mxu0 %v3335_v11  ;;  %1888 = vmatpush1.bf16.msra.mxu1 %v3341_v4  ;;  %v2281_v11 = vld [vmem:[%s3782_s4 + $0x18] sm:$0xff]   ;;  %v2282_v4 = vld [vmem:[%s3782_s4 + $0x20] sm:$0xff]  }
 0x7f3   :  { %1848 = vmatprep.subr.bf16.mxu0 %v3347_v5  ;;  %1889 = vmatprep.subr.bf16.mxu1 %v3353_v22  ;;  %v2283_v5 = vld [vmem:[%s3782_s4 + $0x28] sm:$0xff]   ;;  %v2284_v22 = vld [vmem:[%s3782_s4 + $0x30] sm:$0xff]  }
 0x7f6   :  { %1849 = vmatpush1.bf16.msra.mxu0 %v3359_v3  ;;  %1890 = vmatpush1.bf16.msra.mxu1 %v3365_v0  ;;  %v2285_v3 = vld [vmem:[%s3782_s4 + $0x38] sm:$0xff]  }
 0x7f7   :  { %1850 = vmatprep.subr.bf16.mxu0 %v3371_v6  ;;  %1891 = vmatprep.subr.bf16.mxu1 %v3377_v33 }
 0x7fa   :  { %1851 = vmatpush1.bf16.msra.mxu0 %v3383_v29  ;;  %1892 = vmatpush1.bf16.msra.mxu1 %v3389_v20 }
 0x7fb   :  { %1852 = vmatprep.subr.bf16.mxu0 %v3395_v19  ;;  %1893 = vmatprep.subr.bf16.mxu1 %v3401_v2 }
 0x7fe   :  { %1853 = vmatpush1.bf16.msra.mxu0 %v3407_v14  ;;  %1894 = vmatpush1.bf16.msra.mxu1 %v3413_v17 }
 0x7ff   :  { %1854 = vmatprep.subr.bf16.mxu0 %v3513_v10  ;;  %1895 = vmatprep.subr.bf16.mxu1 %v3519_v27 }
 0x802   :  { %1855 = vmatpush1.bf16.msra.mxu0 %v3525_v16  ;;  %1896 = vmatpush1.bf16.msra.mxu1 %v3531_v54 }
 0x803   :  { %1856 = vmatprep.subr.bf16.mxu0 %v3537_v60  ;;  %1897 = vmatprep.subr.bf16.mxu1 %v3543_v58 }
 0x806   :  { %1857 = vmatpush1.bf16.msra.mxu0 %v3549_v59  ;;  %1898 = vmatpush1.bf16.msra.mxu1 %v3555_v62 }
 0x807   :  { %1858 = vmatprep.subr.bf16.mxu0 %v3561_v55  ;;  %1899 = vmatprep.subr.bf16.mxu1 %v3567_v31 }
 0x80a   :  { %1859 = vmatpush1.bf16.msra.mxu0 %v3573_v61  ;;  %1900 = vmatpush1.bf16.msra.mxu1 %v3579_v57 }
 0x80b   :  { %2159 = vmatprep.subr.bf16.mxu0 %v2431_v24 }
 0x80d   :  { %1877 = vmatmul.mubr.bf16.vlgmr.msra.gmra.mrb[60].mxu0 %v2140_v35  ;;  %1918 = vmatmul.mubr.bf16.vlgmr.msra.gmra.mrb[60].mxu1 %v2140_v35 }
 0x80e   :  { %2160 = vmatpush3.bf16.msra.mxu0 %v2278_v9  ;;  %2175 = vmatprep.mubr.msk.bf16.mxu0 %vm2432_vm0, %v2431_v24 }
 0x80f   :  { %2161 = vmatprep.subr.bf16.mxu0 %v2431_v24 }
 0x812   :  { %2162 = vmatpush3.bf16.msra.mxu0 %v2279_v26 }
 0x813   :  { %2163 = vmatprep.subr.bf16.mxu0 %v2431_v24 }
 0x816   :  { %2164 = vmatpush3.bf16.msra.mxu0 %v2280_v34 }
 0x817   :  { %2165 = vmatprep.subr.bf16.mxu0 %v2431_v24 }
 0x81a   :  { %2166 = vmatpush3.bf16.msra.mxu0 %v2281_v11 }
 0x81b   :  { %2167 = vmatprep.subr.bf16.mxu0 %v2431_v24 }
 0x81e   :  { %2168 = vmatpush3.bf16.msra.mxu0 %v2282_v4 }
 0x81f   :  { %2169 = vmatprep.subr.bf16.mxu0 %v2431_v24 }
 0x822   :  { %2170 = vmatpush3.bf16.msra.mxu0 %v2283_v5 }
 0x823   :  { %2171 = vmatprep.subr.bf16.mxu0 %v2431_v24 }
 0x826   :  { %2172 = vmatpush3.bf16.msra.mxu0 %v2284_v22 }
 0x827   :  { %2173 = vmatprep.subr.bf16.mxu0 %v2431_v24 }
 0x82a   :  { %2174 = vmatpush3.bf16.msra.mxu0 %v2285_v3 }
 0x8c0   :  { %v1796_v0 = vpop.f32.mrb[56].mxu0  ;;  %v1837_v6 = vpop.f32.mrb[56].mxu1 }
 0x8c1   :  { %v1798_v33 = vpop.f32.mrb[57].mxu0  ;;  %v1839_v29 = vpop.f32.mrb[57].mxu1 }
 0x8c2   :  { %v1800_v20 = vpop.f32.mrb[58].mxu0  ;;  %v1841_v19 = vpop.f32.mrb[58].mxu1 }
 0x8c3   :  { %v1801_v2 = vpop.f32.mrb[59].mxu0  ;;  %v1842_v14 = vpop.f32.mrb[59].mxu1 }
 0x8e0   :  { %v1878_v17 = vpop.f32.mrb[60].mxu0  ;;  %v1919_v10 = vpop.f32.mrb[60].mxu1 }
 0x8e1   :  { %v1879_v27 = vadd.f32 %v1878_v17, %v1796_v0  ;;  %v1920_v16 = vadd.f32 %v1919_v10, %v1837_v6  ;;  %v1880_v54 = vpop.f32.mrb[61].mxu0  ;;  %v1921_v60 = vpop.f32.mrb[61].mxu1 }
 0x8e2   :  { %v1881_v58 = vadd.f32 %v1880_v54, %v1798_v33  ;;  %v1922_v59 = vadd.f32 %v1921_v60, %v1839_v29  ;;  %v1882_v62 = vpop.f32.mrb[62].mxu0  ;;  %v1923_v55 = vpop.f32.mrb[62].mxu1 }
 0x8e3   :  { %v1926_v31 = vadd.f32 %v1879_v27, %v2899_v30  ;;  %v1883_v61 = vpop.f32.mrb[63].mxu0  ;;  %v1924_v57 = vpop.f32.mrb[63].mxu1  ;;  %v1928_v45 = vadd.f32 %v1920_v16, %v2904_v13 }
 0x8e4   :  { %v1927_v43 = vadd.f32 %v1881_v58, %v2901_v18  ;;  %v1929_v44 = vadd.f32 %v1922_v59, %v2908_v25 }
 0x8e5   :  { %v1930_v63 = vmul.f32 0.5, %v1926_v31 }
 0x8e6   :  { %v1934_v49 = vmul.f32 0.5, %v1927_v43  ;;  %v1939_v56 = vmul.f32 0.5, %v1929_v44 }
 0x8e7   :  { %2356 = vtanh.f32 %v1930_v63 }
 0x8e8   :  { %2358 = vtanh.f32 %v1934_v49 }
 0x8e9   :  { %2360 = vtanh.f32 %v1928_v45 }
 0x8ea   :  { %2362 = vtanh.f32 %v1939_v56 }
 0x8f1   :  { %v2357_v47 = vpop.eup %2356 }
 0x8f2   :  { %v2359_v12 = vpop.eup %2358  ;;  %v1932_v28 = vmul.f32 0.5, %v2357_v47 }
 0x8f3   :  { %v1936_v21 = vmul.f32 0.5, %v2359_v12  ;;  %v2361_v1 = vpop.eup %2360 }
 0x8f4   :  { %v1933_v30 = vadd.f32 0.5, %v1932_v28  ;;  %v2363_v15 = vpop.eup %2362 }
 0x8f5   :  { %v1937_v23 = vadd.f32 0.5, %v1936_v21  ;;  %v1941_v13 = vmul.f32 0.5, %v2363_v15 }
 0x8f6   :  { %v1944_v32 = vmul.f32 %v2361_v1, %v1933_v30 }
 0x8f7   :  { %v1943_v18 = vmul.f32 %v1937_v23, %v3705_v42  ;;  %v1942_v52 = vadd.f32 0.5, %v1941_v13 }
 0x8f9   :  { %v1945_v8 = vadd.f32 %v1944_v32, %v1943_v18 }
 0x8fb   :  { %2364 = vtanh.f32 %v1945_v8 }
 0x905   :  { %v2365_v37 = vpop.eup %2364 }
 0x906   :  { %v1947_v38 = vmul.f32 %v2365_v37, %v1942_v52 }
 0x908   :  { %v1948_v25 = vpack.c.bf16 %v1947_v38, %v1947_v38 }
 0x90a   :  { %1949 = vst [vmem:[#allocation2] sm:$0xf] %v1948_v25  ;;  %2176 = vmatmul.mubr.bf16.vlgmr.msra.gmra.mrb[64].mxu0 %v1948_v25 }
 0x9dd   :  { %v2059_v39 = vpop.f32.mrb[64].mxu0 }
 0x9de   :  { %v2060_v40 = vadd.f32 %v2141_v36, %v2059_v39  ;;  %v2177_v41 = vpop.f32.mrb[65].mxu0 }
 0x9df   :  { %v2062_v51 = vpop.f32.mrb[66].mxu0 }
 0x9e0   :  { %2065 = vst [vmem:[%s3784_s6] sm:$0xff] %v2060_v40  ;;  %v2178_v42 = vpop.f32.mrb[67].mxu0 }

// kernel: rnn_forward.2
= control target key start
LH: loop header
LB: loop body
LE: loop exit
PB: predicated region body
PF: predicated region fallthrough
CT: control target
= control target key end

     0   :  { %9 = vsyncpa [#allocation5], 0  ;;  %s6731_s0 = inlined_call_operand.vmem [shape: bf16[8,8,128], index: 0, kind: input, shape index: {}]   ;;  %s6732_s1 = inlined_call_operand.hbm [shape: bf16[128,512], index: 1, kind: input, shape index: {}]   ;;  %s6733_s2 = inlined_call_operand.hbm [shape: bf16[128,512], index: 2, kind: input, shape index: {}]   ;;  %s6734_s3 = inlined_call_operand.vmem [shape: f32[1,512], index: 3, kind: input, shape index: {}]   ;;  %s6735_s4 = inlined_call_operand.vmem [shape: bf16[8,8,128], index: 4, kind: output, shape index: {}]  }
   0x1   :  { %10 = vsyncpa [#allocation7], 0  ;;  %s5629_s15 = smov [#allocation4]   ;;  %s5581_s19 = scalar_lea.hbm %s6732_s1, 4096 }
   0x2   :  { %s18_s16 = sshll.u32 %s5629_s15, 4  ;;  %p5582_p0 = scmp.ne.s32.totalorder %s6732_s1, %s5581_s19  ;;  %s19_s16 = int_to_ptr.vmem [resolvable:$true] %s18_s16 }
   0x3   :  { %p5585_p1 = scmp.lt.u32.totalorder %s5581_s19, %s6732_s1 }
   0x5   :  { %p5587_p2 = pnand %p5585_p1, %p5582_p0 }
   0x7   :  { %5590 = shalt.err (!%p5587_p2)
}
   0x8   :  { %s5591_s24 = scalar_lea.vmem %s19_s16, 4096  ;;  %p5596_p4 = scmp.lt.s32.totalorder %s19_s16, %s19_s16 }
   0x9   :  { %p5592_p3 = scmp.ne.s32.totalorder %s19_s16, %s5591_s24  ;;  %p5597_p5 = scmp.lt.s32.totalorder %s5591_s24, %s5591_s24 }
   0xb   :  { %p5598_p6 = por %p5597_p5, %p5596_p4 }
   0xd   :  { %p5599_p7 = pnand %p5598_p6, %p5592_p3 }
   0xf   :  { %5602 = shalt.err (!%p5599_p7)
}
  0x10   :  { %s5630_s25 = smov 256   ;;  %s5631_s26 = smov 16  }
  0x11   :  { %24 = dma.hbm_to_vmem [thread:$0]  %s6732_s1, 4096, %s19_s16, [#allocation5], %s5630_s25, %s5630_s25, %s5631_s26  }
  0x12   :  { %s5632_s29 = smov [#allocation6]   ;;  %s5603_s7 = scalar_lea.hbm %s6733_s2, 4096 }
  0x13   :  { %s30_s30 = sshll.u32 %s5632_s29, 4  ;;  %p5604_p8 = scmp.ne.s32.totalorder %s6733_s2, %s5603_s7  ;;  %s31_s30 = int_to_ptr.vmem [resolvable:$true] %s30_s30 }
  0x14   :  { %p5607_p9 = scmp.lt.u32.totalorder %s5603_s7, %s6733_s2 }
  0x16   :  { %p5609_p10 = pnand %p5607_p9, %p5604_p8 }
  0x18   :  { %5612 = shalt.err (!%p5609_p10)
}
  0x19   :  { %s5613_s12 = scalar_lea.vmem %s31_s30, 4096  ;;  %p5618_p12 = scmp.lt.s32.totalorder %s31_s30, %s31_s30 }
  0x1a   :  { %p5614_p11 = scmp.ne.s32.totalorder %s31_s30, %s5613_s12  ;;  %p5619_p13 = scmp.lt.s32.totalorder %s5613_s12, %s5613_s12 }
  0x1c   :  { %p5620_p0 = por %p5619_p13, %p5618_p12 }
  0x1e   :  { %p5621_p1 = pnand %p5620_p0, %p5614_p11 }
  0x20   :  { %5624 = shalt.err (!%p5621_p1)
}
  0x21   :  { %36 = dma.hbm_to_vmem [thread:$0]  %s6733_s2, 4096, %s31_s30, [#allocation7], %s5630_s25, %s5630_s25, %s5631_s26  }
  0x22   :  { %5625 = dma.done.wait [#allocation5], 4096  }
  0x23   :  { %5626 = vsyncadd [#allocation5], 4294963200 }
  0x24   :  { %5627 = dma.done.wait [#allocation7], 4096  }
  0x25   :  { %5628 = vsyncadd [#allocation7], 4294963200  ;;  %v6736_v0 = vmov 0   ;;  %v5686_v1 = vld [vmem:[#allocation6 + $0x4] ss:$16 sps:$4 sm:$0xff]  }
  0x26   :  { %312 = vmatprep.mubr.bf16.mxu0 %v6736_v0  ;;  %50 = vst [vmem:[#allocation2] sm:$0xf] %v6736_v0  ;;  %353 = vmatprep.mubr.bf16.mxu1 %v6736_v0  ;;  %v5688_v2 = vld [vmem:[#allocation6 + $0xc] ss:$16 sps:$4 sm:$0xff]   ;;  %v5691_v3 = vld [vmem:[#allocation6] ss:$16 sps:$4 sm:$0xff]  }
  0x27   :  { %280 = vmatprep.subr.bf16.mxu0 %v5686_v1  ;;  %v5693_v4 = vld [vmem:[#allocation6 + $0x8] ss:$16 sps:$4 sm:$0xff]   ;;  %321 = vmatprep.subr.bf16.mxu1 %v5688_v2  ;;  %v5696_v5 = vld [vmem:[#allocation6 + $0x24] ss:$16 sps:$4 sm:$0xff]   ;;  %v5700_v6 = vld [vmem:[#allocation6 + $0x2c] ss:$16 sps:$4 sm:$0xff]  }
  0x28   :  { %281 = vmatpush1.bf16.msra.mxu0 %v5691_v3  ;;  %322 = vmatpush1.bf16.msra.mxu1 %v5693_v4  ;;  %v5702_v7 = vld [vmem:[#allocation6 + $0x20] ss:$16 sps:$4 sm:$0xff]   ;;  %v5705_v8 = vld [vmem:[#allocation6 + $0x28] ss:$16 sps:$4 sm:$0xff]   ;;  %v5708_v9 = vld [vmem:[#allocation6 + $0x44] ss:$16 sps:$4 sm:$0xff]  }
  0x29   :  { %282 = vmatprep.subr.bf16.mxu0 %v5696_v5  ;;  %323 = vmatprep.subr.bf16.mxu1 %v5700_v6  ;;  %6810 = vst [vmem:[#allocation10_spill] sm:$0xff] %v5708_v9  ;;  %v5710_v10 = vld [vmem:[#allocation6 + $0x4c] ss:$16 sps:$4 sm:$0xff]   ;;  %v5712_v11 = vld [vmem:[#allocation6 + $0x40] ss:$16 sps:$4 sm:$0xff]  }
  0x2a   :  { %6811 = vst [vmem:[#allocation11_spill] sm:$0xff] %v5710_v10  ;;  %6812 = vst [vmem:[#allocation12_spill] sm:$0xff] %v5712_v11  ;;  %v5714_v12 = vld [vmem:[#allocation6 + $0x48] ss:$16 sps:$4 sm:$0xff]   ;;  %v5718_v13 = vld [vmem:[#allocation6 + $0x64] ss:$16 sps:$4 sm:$0xff]  }
  0x2b   :  { %6813 = vst [vmem:[#allocation13_spill] sm:$0xff] %v5714_v12  ;;  %6814 = vst [vmem:[#allocation14_spill] sm:$0xff] %v5718_v13  ;;  %v5722_v14 = vld [vmem:[#allocation6 + $0x6c] ss:$16 sps:$4 sm:$0xff]   ;;  %v5724_v15 = vld [vmem:[#allocation6 + $0x60] ss:$16 sps:$4 sm:$0xff]  }
  0x2c   :  { %283 = vmatpush1.bf16.msra.mxu0 %v5702_v7  ;;  %324 = vmatpush1.bf16.msra.mxu1 %v5705_v8  ;;  %6815 = vst [vmem:[#allocation15_spill] sm:$0xff] %v5722_v14  ;;  %6816 = vst [vmem:[#allocation16_spill] sm:$0xff] %v5724_v15  ;;  %v5728_v16 = vld [vmem:[#allocation6 + $0x68] ss:$16 sps:$4 sm:$0xff]   ;;  %v5730_v17 = vld [vmem:[#allocation6 + $0x84] ss:$16 sps:$4 sm:$0xff]  }
  0x2d   :  { %284 = vmatprep.subr.bf16.mxu0 %v5708_v9  ;;  %325 = vmatprep.subr.bf16.mxu1 %v5710_v10  ;;  %6817 = vst [vmem:[#allocation17_spill] sm:$0xff] %v5728_v16  ;;  %6818 = vst [vmem:[#allocation18_spill] sm:$0xff] %v5730_v17  ;;  %v5734_v18 = vld [vmem:[#allocation6 + $0x8c] ss:$16 sps:$4 sm:$0xff]   ;;  %v5736_v19 = vld [vmem:[#allocation6 + $0x80] ss:$16 sps:$4 sm:$0xff]  }
  0x2e   :  { %6819 = vst [vmem:[#allocation19_spill] sm:$0xff] %v5734_v18  ;;  %6820 = vst [vmem:[#allocation20_spill] sm:$0xff] %v5736_v19  ;;  %v5738_v20 = vld [vmem:[#allocation6 + $0x88] ss:$16 sps:$4 sm:$0xff]   ;;  %v5742_v21 = vld [vmem:[#allocation6 + $0xa4] ss:$16 sps:$4 sm:$0xff]  }
  0x2f   :  { %6821 = vst [vmem:[#allocation21_spill] sm:$0xff] %v5738_v20  ;;  %6822 = vst [vmem:[#allocation22_spill] sm:$0xff] %v5742_v21  ;;  %v5746_v22 = vld [vmem:[#allocation6 + $0xac] ss:$16 sps:$4 sm:$0xff]   ;;  %v5750_v23 = vld [vmem:[#allocation6 + $0xa0] ss:$16 sps:$4 sm:$0xff]  }
  0x30   :  { %285 = vmatpush1.bf16.msra.mxu0 %v5712_v11  ;;  %326 = vmatpush1.bf16.msra.mxu1 %v5714_v12  ;;  %6823 = vst [vmem:[#allocation23_spill] sm:$0xff] %v5746_v22  ;;  %6824 = vst [vmem:[#allocation24_spill] sm:$0xff] %v5750_v23  ;;  %v5752_v24 = vld [vmem:[#allocation6 + $0xa8] ss:$16 sps:$4 sm:$0xff]   ;;  %v5756_v25 = vld [vmem:[#allocation6 + $0xc4] ss:$16 sps:$4 sm:$0xff]  }
  0x31   :  { %286 = vmatprep.subr.bf16.mxu0 %v5718_v13  ;;  %327 = vmatprep.subr.bf16.mxu1 %v5722_v14  ;;  %6825 = vst [vmem:[#allocation25_spill] sm:$0xff] %v5752_v24  ;;  %6826 = vst [vmem:[#allocation26_spill] sm:$0xff] %v5756_v25  ;;  %v5758_v26 = vld [vmem:[#allocation6 + $0xcc] ss:$16 sps:$4 sm:$0xff]   ;;  %v5760_v27 = vld [vmem:[#allocation6 + $0xc0] ss:$16 sps:$4 sm:$0xff]  }
  0x32   :  { %6827 = vst [vmem:[#allocation27_spill] sm:$0xff] %v5758_v26  ;;  %6828 = vst [vmem:[#allocation28_spill] sm:$0xff] %v5760_v27  ;;  %v5764_v28 = vld [vmem:[#allocation6 + $0xc8] ss:$16 sps:$4 sm:$0xff]   ;;  %v5768_v29 = vld [vmem:[#allocation6 + $0xe4] ss:$16 sps:$4 sm:$0xff]  }
  0x33   :  { %6829 = vst [vmem:[#allocation29_spill] sm:$0xff] %v5764_v28  ;;  %6830 = vst [vmem:[#allocation30_spill] sm:$0xff] %v5768_v29  ;;  %v5770_v30 = vld [vmem:[#allocation6 + $0xec] ss:$16 sps:$4 sm:$0xff]   ;;  %v5772_v31 = vld [vmem:[#allocation6 + $0xe0] ss:$16 sps:$4 sm:$0xff]  }
  0x34   :  { %287 = vmatpush1.bf16.msra.mxu0 %v5724_v15  ;;  %328 = vmatpush1.bf16.msra.mxu1 %v5728_v16  ;;  %6831 = vst [vmem:[#allocation31_spill] sm:$0xff] %v5770_v30  ;;  %6832 = vst [vmem:[#allocation32_spill] sm:$0xff] %v5772_v31  ;;  %v5776_v32 = vld [vmem:[#allocation6 + $0xe8] ss:$16 sps:$4 sm:$0xff]   ;;  %v5780_v33 = vld [vmem:[#allocation4 + $0x4] ss:$16 sps:$4 sm:$0xff]  }
  0x35   :  { %288 = vmatprep.subr.bf16.mxu0 %v5730_v17  ;;  %329 = vmatprep.subr.bf16.mxu1 %v5734_v18  ;;  %6833 = vst [vmem:[#allocation33_spill] sm:$0xff] %v5776_v32  ;;  %6834 = vst [vmem:[#allocation34_spill] sm:$0xff] %v5780_v33  ;;  %v5782_v34 = vld [vmem:[#allocation4 + $0xc] ss:$16 sps:$4 sm:$0xff]   ;;  %v5784_v36 = vld [vmem:[#allocation4] ss:$16 sps:$4 sm:$0xff]  }
  0x36   :  { %6835 = vst [vmem:[#allocation35_spill] sm:$0xff] %v5782_v34  ;;  %v53_v35 = vld [vmem:[#allocation2] sm:$0xf]  ;;  %v5788_v37 = vld [vmem:[#allocation4 + $0x8] ss:$16 sps:$4 sm:$0xff]  }
  0x37   :  { %v5792_v38 = vld [vmem:[#allocation4 + $0x24] ss:$16 sps:$4 sm:$0xff]   ;;  %v5794_v39 = vld [vmem:[#allocation4 + $0x2c] ss:$16 sps:$4 sm:$0xff]   ;;  %v5796_v40 = vld [vmem:[#allocation4 + $0x20] ss:$16 sps:$4 sm:$0xff]  }
  0x38   :  { %289 = vmatpush1.bf16.msra.mxu0 %v5736_v19  ;;  %330 = vmatpush1.bf16.msra.mxu1 %v5738_v20  ;;  %v5800_v41 = vld [vmem:[#allocation4 + $0x28] ss:$16 sps:$4 sm:$0xff]   ;;  %v5804_v42 = vld [vmem:[#allocation4 + $0x44] ss:$16 sps:$4 sm:$0xff]   ;;  %v5806_v43 = vld [vmem:[#allocation4 + $0x4c] ss:$16 sps:$4 sm:$0xff]  }
  0x39   :  { %290 = vmatprep.subr.bf16.mxu0 %v5742_v21  ;;  %331 = vmatprep.subr.bf16.mxu1 %v5746_v22  ;;  %v5810_v44 = vld [vmem:[#allocation4 + $0x40] ss:$16 sps:$4 sm:$0xff]   ;;  %v5814_v45 = vld [vmem:[#allocation4 + $0x48] ss:$16 sps:$4 sm:$0xff]   ;;  %v5818_v46 = vld [vmem:[#allocation4 + $0x64] ss:$16 sps:$4 sm:$0xff]  }
  0x3a   :  { %v5820_v47 = vld [vmem:[#allocation4 + $0x6c] ss:$16 sps:$4 sm:$0xff]   ;;  %v5822_v48 = vld [vmem:[#allocation4 + $0x60] ss:$16 sps:$4 sm:$0xff]   ;;  %v5824_v49 = vld [vmem:[#allocation4 + $0x68] ss:$16 sps:$4 sm:$0xff]  }
  0x3b   :  { %v5826_v50 = vld [vmem:[#allocation4 + $0x84] ss:$16 sps:$4 sm:$0xff]   ;;  %v5828_v51 = vld [vmem:[#allocation4 + $0x8c] ss:$16 sps:$4 sm:$0xff]   ;;  %v5834_v52 = vld [vmem:[#allocation4 + $0x80] ss:$16 sps:$4 sm:$0xff]  }
  0x3c   :  { %291 = vmatpush1.bf16.msra.mxu0 %v5750_v23  ;;  %332 = vmatpush1.bf16.msra.mxu1 %v5752_v24  ;;  %v5836_v53 = vld [vmem:[#allocation4 + $0x88] ss:$16 sps:$4 sm:$0xff]   ;;  %v5838_v54 = vld [vmem:[#allocation4 + $0xa4] ss:$16 sps:$4 sm:$0xff]   ;;  %v5840_v55 = vld [vmem:[#allocation4 + $0xac] ss:$16 sps:$4 sm:$0xff]  }
  0x3d   :  { %292 = vmatprep.subr.bf16.mxu0 %v5756_v25  ;;  %333 = vmatprep.subr.bf16.mxu1 %v5758_v26  ;;  %v5846_v56 = vld [vmem:[#allocation4 + $0xa0] ss:$16 sps:$4 sm:$0xff]   ;;  %v5848_v57 = vld [vmem:[#allocation4 + $0xa8] ss:$16 sps:$4 sm:$0xff]   ;;  %v5850_v58 = vld [vmem:[#allocation4 + $0xc4] ss:$16 sps:$4 sm:$0xff]  }
  0x3e   :  { %6836 = vst [vmem:[#allocation36_spill] sm:$0xff] %v5848_v57  ;;  %v5852_v59 = vld [vmem:[#allocation4 + $0xcc] ss:$16 sps:$4 sm:$0xff]   ;;  %v5858_v60 = vld [vmem:[#allocation4 + $0xc0] ss:$16 sps:$4 sm:$0xff]  }
  0x3f   :  { %v5860_v61 = vld [vmem:[#allocation4 + $0xc8] ss:$16 sps:$4 sm:$0xff]   ;;  %v5862_v62 = vld [vmem:[#allocation4 + $0xe4] ss:$16 sps:$4 sm:$0xff]   ;;  %v5864_v63 = vld [vmem:[#allocation4 + $0xec] ss:$16 sps:$4 sm:$0xff]  }
  0x40   :  { %293 = vmatpush1.bf16.msra.mxu0 %v5760_v27  ;;  %334 = vmatpush1.bf16.msra.mxu1 %v5764_v28  ;;  %6837 = vst [vmem:[#allocation37_spill] sm:$0xff] %v5864_v63 }
  0x41   :  { %294 = vmatprep.subr.bf16.mxu0 %v5768_v29  ;;  %335 = vmatprep.subr.bf16.mxu1 %v5770_v30 }
  0x44   :  { %295 = vmatpush1.bf16.msra.mxu0 %v5772_v31  ;;  %336 = vmatpush1.bf16.msra.mxu1 %v5776_v32 }
  0x45   :  { %522 = vmatprep.subr.bf16.mxu0 %v5780_v33  ;;  %563 = vmatprep.subr.bf16.mxu1 %v5782_v34 }
  0x47   :  { %313 = vmatmul.mubr.bf16.vlgmr.msra.gmra.mrb[0].mxu0 %v53_v35  ;;  %354 = vmatmul.mubr.bf16.vlgmr.msra.gmra.mrb[0].mxu1 %v53_v35  ;;  %v5870_v35 = vld [vmem:[#allocation4 + $0xe0] ss:$16 sps:$4 sm:$0xff]  }
  0x48   :  { %523 = vmatpush1.bf16.msra.mxu0 %v5784_v36  ;;  %564 = vmatpush1.bf16.msra.mxu1 %v5788_v37 }
  0x49   :  { %524 = vmatprep.subr.bf16.mxu0 %v5792_v38  ;;  %565 = vmatprep.subr.bf16.mxu1 %v5794_v39 }
  0x4a   :  { %554 = vmatprep.mubr.bf16.mxu0 %v6736_v0  ;;  %595 = vmatprep.mubr.bf16.mxu1 %v6736_v0  ;;  %v5872_v0 = vld [vmem:[#allocation4 + $0xe8] ss:$16 sps:$4 sm:$0xff]  }
  0x4c   :  { %525 = vmatpush1.bf16.msra.mxu0 %v5796_v40  ;;  %566 = vmatpush1.bf16.msra.mxu1 %v5800_v41 }
  0x4d   :  { %526 = vmatprep.subr.bf16.mxu0 %v5804_v42  ;;  %567 = vmatprep.subr.bf16.mxu1 %v5806_v43 }
  0x50   :  { %527 = vmatpush1.bf16.msra.mxu0 %v5810_v44  ;;  %568 = vmatpush1.bf16.msra.mxu1 %v5814_v45 }
  0x51   :  { %528 = vmatprep.subr.bf16.mxu0 %v5818_v46  ;;  %569 = vmatprep.subr.bf16.mxu1 %v5820_v47 }
  0x54   :  { %529 = vmatpush1.bf16.msra.mxu0 %v5822_v48  ;;  %570 = vmatpush1.bf16.msra.mxu1 %v5824_v49 }
  0x55   :  { %530 = vmatprep.subr.bf16.mxu0 %v5826_v50  ;;  %571 = vmatprep.subr.bf16.mxu1 %v5828_v51 }
  0x58   :  { %531 = vmatpush1.bf16.msra.mxu0 %v5834_v52  ;;  %572 = vmatpush1.bf16.msra.mxu1 %v5836_v53 }
  0x59   :  { %532 = vmatprep.subr.bf16.mxu0 %v5838_v54  ;;  %573 = vmatprep.subr.bf16.mxu1 %v5840_v55 }
  0x5c   :  { %533 = vmatpush1.bf16.msra.mxu0 %v5846_v56  ;;  %574 = vmatpush1.bf16.msra.mxu1 %v5848_v57  ;;  %v55_v57 = vld [vmem:[%s6731_s0] sm:$0xf] }
  0x5d   :  { %534 = vmatprep.subr.bf16.mxu0 %v5850_v58  ;;  %575 = vmatprep.subr.bf16.mxu1 %v5852_v59 }
  0x60   :  { %535 = vmatpush1.bf16.msra.mxu0 %v5858_v60  ;;  %576 = vmatpush1.bf16.msra.mxu1 %v5860_v61 }
  0x61   :  { %536 = vmatprep.subr.bf16.mxu0 %v5862_v62  ;;  %577 = vmatprep.subr.bf16.mxu1 %v5864_v63  ;;  %v6838_v63 = vmov 0  }
  0x64   :  { %537 = vmatpush1.bf16.msra.mxu0 %v5870_v35  ;;  %578 = vmatpush1.bf16.msra.mxu1 %v5872_v0 }
  0x65   :  { %875 = vmatprep.subr.bf16.mxu0 %v5686_v1  ;;  %916 = vmatprep.subr.bf16.mxu1 %v5688_v2 }
  0x67   :  { %555 = vmatmul.mubr.bf16.vlgmr.msra.gmra.mrb[4].mxu0 %v55_v57  ;;  %596 = vmatmul.mubr.bf16.vlgmr.msra.gmra.mrb[4].mxu1 %v55_v57 }
  0x68   :  { %876 = vmatpush1.bf16.msra.mxu0 %v5691_v3  ;;  %917 = vmatpush1.bf16.msra.mxu1 %v5693_v4 }
  0x69   :  { %877 = vmatprep.subr.bf16.mxu0 %v5696_v5  ;;  %918 = vmatprep.subr.bf16.mxu1 %v5700_v6 }
  0x6a   :  { %907 = vmatprep.mubr.bf16.mxu0 %v6838_v63  ;;  %948 = vmatprep.mubr.bf16.mxu1 %v6838_v63 }
  0x6c   :  { %878 = vmatpush1.bf16.msra.mxu0 %v5702_v7  ;;  %919 = vmatpush1.bf16.msra.mxu1 %v5705_v8 }
  0x6d   :  { %879 = vmatprep.subr.bf16.mxu0 %v5708_v9  ;;  %920 = vmatprep.subr.bf16.mxu1 %v5710_v10 }
  0x70   :  { %880 = vmatpush1.bf16.msra.mxu0 %v5712_v11  ;;  %921 = vmatpush1.bf16.msra.mxu1 %v5714_v12 }
  0x71   :  { %881 = vmatprep.subr.bf16.mxu0 %v5718_v13  ;;  %922 = vmatprep.subr.bf16.mxu1 %v5722_v14 }
  0x74   :  { %882 = vmatpush1.bf16.msra.mxu0 %v5724_v15  ;;  %923 = vmatpush1.bf16.msra.mxu1 %v5728_v16 }
  0x75   :  { %883 = vmatprep.subr.bf16.mxu0 %v5730_v17  ;;  %924 = vmatprep.subr.bf16.mxu1 %v5734_v18 }
  0x78   :  { %884 = vmatpush1.bf16.msra.mxu0 %v5736_v19  ;;  %925 = vmatpush1.bf16.msra.mxu1 %v5738_v20 }
  0x79   :  { %885 = vmatprep.subr.bf16.mxu0 %v5742_v21  ;;  %926 = vmatprep.subr.bf16.mxu1 %v5746_v22  ;;  %v605_v21 = vlaneseq }
  0x7c   :  { %886 = vmatpush1.bf16.msra.mxu0 %v5750_v23  ;;  %927 = vmatpush1.bf16.msra.mxu1 %v5752_v24 }
  0x7d   :  { %887 = vmatprep.subr.bf16.mxu0 %v5756_v25  ;;  %928 = vmatprep.subr.bf16.mxu1 %v5758_v26 }
  0x80   :  { %888 = vmatpush1.bf16.msra.mxu0 %v5760_v27  ;;  %929 = vmatpush1.bf16.msra.mxu1 %v5764_v28 }
  0x81   :  { %889 = vmatprep.subr.bf16.mxu0 %v5768_v29  ;;  %930 = vmatprep.subr.bf16.mxu1 %v5770_v30  ;;  %v606_v29 = vshrl.u32 %v605_v21, 7 }
  0x83   :  { %v607_v20 = vsub.s32 0, %v606_v29  ;;  %v619_v12 = vsub.s32 3, %v606_v29 }
  0x84   :  { %890 = vmatpush1.bf16.msra.mxu0 %v5772_v31  ;;  %931 = vmatpush1.bf16.msra.mxu1 %v5776_v32  ;;  %v52_v31 = vld [vmem:[%s6734_s3] sm:$0xf]  ;;  %v611_v32 = vsub.s32 1, %v606_v29 }
  0x85   :  { %1117 = vmatprep.subr.bf16.mxu0 %v5780_v33  ;;  %1158 = vmatprep.subr.bf16.mxu1 %v5782_v34  ;;  %v5922_v30 = vrot.slane %v52_v31, %v607_v20  ;;  %v615_v33 = vsub.s32 2, %v606_v29 }
  0x86   :  { %v5924_v18 = vrot.slane %v52_v31, %v611_v32 }
  0x87   :  { %v5927_v13 = vrot.slane %v52_v31, %v615_v33 }
 0x11a   :  { %v314_v57 = vpop.f32.mrb[0].mxu0  ;;  %v355_v25 = vpop.f32.mrb[0].mxu1 }
 0x11b   :  { %v316_v24 = vpop.f32.mrb[1].mxu0  ;;  %v357_v26 = vpop.f32.mrb[1].mxu1 }
 0x11c   :  { %v318_v23 = vpop.f32.mrb[2].mxu0  ;;  %v359_v27 = vpop.f32.mrb[2].mxu1 }
 0x11d   :  { %v319_v22 = vpop.f32.mrb[3].mxu0  ;;  %v360_v28 = vpop.f32.mrb[3].mxu1 }
 0x13a   :  { %v556_v34 = vpop.f32.mrb[4].mxu0  ;;  %v597_v19 = vpop.f32.mrb[4].mxu1 }
 0x13b   :  { %v557_v17 = vadd.f32 %v556_v34, %v314_v57  ;;  %v598_v23 = vadd.f32 %v597_v19, %v355_v25  ;;  %v558_v27 = vpop.f32.mrb[5].mxu0  ;;  %v599_v22 = vpop.f32.mrb[5].mxu1  ;;  %v5931_v25 = vrot.slane %v52_v31, %v619_v12 }
 0x13c   :  { %v559_v28 = vadd.f32 %v558_v27, %v316_v24  ;;  %v600_v16 = vadd.f32 %v599_v22, %v357_v26  ;;  %v560_v21 = vpop.f32.mrb[6].mxu0  ;;  %v601_v15 = vpop.f32.mrb[6].mxu1 }
 0x13d   :  { %v625_v14 = vadd.f32 %v5922_v30, %v557_v17  ;;  %v561_v20 = vpop.f32.mrb[7].mxu0  ;;  %v602_v11 = vpop.f32.mrb[7].mxu1  ;;  %v627_v19 = vadd.f32 %v5927_v13, %v598_v23  ;;  %v6840_v21 = vld [vmem:[#allocation37_spill] sm:$0xff] }
 0x13e   :  { %v626_v10 = vadd.f32 %v5924_v18, %v559_v28  ;;  %v628_v15 = vadd.f32 %v5931_v25, %v600_v16  ;;  %v6839_v28 = vld [vmem:[#allocation36_spill] sm:$0xff]  ;;  %v4746_v20 = vld [vmem:[%s6731_s0 + $0x4] sm:$0xf] }
 0x13f   :  { %v629_v9 = vmul.f32 0.5, %v625_v14 }
 0x140   :  { %v633_v32 = vmul.f32 0.5, %v626_v10  ;;  %v638_v24 = vmul.f32 0.5, %v628_v15  ;;  %v6849_v15 = vld [vmem:[#allocation18_spill] sm:$0xff] }
 0x141   :  { %5501 = vtanh.f32 %v629_v9 }
 0x142   :  { %5503 = vtanh.f32 %v633_v32  ;;  %v6843_v32 = vld [vmem:[#allocation12_spill] sm:$0xff] }
 0x143   :  { %5505 = vtanh.f32 %v627_v19  ;;  %v6848_v19 = vld [vmem:[#allocation17_spill] sm:$0xff] }
 0x144   :  { %5507 = vtanh.f32 %v638_v24  ;;  %v6852_v24 = vld [vmem:[#allocation21_spill] sm:$0xff] }
 0x14b   :  { %v5502_v17 = vpop.eup %5501 }
 0x14c   :  { %v5504_v26 = vpop.eup %5503  ;;  %v631_v33 = vmul.f32 0.5, %v5502_v17  ;;  %v6853_v17 = vld [vmem:[#allocation22_spill] sm:$0xff] }
 0x14d   :  { %v635_v29 = vmul.f32 0.5, %v5504_v26  ;;  %v5506_v34 = vpop.eup %5505  ;;  %v6854_v26 = vld [vmem:[#allocation23_spill] sm:$0xff] }
 0x14e   :  { %v632_v11 = vadd.f32 0.5, %v631_v33  ;;  %v5508_v12 = vpop.eup %5507  ;;  %v6855_v33 = vld [vmem:[#allocation24_spill] sm:$0xff] }
 0x14f   :  { %v636_v57 = vadd.f32 0.5, %v635_v29  ;;  %v640_v31 = vmul.f32 0.5, %v5508_v12  ;;  %v6856_v29 = vld [vmem:[#allocation25_spill] sm:$0xff]  ;;  %v6862_v12 = vld [vmem:[#allocation31_spill] sm:$0xff] }
 0x150   :  { %v643_v14 = vmul.f32 %v5506_v34, %v632_v11  ;;  %v6857_v11 = vld [vmem:[#allocation26_spill] sm:$0xff]  ;;  %v6858_v34 = vld [vmem:[#allocation27_spill] sm:$0xff] }
 0x151   :  { %v642_v10 = vmul.f32 0.0, %v636_v57  ;;  %v641_v23 = vadd.f32 0.5, %v640_v31  ;;  %v6859_v57 = vld [vmem:[#allocation28_spill] sm:$0xff] }
 0x152   :  { %v6863_v31 = vld [vmem:[#allocation32_spill] sm:$0xff] }
 0x153   :  { %v5934_v9 = vadd.f32 %v643_v14, %v642_v10  ;;  %v6860_v14 = vld [vmem:[#allocation29_spill] sm:$0xff]  ;;  %v6861_v10 = vld [vmem:[#allocation30_spill] sm:$0xff] }
 0x155   :  { %5509 = vtanh.f32 %v5934_v9 }
 0x15f   :  { %v5510_v27 = vpop.eup %5509 }
 0x160   :  { %v646_v16 = vmul.f32 %v5510_v27, %v641_v23  ;;  %v6864_v23 = vld [vmem:[#allocation33_spill] sm:$0xff]  ;;  %v6865_v27 = vld [vmem:[#allocation34_spill] sm:$0xff] }
 0x162   :  { %v647_v22 = vpack.c.bf16 %v646_v16, %v646_v16  ;;  %v6866_v16 = vld [vmem:[#allocation35_spill] sm:$0xff] }
 0x164   :  { %648 = vst [vmem:[%s6735_s4] sm:$0xf] %v647_v22  ;;  %908 = vmatmul.mubr.bf16.vlgmr.msra.gmra.mrb[8].mxu0 %v647_v22  ;;  %949 = vmatmul.mubr.bf16.vlgmr.msra.gmra.mrb[8].mxu1 %v647_v22 }
 0x165   :  { %1118 = vmatpush1.bf16.msra.mxu0 %v5784_v36  ;;  %1159 = vmatpush1.bf16.msra.mxu1 %v5788_v37 }
 0x166   :  { %1119 = vmatprep.subr.bf16.mxu0 %v5792_v38  ;;  %1160 = vmatprep.subr.bf16.mxu1 %v5794_v39 }
 0x167   :  { %1149 = vmatprep.mubr.bf16.mxu0 %v6838_v63  ;;  %1190 = vmatprep.mubr.bf16.mxu1 %v6838_v63 }
 0x169   :  { %1120 = vmatpush1.bf16.msra.mxu0 %v5796_v40  ;;  %1161 = vmatpush1.bf16.msra.mxu1 %v5800_v41 }
 0x16a   :  { %1121 = vmatprep.subr.bf16.mxu0 %v5804_v42  ;;  %1162 = vmatprep.subr.bf16.mxu1 %v5806_v43 }
 0x16d   :  { %1122 = vmatpush1.bf16.msra.mxu0 %v5810_v44  ;;  %1163 = vmatpush1.bf16.msra.mxu1 %v5814_v45 }
 0x16e   :  { %1123 = vmatprep.subr.bf16.mxu0 %v5818_v46  ;;  %1164 = vmatprep.subr.bf16.mxu1 %v5820_v47 }
 0x171   :  { %1124 = vmatpush1.bf16.msra.mxu0 %v5822_v48  ;;  %1165 = vmatpush1.bf16.msra.mxu1 %v5824_v49 }
 0x172   :  { %1125 = vmatprep.subr.bf16.mxu0 %v5826_v50  ;;  %1166 = vmatprep.subr.bf16.mxu1 %v5828_v51 }
 0x175   :  { %1126 = vmatpush1.bf16.msra.mxu0 %v5834_v52  ;;  %1167 = vmatpush1.bf16.msra.mxu1 %v5836_v53 }
 0x176   :  { %1127 = vmatprep.subr.bf16.mxu0 %v5838_v54  ;;  %1168 = vmatprep.subr.bf16.mxu1 %v5840_v55 }
 0x179   :  { %1128 = vmatpush1.bf16.msra.mxu0 %v5846_v56  ;;  %1169 = vmatpush1.bf16.msra.mxu1 %v6839_v28 }
 0x17a   :  { %1129 = vmatprep.subr.bf16.mxu0 %v5850_v58  ;;  %1170 = vmatprep.subr.bf16.mxu1 %v5852_v59 }
 0x17d   :  { %1130 = vmatpush1.bf16.msra.mxu0 %v5858_v60  ;;  %1171 = vmatpush1.bf16.msra.mxu1 %v5860_v61 }
 0x17e   :  { %1131 = vmatprep.subr.bf16.mxu0 %v5862_v62  ;;  %1172 = vmatprep.subr.bf16.mxu1 %v6840_v21 }
 0x181   :  { %1132 = vmatpush1.bf16.msra.mxu0 %v5870_v35  ;;  %1173 = vmatpush1.bf16.msra.mxu1 %v5872_v0 }
 0x182   :  { %1450 = vmatprep.subr.bf16.mxu0 %v5686_v1  ;;  %1491 = vmatprep.subr.bf16.mxu1 %v5688_v2  ;;  %v6841_v1 = vld [vmem:[#allocation10_spill] sm:$0xff]  ;;  %v6842_v2 = vld [vmem:[#allocation11_spill] sm:$0xff] }
 0x184   :  { %1150 = vmatmul.mubr.bf16.vlgmr.msra.gmra.mrb[12].mxu0 %v4746_v20  ;;  %1191 = vmatmul.mubr.bf16.vlgmr.msra.gmra.mrb[12].mxu1 %v4746_v20 }
 0x185   :  { %1451 = vmatpush1.bf16.msra.mxu0 %v5691_v3  ;;  %1492 = vmatpush1.bf16.msra.mxu1 %v5693_v4  ;;  %v6844_v3 = vld [vmem:[#allocation13_spill] sm:$0xff]  ;;  %v6845_v4 = vld [vmem:[#allocation14_spill] sm:$0xff] }
 0x186   :  { %1452 = vmatprep.subr.bf16.mxu0 %v5696_v5  ;;  %1493 = vmatprep.subr.bf16.mxu1 %v5700_v6  ;;  %v6846_v5 = vld [vmem:[#allocation15_spill] sm:$0xff]  ;;  %v6847_v6 = vld [vmem:[#allocation16_spill] sm:$0xff] }
 0x187   :  { %1482 = vmatprep.mubr.bf16.mxu0 %v6838_v63  ;;  %1523 = vmatprep.mubr.bf16.mxu1 %v6838_v63 }
 0x189   :  { %1453 = vmatpush1.bf16.msra.mxu0 %v5702_v7  ;;  %1494 = vmatpush1.bf16.msra.mxu1 %v5705_v8  ;;  %v6850_v7 = vld [vmem:[#allocation19_spill] sm:$0xff]  ;;  %v6851_v8 = vld [vmem:[#allocation20_spill] sm:$0xff] }
 0x18a   :  { %1454 = vmatprep.subr.bf16.mxu0 %v6841_v1  ;;  %1495 = vmatprep.subr.bf16.mxu1 %v6842_v2 }
 0x18d   :  { %1455 = vmatpush1.bf16.msra.mxu0 %v6843_v32  ;;  %1496 = vmatpush1.bf16.msra.mxu1 %v6844_v3 }
 0x18e   :  { %1456 = vmatprep.subr.bf16.mxu0 %v6845_v4  ;;  %1497 = vmatprep.subr.bf16.mxu1 %v6846_v5 }
 0x191   :  { %1457 = vmatpush1.bf16.msra.mxu0 %v6847_v6  ;;  %1498 = vmatpush1.bf16.msra.mxu1 %v6848_v19 }
 0x192   :  { %1458 = vmatprep.subr.bf16.mxu0 %v6849_v15  ;;  %1499 = vmatprep.subr.bf16.mxu1 %v6850_v7 }
 0x195   :  { %1459 = vmatpush1.bf16.msra.mxu0 %v6851_v8  ;;  %1500 = vmatpush1.bf16.msra.mxu1 %v6852_v24 }
 0x196   :  { %1460 = vmatprep.subr.bf16.mxu0 %v6853_v17  ;;  %1501 = vmatprep.subr.bf16.mxu1 %v6854_v26 }
 0x199   :  { %1461 = vmatpush1.bf16.msra.mxu0 %v6855_v33  ;;  %1502 = vmatpush1.bf16.msra.mxu1 %v6856_v29 }
 0x19a   :  { %1462 = vmatprep.subr.bf16.mxu0 %v6857_v11  ;;  %1503 = vmatprep.subr.bf16.mxu1 %v6858_v34 }
 0x19d   :  { %1463 = vmatpush1.bf16.msra.mxu0 %v6859_v57  ;;  %1504 = vmatpush1.bf16.msra.mxu1 %v6860_v14 }
 0x19e   :  { %1464 = vmatprep.subr.bf16.mxu0 %v6861_v10  ;;  %1505 = vmatprep.subr.bf16.mxu1 %v6862_v12 }
 0x1a1   :  { %1465 = vmatpush1.bf16.msra.mxu0 %v6863_v31  ;;  %1506 = vmatpush1.bf16.msra.mxu1 %v6864_v23 }
 0x1a2   :  { %1692 = vmatprep.subr.bf16.mxu0 %v6865_v27  ;;  %1733 = vmatprep.subr.bf16.mxu1 %v6866_v16 }
 0x237   :  { %v909_v22 = vpop.f32.mrb[8].mxu0  ;;  %v950_v20 = vpop.f32.mrb[8].mxu1 }
 0x238   :  { %v911_v1 = vpop.f32.mrb[9].mxu0  ;;  %v952_v2 = vpop.f32.mrb[9].mxu1 }
 0x239   :  { %v913_v32 = vpop.f32.mrb[10].mxu0  ;;  %v954_v3 = vpop.f32.mrb[10].mxu1 }
 0x23a   :  { %v914_v4 = vpop.f32.mrb[11].mxu0  ;;  %v955_v5 = vpop.f32.mrb[11].mxu1 }
 0x257   :  { %v1151_v6 = vpop.f32.mrb[12].mxu0  ;;  %v1192_v19 = vpop.f32.mrb[12].mxu1 }
 0x258   :  { %v1152_v15 = vadd.f32 %v1151_v6, %v909_v22  ;;  %v1193_v7 = vadd.f32 %v1192_v19, %v950_v20  ;;  %v1153_v8 = vpop.f32.mrb[13].mxu0  ;;  %v1194_v24 = vpop.f32.mrb[13].mxu1 }
 0x259   :  { %v1154_v17 = vadd.f32 %v1153_v8, %v911_v1  ;;  %v1195_v26 = vadd.f32 %v1194_v24, %v952_v2  ;;  %v1155_v33 = vpop.f32.mrb[14].mxu0  ;;  %v1196_v29 = vpop.f32.mrb[14].mxu1 }
 0x25a   :  { %v1199_v11 = vadd.f32 %v1152_v15, %v5922_v30  ;;  %v1156_v34 = vpop.f32.mrb[15].mxu0  ;;  %v1197_v57 = vpop.f32.mrb[15].mxu1  ;;  %v1201_v31 = vadd.f32 %v1193_v7, %v5927_v13  ;;  %v6149_v33 = vld [vmem:[#allocation6 + $0xe8] ss:$16 sps:$4 sm:$0xff]   ;;  %v6153_v29 = vld [vmem:[#allocation4 + $0x4] ss:$16 sps:$4 sm:$0xff]  }
 0x25b   :  { %v1200_v14 = vadd.f32 %v1154_v17, %v5924_v18  ;;  %v1202_v23 = vadd.f32 %v1195_v26, %v5931_v25  ;;  %v6147_v26 = vld [vmem:[#allocation6 + $0xe0] ss:$16 sps:$4 sm:$0xff]   ;;  %6885 = vst [vmem:[#allocation26_spill] sm:$0xff] %v6149_v33  ;;  %6886 = vst [vmem:[#allocation27_spill] sm:$0xff] %v6153_v29 }
 0x25c   :  { %v1203_v10 = vmul.f32 0.5, %v1199_v11  ;;  %6884 = vst [vmem:[#allocation25_spill] sm:$0xff] %v6147_v26  ;;  %v6155_v11 = vld [vmem:[#allocation4 + $0xc] ss:$16 sps:$4 sm:$0xff]  }
 0x25d   :  { %v1207_v12 = vmul.f32 0.5, %v1200_v14  ;;  %v1212_v27 = vmul.f32 0.5, %v1202_v23  ;;  %6887 = vst [vmem:[#allocation28_spill] sm:$0xff] %v6155_v11 }
 0x25e   :  { %5511 = vtanh.f32 %v1203_v10 }
 0x25f   :  { %5513 = vtanh.f32 %v1207_v12 }
 0x260   :  { %5515 = vtanh.f32 %v1201_v31 }
 0x261   :  { %5517 = vtanh.f32 %v1212_v27 }
 0x268   :  { %v5512_v16 = vpop.eup %5511 }
 0x269   :  { %v5514_v22 = vpop.eup %5513  ;;  %v1205_v20 = vmul.f32 0.5, %v5512_v16 }
 0x26a   :  { %v1209_v1 = vmul.f32 0.5, %v5514_v22  ;;  %v5516_v32 = vpop.eup %5515 }
 0x26b   :  { %v1206_v2 = vadd.f32 0.5, %v1205_v20  ;;  %v5518_v19 = vpop.eup %5517 }
 0x26c   :  { %v1210_v3 = vadd.f32 0.5, %v1209_v1  ;;  %v1214_v15 = vmul.f32 0.5, %v5518_v19 }
 0x26d   :  { %v1217_v4 = vmul.f32 %v5516_v32, %v1206_v2 }
 0x26e   :  { %v1216_v5 = vmul.f32 %v1210_v3, %v5934_v9  ;;  %v1215_v7 = vadd.f32 0.5, %v1214_v15  ;;  %v6137_v9 = vld [vmem:[#allocation6 + $0xc8] ss:$16 sps:$4 sm:$0xff]  }
 0x26f   :  { %6881 = vst [vmem:[#allocation22_spill] sm:$0xff] %v6137_v9 }
 0x270   :  { %v6016_v6 = vadd.f32 %v1217_v4, %v1216_v5 }
 0x272   :  { %5519 = vtanh.f32 %v6016_v6 }
 0x27c   :  { %v5520_v8 = vpop.eup %5519 }
 0x27d   :  { %v1220_v24 = vmul.f32 %v5520_v8, %v1215_v7 }
 0x27f   :  { %v1221_v17 = vpack.c.bf16 %v1220_v24, %v1220_v24 }
 0x281   :  { %4811 = vst [vmem:[%s6735_s4 + $0x4] sm:$0xf] %v1221_v17  ;;  %1483 = vmatmul.mubr.bf16.vlgmr.msra.gmra.mrb[16].mxu0 %v1221_v17  ;;  %1524 = vmatmul.mubr.bf16.vlgmr.msra.gmra.mrb[16].mxu1 %v1221_v17 }
 0x282   :  { %1693 = vmatpush1.bf16.msra.mxu0 %v5784_v36  ;;  %1734 = vmatpush1.bf16.msra.mxu1 %v5788_v37  ;;  %v4812_v36 = vld [vmem:[%s6731_s0 + $0x8] sm:$0xf] }
 0x283   :  { %1694 = vmatprep.subr.bf16.mxu0 %v5792_v38  ;;  %1735 = vmatprep.subr.bf16.mxu1 %v5794_v39  ;;  %v6059_v37 = vld [vmem:[#allocation6 + $0x4] ss:$16 sps:$4 sm:$0xff]   ;;  %v6061_v38 = vld [vmem:[#allocation6 + $0xc] ss:$16 sps:$4 sm:$0xff]   ;;  %v6063_v39 = vld [vmem:[#allocation6] ss:$16 sps:$4 sm:$0xff]  }
 0x284   :  { %1724 = vmatprep.mubr.bf16.mxu0 %v6838_v63  ;;  %1765 = vmatprep.mubr.bf16.mxu1 %v6838_v63 }
 0x286   :  { %1695 = vmatpush1.bf16.msra.mxu0 %v5796_v40  ;;  %1736 = vmatpush1.bf16.msra.mxu1 %v5800_v41  ;;  %v6065_v40 = vld [vmem:[#allocation6 + $0x8] ss:$16 sps:$4 sm:$0xff]   ;;  %v6073_v41 = vld [vmem:[#allocation6 + $0x2c] ss:$16 sps:$4 sm:$0xff]  }
 0x287   :  { %1696 = vmatprep.subr.bf16.mxu0 %v5804_v42  ;;  %1737 = vmatprep.subr.bf16.mxu1 %v5806_v43  ;;  %v6075_v42 = vld [vmem:[#allocation6 + $0x20] ss:$16 sps:$4 sm:$0xff]   ;;  %v6077_v43 = vld [vmem:[#allocation6 + $0x28] ss:$16 sps:$4 sm:$0xff]  }
 0x28a   :  { %1697 = vmatpush1.bf16.msra.mxu0 %v5810_v44  ;;  %1738 = vmatpush1.bf16.msra.mxu1 %v5814_v45  ;;  %v6083_v44 = vld [vmem:[#allocation6 + $0x44] ss:$16 sps:$4 sm:$0xff]   ;;  %v6085_v45 = vld [vmem:[#allocation6 + $0x4c] ss:$16 sps:$4 sm:$0xff]  }
 0x28b   :  { %1698 = vmatprep.subr.bf16.mxu0 %v5818_v46  ;;  %1739 = vmatprep.subr.bf16.mxu1 %v5820_v47  ;;  %v6087_v46 = vld [vmem:[#allocation6 + $0x40] ss:$16 sps:$4 sm:$0xff]   ;;  %v6089_v47 = vld [vmem:[#allocation6 + $0x48] ss:$16 sps:$4 sm:$0xff]  }
 0x28e   :  { %1699 = vmatpush1.bf16.msra.mxu0 %v5822_v48  ;;  %1740 = vmatpush1.bf16.msra.mxu1 %v5824_v49  ;;  %v6095_v48 = vld [vmem:[#allocation6 + $0x64] ss:$16 sps:$4 sm:$0xff]   ;;  %v6097_v49 = vld [vmem:[#allocation6 + $0x6c] ss:$16 sps:$4 sm:$0xff]  }
 0x28f   :  { %1700 = vmatprep.subr.bf16.mxu0 %v5826_v50  ;;  %1741 = vmatprep.subr.bf16.mxu1 %v5828_v51  ;;  %6867 = vst [vmem:[#allocation36_spill] sm:$0xff] %v6097_v49  ;;  %v6099_v50 = vld [vmem:[#allocation6 + $0x60] ss:$16 sps:$4 sm:$0xff]   ;;  %v6101_v51 = vld [vmem:[#allocation6 + $0x68] ss:$16 sps:$4 sm:$0xff]  }
 0x290   :  { %6868 = vst [vmem:[#allocation37_spill] sm:$0xff] %v6099_v50  ;;  %6869 = vst [vmem:[#allocation10_spill] sm:$0xff] %v6101_v51 }
 0x292   :  { %1701 = vmatpush1.bf16.msra.mxu0 %v5834_v52  ;;  %1742 = vmatpush1.bf16.msra.mxu1 %v5836_v53  ;;  %v6107_v52 = vld [vmem:[#allocation6 + $0x84] ss:$16 sps:$4 sm:$0xff]   ;;  %v6109_v53 = vld [vmem:[#allocation6 + $0x8c] ss:$16 sps:$4 sm:$0xff]  }
 0x293   :  { %1702 = vmatprep.subr.bf16.mxu0 %v5838_v54  ;;  %1743 = vmatprep.subr.bf16.mxu1 %v5840_v55  ;;  %6870 = vst [vmem:[#allocation11_spill] sm:$0xff] %v6107_v52  ;;  %6871 = vst [vmem:[#allocation12_spill] sm:$0xff] %v6109_v53  ;;  %v6111_v54 = vld [vmem:[#allocation6 + $0x80] ss:$16 sps:$4 sm:$0xff]   ;;  %v6113_v55 = vld [vmem:[#allocation6 + $0x88] ss:$16 sps:$4 sm:$0xff]  }
 0x294   :  { %6872 = vst [vmem:[#allocation13_spill] sm:$0xff] %v6111_v54  ;;  %6873 = vst [vmem:[#allocation14_spill] sm:$0xff] %v6113_v55 }
 0x296   :  { %1703 = vmatpush1.bf16.msra.mxu0 %v5846_v56  ;;  %1744 = vmatpush1.bf16.msra.mxu1 %v6839_v28  ;;  %v6119_v56 = vld [vmem:[#allocation6 + $0xa0] ss:$16 sps:$4 sm:$0xff]   ;;  %v6141_v28 = vld [vmem:[#allocation6 + $0xe4] ss:$16 sps:$4 sm:$0xff]  }
 0x297   :  { %1704 = vmatprep.subr.bf16.mxu0 %v5850_v58  ;;  %1745 = vmatprep.subr.bf16.mxu1 %v5852_v59  ;;  %6874 = vst [vmem:[#allocation15_spill] sm:$0xff] %v6119_v56  ;;  %v6121_v58 = vld [vmem:[#allocation6 + $0xa4] ss:$16 sps:$4 sm:$0xff]   ;;  %v6123_v59 = vld [vmem:[#allocation6 + $0xa8] ss:$16 sps:$4 sm:$0xff]   ;;  %6882 = vst [vmem:[#allocation23_spill] sm:$0xff] %v6141_v28 }
 0x298   :  { %6875 = vst [vmem:[#allocation16_spill] sm:$0xff] %v6121_v58  ;;  %6876 = vst [vmem:[#allocation17_spill] sm:$0xff] %v6123_v59 }
 0x29a   :  { %1705 = vmatpush1.bf16.msra.mxu0 %v5858_v60  ;;  %1746 = vmatpush1.bf16.msra.mxu1 %v5860_v61  ;;  %v6125_v60 = vld [vmem:[#allocation6 + $0xac] ss:$16 sps:$4 sm:$0xff]   ;;  %v6127_v61 = vld [vmem:[#allocation6 + $0xc4] ss:$16 sps:$4 sm:$0xff]  }
 0x29b   :  { %1706 = vmatprep.subr.bf16.mxu0 %v5862_v62  ;;  %1747 = vmatprep.subr.bf16.mxu1 %v6840_v21  ;;  %6877 = vst [vmem:[#allocation18_spill] sm:$0xff] %v6125_v60  ;;  %6878 = vst [vmem:[#allocation19_spill] sm:$0xff] %v6127_v61  ;;  %v6130_v62 = vld [vmem:[#allocation6 + $0xcc] ss:$16 sps:$4 sm:$0xff]  }
 0x29c   :  { %6879 = vst [vmem:[#allocation20_spill] sm:$0xff] %v6130_v62  ;;  %v6143_v21 = vld [vmem:[#allocation6 + $0xec] ss:$16 sps:$4 sm:$0xff]  }
 0x29d   :  { %6883 = vst [vmem:[#allocation24_spill] sm:$0xff] %v6143_v21 }
 0x29e   :  { %1707 = vmatpush1.bf16.msra.mxu0 %v5870_v35  ;;  %1748 = vmatpush1.bf16.msra.mxu1 %v5872_v0  ;;  %v6071_v0 = vld [vmem:[#allocation6 + $0x24] ss:$16 sps:$4 sm:$0xff]   ;;  %v6135_v35 = vld [vmem:[#allocation6 + $0xc0] ss:$16 sps:$4 sm:$0xff]  }
 0x29f   :  { %2025 = vmatprep.subr.bf16.mxu0 %v6059_v37  ;;  %2066 = vmatprep.subr.bf16.mxu1 %v6061_v38  ;;  %6880 = vst [vmem:[#allocation21_spill] sm:$0xff] %v6135_v35 }
 0x2a1   :  { %1725 = vmatmul.mubr.bf16.vlgmr.msra.gmra.mrb[20].mxu0 %v4812_v36  ;;  %1766 = vmatmul.mubr.bf16.vlgmr.msra.gmra.mrb[20].mxu1 %v4812_v36 }
 0x2a2   :  { %2057 = vmatprep.mubr.bf16.mxu0 %v6838_v63  ;;  %2098 = vmatprep.mubr.bf16.mxu1 %v6838_v63 }
 0x2a3   :  { %2026 = vmatpush1.bf16.msra.mxu0 %v6063_v39  ;;  %2067 = vmatpush1.bf16.msra.mxu1 %v6065_v40 }
 0x2a4   :  { %2027 = vmatprep.subr.bf16.mxu0 %v6071_v0  ;;  %2068 = vmatprep.subr.bf16.mxu1 %v6073_v41 }
 0x2a7   :  { %2028 = vmatpush1.bf16.msra.mxu0 %v6075_v42  ;;  %2069 = vmatpush1.bf16.msra.mxu1 %v6077_v43 }
 0x2a8   :  { %2029 = vmatprep.subr.bf16.mxu0 %v6083_v44  ;;  %2070 = vmatprep.subr.bf16.mxu1 %v6085_v45 }
 0x2ab   :  { %2030 = vmatpush1.bf16.msra.mxu0 %v6087_v46  ;;  %2071 = vmatpush1.bf16.msra.mxu1 %v6089_v47 }
 0x2ac   :  { %2031 = vmatprep.subr.bf16.mxu0 %v6095_v48  ;;  %2072 = vmatprep.subr.bf16.mxu1 %v6097_v49 }
 0x2af   :  { %2032 = vmatpush1.bf16.msra.mxu0 %v6099_v50  ;;  %2073 = vmatpush1.bf16.msra.mxu1 %v6101_v51 }
 0x2b0   :  { %2033 = vmatprep.subr.bf16.mxu0 %v6107_v52  ;;  %2074 = vmatprep.subr.bf16.mxu1 %v6109_v53 }
 0x2b3   :  { %2034 = vmatpush1.bf16.msra.mxu0 %v6111_v54  ;;  %2075 = vmatpush1.bf16.msra.mxu1 %v6113_v55 }
 0x2b4   :  { %2035 = vmatprep.subr.bf16.mxu0 %v6121_v58  ;;  %2076 = vmatprep.subr.bf16.mxu1 %v6125_v60 }
 0x2b7   :  { %2036 = vmatpush1.bf16.msra.mxu0 %v6119_v56  ;;  %2077 = vmatpush1.bf16.msra.mxu1 %v6123_v59 }
 0x2b8   :  { %2037 = vmatprep.subr.bf16.mxu0 %v6127_v61  ;;  %2078 = vmatprep.subr.bf16.mxu1 %v6130_v62 }
 0x2bb   :  { %2038 = vmatpush1.bf16.msra.mxu0 %v6135_v35  ;;  %2079 = vmatpush1.bf16.msra.mxu1 %v6137_v9 }
 0x2bc   :  { %2039 = vmatprep.subr.bf16.mxu0 %v6141_v28  ;;  %2080 = vmatprep.subr.bf16.mxu1 %v6143_v21 }
 0x2bf   :  { %2040 = vmatpush1.bf16.msra.mxu0 %v6147_v26  ;;  %2081 = vmatpush1.bf16.msra.mxu1 %v6149_v33 }
 0x2c0   :  { %2267 = vmatprep.subr.bf16.mxu0 %v6153_v29  ;;  %2308 = vmatprep.subr.bf16.mxu1 %v6155_v11 }
 0x354   :  { %v1484_v34 = vpop.f32.mrb[16].mxu0  ;;  %v1525_v57 = vpop.f32.mrb[16].mxu1 }
 0x355   :  { %v1486_v14 = vpop.f32.mrb[17].mxu0  ;;  %v1527_v10 = vpop.f32.mrb[17].mxu1 }
 0x356   :  { %v1488_v12 = vpop.f32.mrb[18].mxu0  ;;  %v1529_v31 = vpop.f32.mrb[18].mxu1 }
 0x357   :  { %v1489_v23 = vpop.f32.mrb[19].mxu0  ;;  %v1530_v27 = vpop.f32.mrb[19].mxu1 }
 0x374   :  { %v1726_v16 = vpop.f32.mrb[20].mxu0  ;;  %v1767_v22 = vpop.f32.mrb[20].mxu1 }
 0x375   :  { %v1727_v20 = vadd.f32 %v1726_v16, %v1484_v34  ;;  %v1768_v1 = vadd.f32 %v1767_v22, %v1525_v57  ;;  %v1728_v2 = vpop.f32.mrb[21].mxu0  ;;  %v1769_v32 = vpop.f32.mrb[21].mxu1 }
 0x376   :  { %v1729_v3 = vadd.f32 %v1728_v2, %v1486_v14  ;;  %v1770_v4 = vadd.f32 %v1769_v32, %v1527_v10  ;;  %v1730_v5 = vpop.f32.mrb[22].mxu0  ;;  %v1771_v19 = vpop.f32.mrb[22].mxu1 }
 0x377   :  { %v1774_v15 = vadd.f32 %v1727_v20, %v5922_v30  ;;  %v1731_v7 = vpop.f32.mrb[23].mxu0  ;;  %v1772_v8 = vpop.f32.mrb[23].mxu1  ;;  %v1776_v12 = vadd.f32 %v1768_v1, %v5927_v13 }
 0x378   :  { %v1775_v24 = vadd.f32 %v1729_v3, %v5924_v18  ;;  %v1777_v34 = vadd.f32 %v1770_v4, %v5931_v25  ;;  %v6171_v7 = vld [vmem:[#allocation4 + $0x8] ss:$16 sps:$4 sm:$0xff]  }
 0x379   :  { %v1778_v17 = vmul.f32 0.5, %v1774_v15  ;;  %v6169_v15 = vld [vmem:[#allocation4] ss:$16 sps:$4 sm:$0xff]  }
 0x37a   :  { %v1782_v36 = vmul.f32 0.5, %v1775_v24  ;;  %v1787_v57 = vmul.f32 0.5, %v1777_v34  ;;  %v6173_v24 = vld [vmem:[#allocation4 + $0x24] ss:$16 sps:$4 sm:$0xff]   ;;  %v6190_v34 = vld [vmem:[#allocation4 + $0x4c] ss:$16 sps:$4 sm:$0xff]  }
 0x37b   :  { %5521 = vtanh.f32 %v1778_v17  ;;  %v6175_v17 = vld [vmem:[#allocation4 + $0x2c] ss:$16 sps:$4 sm:$0xff]  }
 0x37c   :  { %5523 = vtanh.f32 %v1782_v36  ;;  %v6184_v36 = vld [vmem:[#allocation4 + $0x28] ss:$16 sps:$4 sm:$0xff]  }
 0x37d   :  { %5525 = vtanh.f32 %v1776_v12  ;;  %v6188_v12 = vld [vmem:[#allocation4 + $0x44] ss:$16 sps:$4 sm:$0xff]  }
 0x37e   :  { %5527 = vtanh.f32 %v1787_v57  ;;  %v6196_v57 = vld [vmem:[#allocation4 + $0x40] ss:$16 sps:$4 sm:$0xff]  }
 0x385   :  { %v5522_v14 = vpop.eup %5521 }
 0x386   :  { %v5524_v10 = vpop.eup %5523  ;;  %v1780_v31 = vmul.f32 0.5, %v5522_v14  ;;  %v6198_v14 = vld [vmem:[#allocation4 + $0x48] ss:$16 sps:$4 sm:$0xff]  }
 0x387   :  { %v1784_v23 = vmul.f32 0.5, %v5524_v10  ;;  %v5526_v16 = vpop.eup %5525  ;;  %v6202_v10 = vld [vmem:[#allocation4 + $0x64] ss:$16 sps:$4 sm:$0xff]  }
 0x388   :  { %v1781_v27 = vadd.f32 0.5, %v1780_v31  ;;  %v5528_v1 = vpop.eup %5527  ;;  %v6204_v31 = vld [vmem:[#allocation4 + $0x6c] ss:$16 sps:$4 sm:$0xff]  }
 0x389   :  { %v1785_v22 = vadd.f32 0.5, %v1784_v23  ;;  %v1789_v3 = vmul.f32 0.5, %v5528_v1  ;;  %v6208_v23 = vld [vmem:[#allocation4 + $0x60] ss:$16 sps:$4 sm:$0xff]   ;;  %v6226_v1 = vld [vmem:[#allocation4 + $0xa4] ss:$16 sps:$4 sm:$0xff]  }
 0x38a   :  { %v1792_v20 = vmul.f32 %v5526_v16, %v1781_v27  ;;  %v6210_v27 = vld [vmem:[#allocation4 + $0x68] ss:$16 sps:$4 sm:$0xff]   ;;  %v6214_v16 = vld [vmem:[#allocation4 + $0x84] ss:$16 sps:$4 sm:$0xff]   ;;  %6891 = vst [vmem:[#allocation32_spill] sm:$0xff] %v6226_v1 }
 0x38b   :  { %v1791_v2 = vmul.f32 %v1785_v22, %v6016_v6  ;;  %v1790_v5 = vadd.f32 0.5, %v1789_v3  ;;  %v6182_v6 = vld [vmem:[#allocation4 + $0x20] ss:$16 sps:$4 sm:$0xff]   ;;  %v6216_v22 = vld [vmem:[#allocation4 + $0x8c] ss:$16 sps:$4 sm:$0xff]  }
 0x38c   :  { %6888 = vst [vmem:[#allocation29_spill] sm:$0xff] %v6216_v22  ;;  %v6228_v3 = vld [vmem:[#allocation4 + $0xac] ss:$16 sps:$4 sm:$0xff]  }
 0x38d   :  { %v6166_v32 = vadd.f32 %v1792_v20, %v1791_v2  ;;  %v6220_v20 = vld [vmem:[#allocation4 + $0x80] ss:$16 sps:$4 sm:$0xff]   ;;  %v6222_v2 = vld [vmem:[#allocation4 + $0x88] ss:$16 sps:$4 sm:$0xff]   ;;  %6892 = vst [vmem:[#allocation33_spill] sm:$0xff] %v6228_v3 }
 0x38e   :  { %6889 = vst [vmem:[#allocation30_spill] sm:$0xff] %v6220_v20  ;;  %6890 = vst [vmem:[#allocation31_spill] sm:$0xff] %v6222_v2 }
 0x38f   :  { %5529 = vtanh.f32 %v6166_v32 }
 0x399   :  { %v5530_v4 = vpop.eup %5529 }
 0x39a   :  { %v1795_v19 = vmul.f32 %v5530_v4, %v1790_v5  ;;  %v6232_v5 = vld [vmem:[#allocation4 + $0xa0] ss:$16 sps:$4 sm:$0xff]   ;;  %v6234_v4 = vld [vmem:[#allocation4 + $0xa8] ss:$16 sps:$4 sm:$0xff]  }
 0x39b   :  { %6893 = vst [vmem:[#allocation34_spill] sm:$0xff] %v6232_v5 }
 0x39c   :  { %v1796_v8 = vpack.c.bf16 %v1795_v19, %v1795_v19  ;;  %v6238_v19 = vld [vmem:[#allocation4 + $0xc4] ss:$16 sps:$4 sm:$0xff]  }
 0x39e   :  { %4877 = vst [vmem:[%s6735_s4 + $0x8] sm:$0xf] %v1796_v8  ;;  %2058 = vmatmul.mubr.bf16.vlgmr.msra.gmra.mrb[24].mxu0 %v1796_v8  ;;  %2099 = vmatmul.mubr.bf16.vlgmr.msra.gmra.mrb[24].mxu1 %v1796_v8  ;;  %v6240_v8 = vld [vmem:[#allocation4 + $0xcc] ss:$16 sps:$4 sm:$0xff]  }
 0x39f   :  { %2268 = vmatpush1.bf16.msra.mxu0 %v6169_v15  ;;  %2309 = vmatpush1.bf16.msra.mxu1 %v6171_v7  ;;  %6894 = vst [vmem:[#allocation35_spill] sm:$0xff] %v6240_v8 }
 0x3a0   :  { %2269 = vmatprep.subr.bf16.mxu0 %v6173_v24  ;;  %2310 = vmatprep.subr.bf16.mxu1 %v6175_v17 }
 0x3a1   :  { %2299 = vmatprep.mubr.bf16.mxu0 %v6838_v63  ;;  %2340 = vmatprep.mubr.bf16.mxu1 %v6838_v63 }
 0x3a3   :  { %2270 = vmatpush1.bf16.msra.mxu0 %v6182_v6  ;;  %2311 = vmatpush1.bf16.msra.mxu1 %v6184_v36 }
 0x3a4   :  { %2271 = vmatprep.subr.bf16.mxu0 %v6188_v12  ;;  %2312 = vmatprep.subr.bf16.mxu1 %v6190_v34 }
 0x3a7   :  { %2272 = vmatpush1.bf16.msra.mxu0 %v6196_v57  ;;  %2313 = vmatpush1.bf16.msra.mxu1 %v6198_v14 }
 0x3a8   :  { %2273 = vmatprep.subr.bf16.mxu0 %v6202_v10  ;;  %2314 = vmatprep.subr.bf16.mxu1 %v6204_v31 }
 0x3ab   :  { %2274 = vmatpush1.bf16.msra.mxu0 %v6208_v23  ;;  %2315 = vmatpush1.bf16.msra.mxu1 %v6210_v27 }
 0x3ac   :  { %2275 = vmatprep.subr.bf16.mxu0 %v6214_v16  ;;  %2316 = vmatprep.subr.bf16.mxu1 %v6216_v22  ;;  %v6244_v22 = vld [vmem:[#allocation4 + $0xc0] ss:$16 sps:$4 sm:$0xff]  }
 0x3af   :  { %2276 = vmatpush1.bf16.msra.mxu0 %v6220_v20  ;;  %2317 = vmatpush1.bf16.msra.mxu1 %v6222_v2  ;;  %v6246_v20 = vld [vmem:[#allocation4 + $0xc8] ss:$16 sps:$4 sm:$0xff]   ;;  %v6250_v2 = vld [vmem:[#allocation4 + $0xe4] ss:$16 sps:$4 sm:$0xff]  }
 0x3b0   :  { %2277 = vmatprep.subr.bf16.mxu0 %v6226_v1  ;;  %2318 = vmatprep.subr.bf16.mxu1 %v6228_v3  ;;  %v6252_v1 = vld [vmem:[#allocation4 + $0xec] ss:$16 sps:$4 sm:$0xff]   ;;  %v6256_v3 = vld [vmem:[#allocation4 + $0xe0] ss:$16 sps:$4 sm:$0xff]  }
 0x3b3   :  { %2278 = vmatpush1.bf16.msra.mxu0 %v6232_v5  ;;  %2319 = vmatpush1.bf16.msra.mxu1 %v6234_v4  ;;  %v6258_v5 = vld [vmem:[#allocation4 + $0xe8] ss:$16 sps:$4 sm:$0xff]  }
 0x3b4   :  { %2279 = vmatprep.subr.bf16.mxu0 %v6238_v19  ;;  %2320 = vmatprep.subr.bf16.mxu1 %v6240_v8  ;;  %v4878_v8 = vld [vmem:[%s6731_s0 + $0xc] sm:$0xf] }
 0x3b7   :  { %2280 = vmatpush1.bf16.msra.mxu0 %v6244_v22  ;;  %2321 = vmatpush1.bf16.msra.mxu1 %v6246_v20 }
 0x3b8   :  { %2281 = vmatprep.subr.bf16.mxu0 %v6250_v2  ;;  %2322 = vmatprep.subr.bf16.mxu1 %v6252_v1 }
 0x3bb   :  { %2282 = vmatpush1.bf16.msra.mxu0 %v6256_v3  ;;  %2323 = vmatpush1.bf16.msra.mxu1 %v6258_v5 }
 0x3bc   :  { %2600 = vmatprep.subr.bf16.mxu0 %v6059_v37  ;;  %2641 = vmatprep.subr.bf16.mxu1 %v6061_v38 }
 0x3be   :  { %2300 = vmatmul.mubr.bf16.vlgmr.msra.gmra.mrb[28].mxu0 %v4878_v8  ;;  %2341 = vmatmul.mubr.bf16.vlgmr.msra.gmra.mrb[28].mxu1 %v4878_v8 }
 0x3bf   :  { %2601 = vmatpush1.bf16.msra.mxu0 %v6063_v39  ;;  %2642 = vmatpush1.bf16.msra.mxu1 %v6065_v40 }
 0x3c0   :  { %2602 = vmatprep.subr.bf16.mxu0 %v6071_v0  ;;  %2643 = vmatprep.subr.bf16.mxu1 %v6073_v41 }
 0x3c1   :  { %2632 = vmatprep.mubr.bf16.mxu0 %v6838_v63  ;;  %2673 = vmatprep.mubr.bf16.mxu1 %v6838_v63 }
 0x3c3   :  { %2603 = vmatpush1.bf16.msra.mxu0 %v6075_v42  ;;  %2644 = vmatpush1.bf16.msra.mxu1 %v6077_v43 }
 0x3c4   :  { %2604 = vmatprep.subr.bf16.mxu0 %v6083_v44  ;;  %2645 = vmatprep.subr.bf16.mxu1 %v6085_v45 }
 0x3c7   :  { %2605 = vmatpush1.bf16.msra.mxu0 %v6087_v46  ;;  %2646 = vmatpush1.bf16.msra.mxu1 %v6089_v47 }
 0x3c8   :  { %2606 = vmatprep.subr.bf16.mxu0 %v6095_v48  ;;  %2647 = vmatprep.subr.bf16.mxu1 %v6097_v49 }
 0x3cb   :  { %2607 = vmatpush1.bf16.msra.mxu0 %v6099_v50  ;;  %2648 = vmatpush1.bf16.msra.mxu1 %v6101_v51 }
 0x3cc   :  { %2608 = vmatprep.subr.bf16.mxu0 %v6107_v52  ;;  %2649 = vmatprep.subr.bf16.mxu1 %v6109_v53 }
 0x3cf   :  { %2609 = vmatpush1.bf16.msra.mxu0 %v6111_v54  ;;  %2650 = vmatpush1.bf16.msra.mxu1 %v6113_v55 }
 0x3d0   :  { %2610 = vmatprep.subr.bf16.mxu0 %v6121_v58  ;;  %2651 = vmatprep.subr.bf16.mxu1 %v6125_v60 }
 0x3d3   :  { %2611 = vmatpush1.bf16.msra.mxu0 %v6119_v56  ;;  %2652 = vmatpush1.bf16.msra.mxu1 %v6123_v59 }
 0x3d4   :  { %2612 = vmatprep.subr.bf16.mxu0 %v6127_v61  ;;  %2653 = vmatprep.subr.bf16.mxu1 %v6130_v62 }
 0x3d7   :  { %2613 = vmatpush1.bf16.msra.mxu0 %v6135_v35  ;;  %2654 = vmatpush1.bf16.msra.mxu1 %v6137_v9 }
 0x3d8   :  { %2614 = vmatprep.subr.bf16.mxu0 %v6141_v28  ;;  %2655 = vmatprep.subr.bf16.mxu1 %v6143_v21 }
 0x3db   :  { %2615 = vmatpush1.bf16.msra.mxu0 %v6147_v26  ;;  %2656 = vmatpush1.bf16.msra.mxu1 %v6149_v33 }
 0x3dc   :  { %2842 = vmatprep.subr.bf16.mxu0 %v6153_v29  ;;  %2883 = vmatprep.subr.bf16.mxu1 %v6155_v11 }
 0x471   :  { %v2059_v8 = vpop.f32.mrb[24].mxu0  ;;  %v2100_v61 = vpop.f32.mrb[24].mxu1 }
 0x472   :  { %v2061_v59 = vpop.f32.mrb[25].mxu0  ;;  %v2102_v62 = vpop.f32.mrb[25].mxu1 }
 0x473   :  { %v2063_v56 = vpop.f32.mrb[26].mxu0  ;;  %v2104_v35 = vpop.f32.mrb[26].mxu1 }
 0x474   :  { %v2064_v60 = vpop.f32.mrb[27].mxu0  ;;  %v2105_v9 = vpop.f32.mrb[27].mxu1 }
 0x491   :  { %v2301_v58 = vpop.f32.mrb[28].mxu0  ;;  %v2342_v28 = vpop.f32.mrb[28].mxu1 }
 0x492   :  { %v2302_v55 = vadd.f32 %v2301_v58, %v2059_v8  ;;  %v2343_v21 = vadd.f32 %v2342_v28, %v2100_v61  ;;  %v2303_v54 = vpop.f32.mrb[29].mxu0  ;;  %v2344_v26 = vpop.f32.mrb[29].mxu1  ;;  %v6896_v8 = vld [vmem:[#allocation30_spill] sm:$0xff] }
 0x493   :  { %v2304_v53 = vadd.f32 %v2303_v54, %v2061_v59  ;;  %v2345_v33 = vadd.f32 %v2344_v26, %v2102_v62  ;;  %v2305_v52 = vpop.f32.mrb[30].mxu0  ;;  %v2346_v29 = vpop.f32.mrb[30].mxu1 }
 0x494   :  { %v2349_v11 = vadd.f32 %v2302_v55, %v5922_v30  ;;  %v2306_v51 = vpop.f32.mrb[31].mxu0  ;;  %v2347_v50 = vpop.f32.mrb[31].mxu1  ;;  %v2351_v60 = vadd.f32 %v2343_v21, %v5927_v13 }
 0x495   :  { %v2350_v49 = vadd.f32 %v2304_v53, %v5924_v18  ;;  %v2352_v58 = vadd.f32 %v2345_v33, %v5931_v25 }
 0x496   :  { %v2353_v56 = vmul.f32 0.5, %v2349_v11 }
 0x497   :  { %v2357_v35 = vmul.f32 0.5, %v2350_v49  ;;  %v2362_v61 = vmul.f32 0.5, %v2352_v58  ;;  %v6900_v58 = vld [vmem:[#allocation34_spill] sm:$0xff] }
 0x498   :  { %5531 = vtanh.f32 %v2353_v56  ;;  %v6897_v56 = vld [vmem:[#allocation31_spill] sm:$0xff] }
 0x499   :  { %5533 = vtanh.f32 %v2357_v35  ;;  %v6898_v35 = vld [vmem:[#allocation32_spill] sm:$0xff] }
 0x49a   :  { %5535 = vtanh.f32 %v2351_v60  ;;  %v6899_v60 = vld [vmem:[#allocation33_spill] sm:$0xff] }
 0x49b   :  { %5537 = vtanh.f32 %v2362_v61  ;;  %v6901_v61 = vld [vmem:[#allocation35_spill] sm:$0xff] }
 0x4a2   :  { %v5532_v54 = vpop.eup %5531 }
 0x4a3   :  { %v5534_v59 = vpop.eup %5533  ;;  %v2355_v52 = vmul.f32 0.5, %v5532_v54  ;;  %v4944_v54 = vld [vmem:[%s6731_s0 + $0x10] sm:$0xf] }
 0x4a4   :  { %v2359_v62 = vmul.f32 0.5, %v5534_v59  ;;  %v5536_v51 = vpop.eup %5535  ;;  %v6915_v59 = vld [vmem:[#allocation21_spill] sm:$0xff] }
 0x4a5   :  { %v2356_v55 = vadd.f32 0.5, %v2355_v52  ;;  %v5538_v28 = vpop.eup %5537  ;;  %v6916_v52 = vld [vmem:[#allocation22_spill] sm:$0xff] }
 0x4a6   :  { %v2360_v50 = vadd.f32 0.5, %v2359_v62  ;;  %v2364_v21 = vmul.f32 0.5, %v5538_v28  ;;  %v6917_v62 = vld [vmem:[#allocation23_spill] sm:$0xff] }
 0x4a7   :  { %v2367_v9 = vmul.f32 %v5536_v51, %v2356_v55  ;;  %v6918_v55 = vld [vmem:[#allocation24_spill] sm:$0xff]  ;;  %v6919_v51 = vld [vmem:[#allocation25_spill] sm:$0xff] }
 0x4a8   :  { %v2366_v53 = vmul.f32 %v2360_v50, %v6166_v32  ;;  %v2365_v26 = vadd.f32 0.5, %v2364_v21  ;;  %v6895_v32 = vld [vmem:[#allocation29_spill] sm:$0xff]  ;;  %v6920_v50 = vld [vmem:[#allocation26_spill] sm:$0xff] }
 0x4aa   :  { %v6308_v49 = vadd.f32 %v2367_v9, %v2366_v53  ;;  %v6921_v9 = vld [vmem:[#allocation27_spill] sm:$0xff]  ;;  %v6922_v53 = vld [vmem:[#allocation28_spill] sm:$0xff] }
 0x4ac   :  { %5539 = vtanh.f32 %v6308_v49 }
 0x4b6   :  { %v5540_v33 = vpop.eup %5539 }
 0x4b7   :  { %v2370_v29 = vmul.f32 %v5540_v33, %v2365_v26 }
 0x4b9   :  { %v2371_v11 = vpack.c.bf16 %v2370_v29, %v2370_v29 }
 0x4bb   :  { %4943 = vst [vmem:[%s6735_s4 + $0xc] sm:$0xf] %v2371_v11  ;;  %2633 = vmatmul.mubr.bf16.vlgmr.msra.gmra.mrb[32].mxu0 %v2371_v11  ;;  %2674 = vmatmul.mubr.bf16.vlgmr.msra.gmra.mrb[32].mxu1 %v2371_v11 }
 0x4bc   :  { %2843 = vmatpush1.bf16.msra.mxu0 %v6169_v15  ;;  %2884 = vmatpush1.bf16.msra.mxu1 %v6171_v7 }
 0x4bd   :  { %2844 = vmatprep.subr.bf16.mxu0 %v6173_v24  ;;  %2885 = vmatprep.subr.bf16.mxu1 %v6175_v17 }
 0x4be   :  { %2874 = vmatprep.mubr.bf16.mxu0 %v6838_v63  ;;  %2915 = vmatprep.mubr.bf16.mxu1 %v6838_v63 }
 0x4c0   :  { %2845 = vmatpush1.bf16.msra.mxu0 %v6182_v6  ;;  %2886 = vmatpush1.bf16.msra.mxu1 %v6184_v36 }
 0x4c1   :  { %2846 = vmatprep.subr.bf16.mxu0 %v6188_v12  ;;  %2887 = vmatprep.subr.bf16.mxu1 %v6190_v34 }
 0x4c4   :  { %2847 = vmatpush1.bf16.msra.mxu0 %v6196_v57  ;;  %2888 = vmatpush1.bf16.msra.mxu1 %v6198_v14 }
 0x4c5   :  { %2848 = vmatprep.subr.bf16.mxu0 %v6202_v10  ;;  %2889 = vmatprep.subr.bf16.mxu1 %v6204_v31 }
 0x4c8   :  { %2849 = vmatpush1.bf16.msra.mxu0 %v6208_v23  ;;  %2890 = vmatpush1.bf16.msra.mxu1 %v6210_v27 }
 0x4c9   :  { %2850 = vmatprep.subr.bf16.mxu0 %v6214_v16  ;;  %2891 = vmatprep.subr.bf16.mxu1 %v6895_v32 }
 0x4cc   :  { %2851 = vmatpush1.bf16.msra.mxu0 %v6896_v8  ;;  %2892 = vmatpush1.bf16.msra.mxu1 %v6897_v56 }
 0x4cd   :  { %2852 = vmatprep.subr.bf16.mxu0 %v6898_v35  ;;  %2893 = vmatprep.subr.bf16.mxu1 %v6899_v60 }
 0x4d0   :  { %2853 = vmatpush1.bf16.msra.mxu0 %v6900_v58  ;;  %2894 = vmatpush1.bf16.msra.mxu1 %v6234_v4 }
 0x4d1   :  { %2854 = vmatprep.subr.bf16.mxu0 %v6238_v19  ;;  %2895 = vmatprep.subr.bf16.mxu1 %v6901_v61 }
 0x4d4   :  { %2855 = vmatpush1.bf16.msra.mxu0 %v6244_v22  ;;  %2896 = vmatpush1.bf16.msra.mxu1 %v6246_v20 }
 0x4d5   :  { %2856 = vmatprep.subr.bf16.mxu0 %v6250_v2  ;;  %2897 = vmatprep.subr.bf16.mxu1 %v6252_v1 }
 0x4d8   :  { %2857 = vmatpush1.bf16.msra.mxu0 %v6256_v3  ;;  %2898 = vmatpush1.bf16.msra.mxu1 %v6258_v5 }
 0x4d9   :  { %3175 = vmatprep.subr.bf16.mxu0 %v6059_v37  ;;  %3216 = vmatprep.subr.bf16.mxu1 %v6061_v38  ;;  %v6902_v37 = vld [vmem:[#allocation36_spill] sm:$0xff]  ;;  %v6903_v38 = vld [vmem:[#allocation37_spill] sm:$0xff] }
 0x4db   :  { %2875 = vmatmul.mubr.bf16.vlgmr.msra.gmra.mrb[36].mxu0 %v4944_v54  ;;  %2916 = vmatmul.mubr.bf16.vlgmr.msra.gmra.mrb[36].mxu1 %v4944_v54 }
 0x4dc   :  { %3176 = vmatpush1.bf16.msra.mxu0 %v6063_v39  ;;  %3217 = vmatpush1.bf16.msra.mxu1 %v6065_v40  ;;  %v6904_v39 = vld [vmem:[#allocation10_spill] sm:$0xff]  ;;  %v6905_v40 = vld [vmem:[#allocation11_spill] sm:$0xff] }
 0x4dd   :  { %3177 = vmatprep.subr.bf16.mxu0 %v6071_v0  ;;  %3218 = vmatprep.subr.bf16.mxu1 %v6073_v41  ;;  %v6906_v0 = vld [vmem:[#allocation12_spill] sm:$0xff]  ;;  %v6907_v41 = vld [vmem:[#allocation13_spill] sm:$0xff] }
 0x4de   :  { %3207 = vmatprep.mubr.bf16.mxu0 %v6838_v63  ;;  %3248 = vmatprep.mubr.bf16.mxu1 %v6838_v63 }
 0x4e0   :  { %3178 = vmatpush1.bf16.msra.mxu0 %v6075_v42  ;;  %3219 = vmatpush1.bf16.msra.mxu1 %v6077_v43  ;;  %v6908_v42 = vld [vmem:[#allocation14_spill] sm:$0xff]  ;;  %v6909_v43 = vld [vmem:[#allocation16_spill] sm:$0xff] }
 0x4e1   :  { %3179 = vmatprep.subr.bf16.mxu0 %v6083_v44  ;;  %3220 = vmatprep.subr.bf16.mxu1 %v6085_v45  ;;  %v6910_v44 = vld [vmem:[#allocation18_spill] sm:$0xff]  ;;  %v6911_v45 = vld [vmem:[#allocation15_spill] sm:$0xff] }
 0x4e4   :  { %3180 = vmatpush1.bf16.msra.mxu0 %v6087_v46  ;;  %3221 = vmatpush1.bf16.msra.mxu1 %v6089_v47  ;;  %v6912_v46 = vld [vmem:[#allocation17_spill] sm:$0xff]  ;;  %v6913_v47 = vld [vmem:[#allocation19_spill] sm:$0xff] }
 0x4e5   :  { %3181 = vmatprep.subr.bf16.mxu0 %v6095_v48  ;;  %3222 = vmatprep.subr.bf16.mxu1 %v6902_v37  ;;  %v6914_v48 = vld [vmem:[#allocation20_spill] sm:$0xff] }
 0x4e8   :  { %3182 = vmatpush1.bf16.msra.mxu0 %v6903_v38  ;;  %3223 = vmatpush1.bf16.msra.mxu1 %v6904_v39 }
 0x4e9   :  { %3183 = vmatprep.subr.bf16.mxu0 %v6905_v40  ;;  %3224 = vmatprep.subr.bf16.mxu1 %v6906_v0 }
 0x4ec   :  { %3184 = vmatpush1.bf16.msra.mxu0 %v6907_v41  ;;  %3225 = vmatpush1.bf16.msra.mxu1 %v6908_v42 }
 0x4ed   :  { %3185 = vmatprep.subr.bf16.mxu0 %v6909_v43  ;;  %3226 = vmatprep.subr.bf16.mxu1 %v6910_v44 }
 0x4f0   :  { %3186 = vmatpush1.bf16.msra.mxu0 %v6911_v45  ;;  %3227 = vmatpush1.bf16.msra.mxu1 %v6912_v46 }
 0x4f1   :  { %3187 = vmatprep.subr.bf16.mxu0 %v6913_v47  ;;  %3228 = vmatprep.subr.bf16.mxu1 %v6914_v48 }
 0x4f4   :  { %3188 = vmatpush1.bf16.msra.mxu0 %v6915_v59  ;;  %3229 = vmatpush1.bf16.msra.mxu1 %v6916_v52 }
 0x4f5   :  { %3189 = vmatprep.subr.bf16.mxu0 %v6917_v62  ;;  %3230 = vmatprep.subr.bf16.mxu1 %v6918_v55 }
 0x4f8   :  { %3190 = vmatpush1.bf16.msra.mxu0 %v6919_v51  ;;  %3231 = vmatpush1.bf16.msra.mxu1 %v6920_v50 }
 0x4f9   :  { %3417 = vmatprep.subr.bf16.mxu0 %v6921_v9  ;;  %3458 = vmatprep.subr.bf16.mxu1 %v6922_v53 }
 0x58e   :  { %v2634_v28 = vpop.f32.mrb[32].mxu0  ;;  %v2675_v21 = vpop.f32.mrb[32].mxu1 }
 0x58f   :  { %v2636_v26 = vpop.f32.mrb[33].mxu0  ;;  %v2677_v33 = vpop.f32.mrb[33].mxu1 }
 0x590   :  { %v2638_v29 = vpop.f32.mrb[34].mxu0  ;;  %v2679_v11 = vpop.f32.mrb[34].mxu1 }
 0x591   :  { %v2639_v54 = vpop.f32.mrb[35].mxu0  ;;  %v2680_v37 = vpop.f32.mrb[35].mxu1 }
 0x5ae   :  { %v2876_v38 = vpop.f32.mrb[36].mxu0  ;;  %v2917_v39 = vpop.f32.mrb[36].mxu1 }
 0x5af   :  { %v2877_v40 = vadd.f32 %v2876_v38, %v2634_v28  ;;  %v2918_v0 = vadd.f32 %v2917_v39, %v2675_v21  ;;  %v2878_v41 = vpop.f32.mrb[37].mxu0  ;;  %v2919_v42 = vpop.f32.mrb[37].mxu1 }
 0x5b0   :  { %v2879_v43 = vadd.f32 %v2878_v41, %v2636_v26  ;;  %v2920_v44 = vadd.f32 %v2919_v42, %v2677_v33  ;;  %v2880_v45 = vpop.f32.mrb[38].mxu0  ;;  %v2921_v46 = vpop.f32.mrb[38].mxu1 }
 0x5b1   :  { %v2924_v47 = vadd.f32 %v2877_v40, %v5922_v30  ;;  %v2881_v48 = vpop.f32.mrb[39].mxu0  ;;  %v2922_v59 = vpop.f32.mrb[39].mxu1  ;;  %v2926_v51 = vadd.f32 %v2918_v0, %v5927_v13  ;;  %v6523_v45 = vld [vmem:[#allocation6 + $0xe8] ss:$16 sps:$4 sm:$0xff]   ;;  %v6527_v46 = vld [vmem:[#allocation4 + $0x4] ss:$16 sps:$4 sm:$0xff]  }
 0x5b2   :  { %v2925_v52 = vadd.f32 %v2879_v43, %v5924_v18  ;;  %v2927_v50 = vadd.f32 %v2920_v44, %v5931_v25  ;;  %v6521_v44 = vld [vmem:[#allocation6 + $0xe0] ss:$16 sps:$4 sm:$0xff]  }
 0x5b3   :  { %v2928_v62 = vmul.f32 0.5, %v2924_v47  ;;  %v6529_v47 = vld [vmem:[#allocation4 + $0xc] ss:$16 sps:$4 sm:$0xff]  }
 0x5b4   :  { %v2932_v55 = vmul.f32 0.5, %v2925_v52  ;;  %v2937_v9 = vmul.f32 0.5, %v2927_v50 }
 0x5b5   :  { %5541 = vtanh.f32 %v2928_v62 }
 0x5b6   :  { %5543 = vtanh.f32 %v2932_v55 }
 0x5b7   :  { %5545 = vtanh.f32 %v2926_v51 }
 0x5b8   :  { %5547 = vtanh.f32 %v2937_v9 }
 0x5bf   :  { %v5542_v53 = vpop.eup %5541 }
 0x5c0   :  { %v5544_v28 = vpop.eup %5543  ;;  %v2930_v21 = vmul.f32 0.5, %v5542_v53 }
 0x5c1   :  { %v2934_v26 = vmul.f32 0.5, %v5544_v28  ;;  %v5546_v29 = vpop.eup %5545 }
 0x5c2   :  { %v2931_v33 = vadd.f32 0.5, %v2930_v21  ;;  %v5548_v39 = vpop.eup %5547 }
 0x5c3   :  { %v2935_v11 = vadd.f32 0.5, %v2934_v26  ;;  %v2939_v40 = vmul.f32 0.5, %v5548_v39 }
 0x5c4   :  { %v2942_v54 = vmul.f32 %v5546_v29, %v2931_v33 }
 0x5c5   :  { %v2941_v37 = vmul.f32 %v2935_v11, %v6308_v49  ;;  %v2940_v0 = vadd.f32 0.5, %v2939_v40  ;;  %v6497_v49 = vld [vmem:[#allocation6 + $0xa8] ss:$16 sps:$4 sm:$0xff]  }
 0x5c7   :  { %v6390_v38 = vadd.f32 %v2942_v54, %v2941_v37 }
 0x5c9   :  { %5549 = vtanh.f32 %v6390_v38 }
 0x5d3   :  { %v5550_v41 = vpop.eup %5549 }
 0x5d4   :  { %v2945_v42 = vmul.f32 %v5550_v41, %v2940_v0 }
 0x5d6   :  { %v2946_v43 = vpack.c.bf16 %v2945_v42, %v2945_v42 }
 0x5d8   :  { %5009 = vst [vmem:[%s6735_s4 + $0x10] sm:$0xf] %v2946_v43  ;;  %3208 = vmatmul.mubr.bf16.vlgmr.msra.gmra.mrb[40].mxu0 %v2946_v43  ;;  %3249 = vmatmul.mubr.bf16.vlgmr.msra.gmra.mrb[40].mxu1 %v2946_v43 }
 0x5d9   :  { %3418 = vmatpush1.bf16.msra.mxu0 %v6169_v15  ;;  %3459 = vmatpush1.bf16.msra.mxu1 %v6171_v7  ;;  %v5010_v15 = vld [vmem:[%s6731_s0 + $0x14] sm:$0xf]  ;;  %v6433_v7 = vld [vmem:[#allocation6 + $0x4] ss:$16 sps:$4 sm:$0xff]  }
 0x5da   :  { %3419 = vmatprep.subr.bf16.mxu0 %v6173_v24  ;;  %3460 = vmatprep.subr.bf16.mxu1 %v6175_v17  ;;  %v6435_v24 = vld [vmem:[#allocation6 + $0xc] ss:$16 sps:$4 sm:$0xff]   ;;  %v6437_v17 = vld [vmem:[#allocation6] ss:$16 sps:$4 sm:$0xff]  }
 0x5db   :  { %3449 = vmatprep.mubr.bf16.mxu0 %v6838_v63  ;;  %3490 = vmatprep.mubr.bf16.mxu1 %v6838_v63 }
 0x5dd   :  { %3420 = vmatpush1.bf16.msra.mxu0 %v6182_v6  ;;  %3461 = vmatpush1.bf16.msra.mxu1 %v6184_v36  ;;  %v6439_v6 = vld [vmem:[#allocation6 + $0x8] ss:$16 sps:$4 sm:$0xff]   ;;  %v6445_v36 = vld [vmem:[#allocation6 + $0x24] ss:$16 sps:$4 sm:$0xff]  }
 0x5de   :  { %3421 = vmatprep.subr.bf16.mxu0 %v6188_v12  ;;  %3462 = vmatprep.subr.bf16.mxu1 %v6190_v34  ;;  %v6447_v12 = vld [vmem:[#allocation6 + $0x2c] ss:$16 sps:$4 sm:$0xff]   ;;  %v6449_v34 = vld [vmem:[#allocation6 + $0x20] ss:$16 sps:$4 sm:$0xff]  }
 0x5e1   :  { %3422 = vmatpush1.bf16.msra.mxu0 %v6196_v57  ;;  %3463 = vmatpush1.bf16.msra.mxu1 %v6198_v14  ;;  %v6451_v57 = vld [vmem:[#allocation6 + $0x28] ss:$16 sps:$4 sm:$0xff]   ;;  %v6457_v14 = vld [vmem:[#allocation6 + $0x44] ss:$16 sps:$4 sm:$0xff]  }
 0x5e2   :  { %3423 = vmatprep.subr.bf16.mxu0 %v6202_v10  ;;  %3464 = vmatprep.subr.bf16.mxu1 %v6204_v31  ;;  %v6459_v10 = vld [vmem:[#allocation6 + $0x4c] ss:$16 sps:$4 sm:$0xff]   ;;  %v6461_v31 = vld [vmem:[#allocation6 + $0x40] ss:$16 sps:$4 sm:$0xff]  }
 0x5e5   :  { %3424 = vmatpush1.bf16.msra.mxu0 %v6208_v23  ;;  %3465 = vmatpush1.bf16.msra.mxu1 %v6210_v27  ;;  %v6463_v23 = vld [vmem:[#allocation6 + $0x48] ss:$16 sps:$4 sm:$0xff]   ;;  %v6469_v27 = vld [vmem:[#allocation6 + $0x64] ss:$16 sps:$4 sm:$0xff]  }
 0x5e6   :  { %3425 = vmatprep.subr.bf16.mxu0 %v6214_v16  ;;  %3466 = vmatprep.subr.bf16.mxu1 %v6895_v32  ;;  %v6471_v16 = vld [vmem:[#allocation6 + $0x6c] ss:$16 sps:$4 sm:$0xff]  }
 0x5e7   :  { %v6499_v32 = vld [vmem:[#allocation6 + $0xac] ss:$16 sps:$4 sm:$0xff]  }
 0x5e9   :  { %3426 = vmatpush1.bf16.msra.mxu0 %v6896_v8  ;;  %3467 = vmatpush1.bf16.msra.mxu1 %v6897_v56  ;;  %v6501_v8 = vld [vmem:[#allocation6 + $0xc4] ss:$16 sps:$4 sm:$0xff]   ;;  %v6504_v56 = vld [vmem:[#allocation6 + $0xcc] ss:$16 sps:$4 sm:$0xff]  }
 0x5ea   :  { %3427 = vmatprep.subr.bf16.mxu0 %v6898_v35  ;;  %3468 = vmatprep.subr.bf16.mxu1 %v6899_v60  ;;  %v6509_v35 = vld [vmem:[#allocation6 + $0xc0] ss:$16 sps:$4 sm:$0xff]   ;;  %v6511_v60 = vld [vmem:[#allocation6 + $0xc8] ss:$16 sps:$4 sm:$0xff]  }
 0x5ed   :  { %3428 = vmatpush1.bf16.msra.mxu0 %v6900_v58  ;;  %3469 = vmatpush1.bf16.msra.mxu1 %v6234_v4  ;;  %v6493_v4 = vld [vmem:[#allocation6 + $0xa0] ss:$16 sps:$4 sm:$0xff]   ;;  %v6515_v58 = vld [vmem:[#allocation6 + $0xe4] ss:$16 sps:$4 sm:$0xff]  }
 0x5ee   :  { %3429 = vmatprep.subr.bf16.mxu0 %v6238_v19  ;;  %3470 = vmatprep.subr.bf16.mxu1 %v6901_v61  ;;  %v6495_v19 = vld [vmem:[#allocation6 + $0xa4] ss:$16 sps:$4 sm:$0xff]   ;;  %v6517_v61 = vld [vmem:[#allocation6 + $0xec] ss:$16 sps:$4 sm:$0xff]  }
 0x5f1   :  { %3430 = vmatpush1.bf16.msra.mxu0 %v6244_v22  ;;  %3471 = vmatpush1.bf16.msra.mxu1 %v6246_v20  ;;  %v6473_v22 = vld [vmem:[#allocation6 + $0x60] ss:$16 sps:$4 sm:$0xff]   ;;  %v6475_v20 = vld [vmem:[#allocation6 + $0x68] ss:$16 sps:$4 sm:$0xff]  }
 0x5f2   :  { %3431 = vmatprep.subr.bf16.mxu0 %v6250_v2  ;;  %3472 = vmatprep.subr.bf16.mxu1 %v6252_v1  ;;  %v6481_v2 = vld [vmem:[#allocation6 + $0x84] ss:$16 sps:$4 sm:$0xff]   ;;  %v6483_v1 = vld [vmem:[#allocation6 + $0x8c] ss:$16 sps:$4 sm:$0xff]  }
 0x5f5   :  { %3432 = vmatpush1.bf16.msra.mxu0 %v6256_v3  ;;  %3473 = vmatpush1.bf16.msra.mxu1 %v6258_v5  ;;  %v6485_v3 = vld [vmem:[#allocation6 + $0x80] ss:$16 sps:$4 sm:$0xff]   ;;  %v6487_v5 = vld [vmem:[#allocation6 + $0x88] ss:$16 sps:$4 sm:$0xff]  }
 0x5f6   :  { %3750 = vmatprep.subr.bf16.mxu0 %v6433_v7  ;;  %3791 = vmatprep.subr.bf16.mxu1 %v6435_v24 }
 0x5f8   :  { %3450 = vmatmul.mubr.bf16.vlgmr.msra.gmra.mrb[44].mxu0 %v5010_v15  ;;  %3491 = vmatmul.mubr.bf16.vlgmr.msra.gmra.mrb[44].mxu1 %v5010_v15 }
 0x5f9   :  { %3782 = vmatprep.mubr.bf16.mxu0 %v6838_v63  ;;  %3823 = vmatprep.mubr.bf16.mxu1 %v6838_v63 }
 0x5fa   :  { %3751 = vmatpush1.bf16.msra.mxu0 %v6437_v17  ;;  %3792 = vmatpush1.bf16.msra.mxu1 %v6439_v6 }
 0x5fb   :  { %3752 = vmatprep.subr.bf16.mxu0 %v6445_v36  ;;  %3793 = vmatprep.subr.bf16.mxu1 %v6447_v12 }
 0x5fe   :  { %3753 = vmatpush1.bf16.msra.mxu0 %v6449_v34  ;;  %3794 = vmatpush1.bf16.msra.mxu1 %v6451_v57 }
 0x5ff   :  { %3754 = vmatprep.subr.bf16.mxu0 %v6457_v14  ;;  %3795 = vmatprep.subr.bf16.mxu1 %v6459_v10 }
 0x602   :  { %3755 = vmatpush1.bf16.msra.mxu0 %v6461_v31  ;;  %3796 = vmatpush1.bf16.msra.mxu1 %v6463_v23 }
 0x603   :  { %3756 = vmatprep.subr.bf16.mxu0 %v6469_v27  ;;  %3797 = vmatprep.subr.bf16.mxu1 %v6471_v16 }
 0x606   :  { %3757 = vmatpush1.bf16.msra.mxu0 %v6473_v22  ;;  %3798 = vmatpush1.bf16.msra.mxu1 %v6475_v20 }
 0x607   :  { %3758 = vmatprep.subr.bf16.mxu0 %v6481_v2  ;;  %3799 = vmatprep.subr.bf16.mxu1 %v6483_v1 }
 0x60a   :  { %3759 = vmatpush1.bf16.msra.mxu0 %v6485_v3  ;;  %3800 = vmatpush1.bf16.msra.mxu1 %v6487_v5 }
 0x60b   :  { %3760 = vmatprep.subr.bf16.mxu0 %v6495_v19  ;;  %3801 = vmatprep.subr.bf16.mxu1 %v6499_v32 }
 0x60e   :  { %3761 = vmatpush1.bf16.msra.mxu0 %v6493_v4  ;;  %3802 = vmatpush1.bf16.msra.mxu1 %v6497_v49 }
 0x60f   :  { %3762 = vmatprep.subr.bf16.mxu0 %v6501_v8  ;;  %3803 = vmatprep.subr.bf16.mxu1 %v6504_v56 }
 0x612   :  { %3763 = vmatpush1.bf16.msra.mxu0 %v6509_v35  ;;  %3804 = vmatpush1.bf16.msra.mxu1 %v6511_v60 }
 0x613   :  { %3764 = vmatprep.subr.bf16.mxu0 %v6515_v58  ;;  %3805 = vmatprep.subr.bf16.mxu1 %v6517_v61 }
 0x616   :  { %3765 = vmatpush1.bf16.msra.mxu0 %v6521_v44  ;;  %3806 = vmatpush1.bf16.msra.mxu1 %v6523_v45 }
 0x617   :  { %3992 = vmatprep.subr.bf16.mxu0 %v6527_v46  ;;  %4033 = vmatprep.subr.bf16.mxu1 %v6529_v47 }
 0x6ab   :  { %v3209_v48 = vpop.f32.mrb[40].mxu0  ;;  %v3250_v59 = vpop.f32.mrb[40].mxu1 }
 0x6ac   :  { %v3211_v52 = vpop.f32.mrb[41].mxu0  ;;  %v3252_v62 = vpop.f32.mrb[41].mxu1 }
 0x6ad   :  { %v3213_v55 = vpop.f32.mrb[42].mxu0  ;;  %v3254_v51 = vpop.f32.mrb[42].mxu1 }
 0x6ae   :  { %v3214_v50 = vpop.f32.mrb[43].mxu0  ;;  %v3255_v9 = vpop.f32.mrb[43].mxu1 }
 0x6cb   :  { %v3451_v53 = vpop.f32.mrb[44].mxu0  ;;  %v3492_v28 = vpop.f32.mrb[44].mxu1 }
 0x6cc   :  { %v3452_v21 = vadd.f32 %v3451_v53, %v3209_v48  ;;  %v3493_v26 = vadd.f32 %v3492_v28, %v3250_v59  ;;  %v3453_v33 = vpop.f32.mrb[45].mxu0  ;;  %v3494_v29 = vpop.f32.mrb[45].mxu1 }
 0x6cd   :  { %v3454_v11 = vadd.f32 %v3453_v33, %v3211_v52  ;;  %v3495_v54 = vadd.f32 %v3494_v29, %v3252_v62  ;;  %v3455_v37 = vpop.f32.mrb[46].mxu0  ;;  %v3496_v39 = vpop.f32.mrb[46].mxu1 }
 0x6ce   :  { %v3499_v40 = vadd.f32 %v3452_v21, %v5922_v30  ;;  %v3456_v0 = vpop.f32.mrb[47].mxu0  ;;  %v3497_v41 = vpop.f32.mrb[47].mxu1  ;;  %v3501_v55 = vadd.f32 %v3493_v26, %v5927_v13 }
 0x6cf   :  { %v3500_v42 = vadd.f32 %v3454_v11, %v5924_v18  ;;  %v3502_v48 = vadd.f32 %v3495_v54, %v5931_v25  ;;  %v6545_v0 = vld [vmem:[#allocation4 + $0x8] ss:$16 sps:$4 sm:$0xff]  }
 0x6d0   :  { %v3503_v43 = vmul.f32 0.5, %v3499_v40  ;;  %v6543_v40 = vld [vmem:[#allocation4] ss:$16 sps:$4 sm:$0xff]  }
 0x6d1   :  { %v3507_v15 = vmul.f32 0.5, %v3500_v42  ;;  %v3512_v59 = vmul.f32 0.5, %v3502_v48  ;;  %v6547_v42 = vld [vmem:[#allocation4 + $0x24] ss:$16 sps:$4 sm:$0xff]   ;;  %v6564_v48 = vld [vmem:[#allocation4 + $0x4c] ss:$16 sps:$4 sm:$0xff]  }
 0x6d2   :  { %5551 = vtanh.f32 %v3503_v43  ;;  %v6549_v43 = vld [vmem:[#allocation4 + $0x2c] ss:$16 sps:$4 sm:$0xff]  }
 0x6d3   :  { %5553 = vtanh.f32 %v3507_v15  ;;  %v6558_v15 = vld [vmem:[#allocation4 + $0x28] ss:$16 sps:$4 sm:$0xff]  }
 0x6d4   :  { %5555 = vtanh.f32 %v3501_v55  ;;  %v6562_v55 = vld [vmem:[#allocation4 + $0x44] ss:$16 sps:$4 sm:$0xff]  }
 0x6d5   :  { %5557 = vtanh.f32 %v3512_v59  ;;  %v6570_v59 = vld [vmem:[#allocation4 + $0x40] ss:$16 sps:$4 sm:$0xff]  }
 0x6dc   :  { %v5552_v52 = vpop.eup %5551 }
 0x6dd   :  { %v5554_v62 = vpop.eup %5553  ;;  %v3505_v51 = vmul.f32 0.5, %v5552_v52  ;;  %v6572_v52 = vld [vmem:[#allocation4 + $0x48] ss:$16 sps:$4 sm:$0xff]  }
 0x6de   :  { %v3509_v50 = vmul.f32 0.5, %v5554_v62  ;;  %v5556_v53 = vpop.eup %5555  ;;  %v6576_v62 = vld [vmem:[#allocation4 + $0x64] ss:$16 sps:$4 sm:$0xff]  }
 0x6df   :  { %v3506_v9 = vadd.f32 0.5, %v3505_v51  ;;  %v5558_v26 = vpop.eup %5557  ;;  %v6578_v51 = vld [vmem:[#allocation4 + $0x6c] ss:$16 sps:$4 sm:$0xff]  }
 0x6e0   :  { %v3510_v28 = vadd.f32 0.5, %v3509_v50  ;;  %v3514_v11 = vmul.f32 0.5, %v5558_v26  ;;  %v6582_v50 = vld [vmem:[#allocation4 + $0x60] ss:$16 sps:$4 sm:$0xff]   ;;  %v6600_v26 = vld [vmem:[#allocation4 + $0xa4] ss:$16 sps:$4 sm:$0xff]  }
 0x6e1   :  { %v3517_v21 = vmul.f32 %v5556_v53, %v3506_v9  ;;  %v6584_v9 = vld [vmem:[#allocation4 + $0x68] ss:$16 sps:$4 sm:$0xff]   ;;  %v6588_v53 = vld [vmem:[#allocation4 + $0x84] ss:$16 sps:$4 sm:$0xff]   ;;  %6926 = vst [vmem:[#allocation32_spill] sm:$0xff] %v6600_v26 }
 0x6e2   :  { %v3516_v33 = vmul.f32 %v3510_v28, %v6390_v38  ;;  %v3515_v37 = vadd.f32 0.5, %v3514_v11  ;;  %v6556_v38 = vld [vmem:[#allocation4 + $0x20] ss:$16 sps:$4 sm:$0xff]   ;;  %v6590_v28 = vld [vmem:[#allocation4 + $0x8c] ss:$16 sps:$4 sm:$0xff]  }
 0x6e3   :  { %6923 = vst [vmem:[#allocation29_spill] sm:$0xff] %v6590_v28  ;;  %v6602_v11 = vld [vmem:[#allocation4 + $0xac] ss:$16 sps:$4 sm:$0xff]  }
 0x6e4   :  { %v6540_v29 = vadd.f32 %v3517_v21, %v3516_v33  ;;  %v6594_v21 = vld [vmem:[#allocation4 + $0x80] ss:$16 sps:$4 sm:$0xff]   ;;  %v6596_v33 = vld [vmem:[#allocation4 + $0x88] ss:$16 sps:$4 sm:$0xff]   ;;  %6927 = vst [vmem:[#allocation33_spill] sm:$0xff] %v6602_v11 }
 0x6e5   :  { %6924 = vst [vmem:[#allocation30_spill] sm:$0xff] %v6594_v21  ;;  %6925 = vst [vmem:[#allocation31_spill] sm:$0xff] %v6596_v33 }
 0x6e6   :  { %5559 = vtanh.f32 %v6540_v29 }
 0x6f0   :  { %v5560_v54 = vpop.eup %5559 }
 0x6f1   :  { %v3520_v39 = vmul.f32 %v5560_v54, %v3515_v37  ;;  %v6606_v37 = vld [vmem:[#allocation4 + $0xa0] ss:$16 sps:$4 sm:$0xff]   ;;  %v6608_v54 = vld [vmem:[#allocation4 + $0xa8] ss:$16 sps:$4 sm:$0xff]  }
 0x6f2   :  { %6928 = vst [vmem:[#allocation34_spill] sm:$0xff] %v6606_v37 }
 0x6f3   :  { %v3521_v41 = vpack.c.bf16 %v3520_v39, %v3520_v39  ;;  %v6612_v39 = vld [vmem:[#allocation4 + $0xc4] ss:$16 sps:$4 sm:$0xff]  }
 0x6f5   :  { %5075 = vst [vmem:[%s6735_s4 + $0x14] sm:$0xf] %v3521_v41  ;;  %3783 = vmatmul.mubr.bf16.vlgmr.msra.gmra.mrb[48].mxu0 %v3521_v41  ;;  %3824 = vmatmul.mubr.bf16.vlgmr.msra.gmra.mrb[48].mxu1 %v3521_v41  ;;  %v6614_v41 = vld [vmem:[#allocation4 + $0xcc] ss:$16 sps:$4 sm:$0xff]  }
 0x6f6   :  { %3993 = vmatpush1.bf16.msra.mxu0 %v6543_v40  ;;  %4034 = vmatpush1.bf16.msra.mxu1 %v6545_v0  ;;  %6929 = vst [vmem:[#allocation35_spill] sm:$0xff] %v6614_v41 }
 0x6f7   :  { %3994 = vmatprep.subr.bf16.mxu0 %v6547_v42  ;;  %4035 = vmatprep.subr.bf16.mxu1 %v6549_v43 }
 0x6f8   :  { %4024 = vmatprep.mubr.bf16.mxu0 %v6838_v63  ;;  %4065 = vmatprep.mubr.bf16.mxu1 %v6838_v63 }
 0x6fa   :  { %3995 = vmatpush1.bf16.msra.mxu0 %v6556_v38  ;;  %4036 = vmatpush1.bf16.msra.mxu1 %v6558_v15 }
 0x6fb   :  { %3996 = vmatprep.subr.bf16.mxu0 %v6562_v55  ;;  %4037 = vmatprep.subr.bf16.mxu1 %v6564_v48 }
 0x6fe   :  { %3997 = vmatpush1.bf16.msra.mxu0 %v6570_v59  ;;  %4038 = vmatpush1.bf16.msra.mxu1 %v6572_v52 }
 0x6ff   :  { %3998 = vmatprep.subr.bf16.mxu0 %v6576_v62  ;;  %4039 = vmatprep.subr.bf16.mxu1 %v6578_v51 }
 0x702   :  { %3999 = vmatpush1.bf16.msra.mxu0 %v6582_v50  ;;  %4040 = vmatpush1.bf16.msra.mxu1 %v6584_v9 }
 0x703   :  { %4000 = vmatprep.subr.bf16.mxu0 %v6588_v53  ;;  %4041 = vmatprep.subr.bf16.mxu1 %v6590_v28  ;;  %v6618_v28 = vld [vmem:[#allocation4 + $0xc0] ss:$16 sps:$4 sm:$0xff]  }
 0x706   :  { %4001 = vmatpush1.bf16.msra.mxu0 %v6594_v21  ;;  %4042 = vmatpush1.bf16.msra.mxu1 %v6596_v33  ;;  %v6620_v21 = vld [vmem:[#allocation4 + $0xc8] ss:$16 sps:$4 sm:$0xff]   ;;  %v6624_v33 = vld [vmem:[#allocation4 + $0xe4] ss:$16 sps:$4 sm:$0xff]  }
 0x707   :  { %4002 = vmatprep.subr.bf16.mxu0 %v6600_v26  ;;  %4043 = vmatprep.subr.bf16.mxu1 %v6602_v11  ;;  %v6626_v26 = vld [vmem:[#allocation4 + $0xec] ss:$16 sps:$4 sm:$0xff]   ;;  %v6630_v11 = vld [vmem:[#allocation4 + $0xe0] ss:$16 sps:$4 sm:$0xff]  }
 0x70a   :  { %4003 = vmatpush1.bf16.msra.mxu0 %v6606_v37  ;;  %4044 = vmatpush1.bf16.msra.mxu1 %v6608_v54  ;;  %v6632_v37 = vld [vmem:[#allocation4 + $0xe8] ss:$16 sps:$4 sm:$0xff]  }
 0x70b   :  { %4004 = vmatprep.subr.bf16.mxu0 %v6612_v39  ;;  %4045 = vmatprep.subr.bf16.mxu1 %v6614_v41  ;;  %v5076_v41 = vld [vmem:[%s6731_s0 + $0x18] sm:$0xf] }
 0x70e   :  { %4005 = vmatpush1.bf16.msra.mxu0 %v6618_v28  ;;  %4046 = vmatpush1.bf16.msra.mxu1 %v6620_v21 }
 0x70f   :  { %4006 = vmatprep.subr.bf16.mxu0 %v6624_v33  ;;  %4047 = vmatprep.subr.bf16.mxu1 %v6626_v26 }
 0x712   :  { %4007 = vmatpush1.bf16.msra.mxu0 %v6630_v11  ;;  %4048 = vmatpush1.bf16.msra.mxu1 %v6632_v37 }
 0x713   :  { %4325 = vmatprep.subr.bf16.mxu0 %v6433_v7  ;;  %4366 = vmatprep.subr.bf16.mxu1 %v6435_v24 }
 0x715   :  { %4025 = vmatmul.mubr.bf16.vlgmr.msra.gmra.mrb[52].mxu0 %v5076_v41  ;;  %4066 = vmatmul.mubr.bf16.vlgmr.msra.gmra.mrb[52].mxu1 %v5076_v41 }
 0x716   :  { %4326 = vmatpush1.bf16.msra.mxu0 %v6437_v17  ;;  %4367 = vmatpush1.bf16.msra.mxu1 %v6439_v6 }
 0x717   :  { %4327 = vmatprep.subr.bf16.mxu0 %v6445_v36  ;;  %4368 = vmatprep.subr.bf16.mxu1 %v6447_v12 }
 0x718   :  { %4357 = vmatprep.mubr.bf16.mxu0 %v6838_v63  ;;  %4398 = vmatprep.mubr.bf16.mxu1 %v6838_v63 }
 0x71a   :  { %4328 = vmatpush1.bf16.msra.mxu0 %v6449_v34  ;;  %4369 = vmatpush1.bf16.msra.mxu1 %v6451_v57 }
 0x71b   :  { %4329 = vmatprep.subr.bf16.mxu0 %v6457_v14  ;;  %4370 = vmatprep.subr.bf16.mxu1 %v6459_v10 }
 0x71e   :  { %4330 = vmatpush1.bf16.msra.mxu0 %v6461_v31  ;;  %4371 = vmatpush1.bf16.msra.mxu1 %v6463_v23 }
 0x71f   :  { %4331 = vmatprep.subr.bf16.mxu0 %v6469_v27  ;;  %4372 = vmatprep.subr.bf16.mxu1 %v6471_v16 }
 0x722   :  { %4332 = vmatpush1.bf16.msra.mxu0 %v6473_v22  ;;  %4373 = vmatpush1.bf16.msra.mxu1 %v6475_v20 }
 0x723   :  { %4333 = vmatprep.subr.bf16.mxu0 %v6481_v2  ;;  %4374 = vmatprep.subr.bf16.mxu1 %v6483_v1 }
 0x726   :  { %4334 = vmatpush1.bf16.msra.mxu0 %v6485_v3  ;;  %4375 = vmatpush1.bf16.msra.mxu1 %v6487_v5 }
 0x727   :  { %4335 = vmatprep.subr.bf16.mxu0 %v6495_v19  ;;  %4376 = vmatprep.subr.bf16.mxu1 %v6499_v32 }
 0x72a   :  { %4336 = vmatpush1.bf16.msra.mxu0 %v6493_v4  ;;  %4377 = vmatpush1.bf16.msra.mxu1 %v6497_v49 }
 0x72b   :  { %4337 = vmatprep.subr.bf16.mxu0 %v6501_v8  ;;  %4378 = vmatprep.subr.bf16.mxu1 %v6504_v56 }
 0x72e   :  { %4338 = vmatpush1.bf16.msra.mxu0 %v6509_v35  ;;  %4379 = vmatpush1.bf16.msra.mxu1 %v6511_v60 }
 0x72f   :  { %4339 = vmatprep.subr.bf16.mxu0 %v6515_v58  ;;  %4380 = vmatprep.subr.bf16.mxu1 %v6517_v61 }
 0x732   :  { %4340 = vmatpush1.bf16.msra.mxu0 %v6521_v44  ;;  %4381 = vmatpush1.bf16.msra.mxu1 %v6523_v45 }
 0x733   :  { %4567 = vmatprep.subr.bf16.mxu0 %v6527_v46  ;;  %4608 = vmatprep.subr.bf16.mxu1 %v6529_v47 }
 0x7c8   :  { %v3784_v7 = vpop.f32.mrb[48].mxu0  ;;  %v3825_v24 = vpop.f32.mrb[48].mxu1 }
 0x7c9   :  { %v3786_v17 = vpop.f32.mrb[49].mxu0  ;;  %v3827_v6 = vpop.f32.mrb[49].mxu1 }
 0x7ca   :  { %v3788_v36 = vpop.f32.mrb[50].mxu0  ;;  %v3829_v12 = vpop.f32.mrb[50].mxu1 }
 0x7cb   :  { %v3789_v34 = vpop.f32.mrb[51].mxu0  ;;  %v3830_v57 = vpop.f32.mrb[51].mxu1 }
 0x7e8   :  { %v4026_v14 = vpop.f32.mrb[52].mxu0  ;;  %v4067_v10 = vpop.f32.mrb[52].mxu1 }
 0x7e9   :  { %v4027_v31 = vadd.f32 %v4026_v14, %v3784_v7  ;;  %v4068_v23 = vadd.f32 %v4067_v10, %v3825_v24  ;;  %v4028_v27 = vpop.f32.mrb[53].mxu0  ;;  %v4069_v16 = vpop.f32.mrb[53].mxu1 }
 0x7ea   :  { %v4029_v22 = vadd.f32 %v4028_v27, %v3786_v17  ;;  %v4070_v20 = vadd.f32 %v4069_v16, %v3827_v6  ;;  %v4030_v2 = vpop.f32.mrb[54].mxu0  ;;  %v4071_v1 = vpop.f32.mrb[54].mxu1 }
 0x7eb   :  { %v4074_v3 = vadd.f32 %v4027_v31, %v5922_v30  ;;  %v4031_v5 = vpop.f32.mrb[55].mxu0  ;;  %v4072_v4 = vpop.f32.mrb[55].mxu1  ;;  %v4076_v8 = vadd.f32 %v4068_v23, %v5927_v13 }
 0x7ec   :  { %v4075_v19 = vadd.f32 %v4029_v22, %v5924_v18  ;;  %v4077_v56 = vadd.f32 %v4070_v20, %v5931_v25 }
 0x7ed   :  { %v4078_v49 = vmul.f32 0.5, %v4074_v3 }
 0x7ee   :  { %v4082_v32 = vmul.f32 0.5, %v4075_v19  ;;  %v4087_v35 = vmul.f32 0.5, %v4077_v56 }
 0x7ef   :  { %5561 = vtanh.f32 %v4078_v49 }
 0x7f0   :  { %5563 = vtanh.f32 %v4082_v32 }
 0x7f1   :  { %5565 = vtanh.f32 %v4076_v8 }
 0x7f2   :  { %5567 = vtanh.f32 %v4087_v35 }
 0x7f9   :  { %v5562_v60 = vpop.eup %5561 }
 0x7fa   :  { %v5564_v58 = vpop.eup %5563  ;;  %v4080_v61 = vmul.f32 0.5, %v5562_v60 }
 0x7fb   :  { %v4084_v44 = vmul.f32 0.5, %v5564_v58  ;;  %v5566_v46 = vpop.eup %5565 }
 0x7fc   :  { %v4081_v45 = vadd.f32 0.5, %v4080_v61  ;;  %v5568_v17 = vpop.eup %5567 }
 0x7fd   :  { %v4085_v47 = vadd.f32 0.5, %v4084_v44  ;;  %v4089_v6 = vmul.f32 0.5, %v5568_v17 }
 0x7fe   :  { %v4092_v41 = vmul.f32 %v5566_v46, %v4081_v45 }
 0x7ff   :  { %v4091_v7 = vmul.f32 %v4085_v47, %v6540_v29  ;;  %v4090_v36 = vadd.f32 0.5, %v4089_v6  ;;  %v6931_v29 = vld [vmem:[#allocation30_spill] sm:$0xff] }
 0x801   :  { %v6682_v24 = vadd.f32 %v4092_v41, %v4091_v7 }
 0x803   :  { %5569 = vtanh.f32 %v6682_v24 }
 0x80d   :  { %v5570_v12 = vpop.eup %5569 }
 0x80e   :  { %v4095_v34 = vmul.f32 %v5570_v12, %v4090_v36 }
 0x810   :  { %v4096_v57 = vpack.c.bf16 %v4095_v34, %v4095_v34 }
 0x812   :  { %5141 = vst [vmem:[%s6735_s4 + $0x18] sm:$0xf] %v4096_v57  ;;  %4358 = vmatmul.mubr.bf16.vlgmr.msra.gmra.mrb[56].mxu0 %v4096_v57  ;;  %4399 = vmatmul.mubr.bf16.vlgmr.msra.gmra.mrb[56].mxu1 %v4096_v57 }
 0x813   :  { %4568 = vmatpush1.bf16.msra.mxu0 %v6543_v40  ;;  %4609 = vmatpush1.bf16.msra.mxu1 %v6545_v0  ;;  %v6932_v40 = vld [vmem:[#allocation31_spill] sm:$0xff]  ;;  %v6933_v0 = vld [vmem:[#allocation32_spill] sm:$0xff] }
 0x814   :  { %4569 = vmatprep.subr.bf16.mxu0 %v6547_v42  ;;  %4610 = vmatprep.subr.bf16.mxu1 %v6549_v43  ;;  %v6934_v42 = vld [vmem:[#allocation33_spill] sm:$0xff]  ;;  %v6935_v43 = vld [vmem:[#allocation34_spill] sm:$0xff] }
 0x815   :  { %4599 = vmatprep.mubr.bf16.mxu0 %v6838_v63  ;;  %4640 = vmatprep.mubr.bf16.mxu1 %v6838_v63  ;;  %v6930_v63 = vld [vmem:[#allocation29_spill] sm:$0xff] }
 0x817   :  { %4570 = vmatpush1.bf16.msra.mxu0 %v6556_v38  ;;  %4611 = vmatpush1.bf16.msra.mxu1 %v6558_v15  ;;  %v6936_v38 = vld [vmem:[#allocation35_spill] sm:$0xff]  ;;  %v5142_v15 = vld [vmem:[%s6731_s0 + $0x1c] sm:$0xf] }
 0x818   :  { %4571 = vmatprep.subr.bf16.mxu0 %v6562_v55  ;;  %4612 = vmatprep.subr.bf16.mxu1 %v6564_v48 }
 0x81b   :  { %4572 = vmatpush1.bf16.msra.mxu0 %v6570_v59  ;;  %4613 = vmatpush1.bf16.msra.mxu1 %v6572_v52 }
 0x81c   :  { %4573 = vmatprep.subr.bf16.mxu0 %v6576_v62  ;;  %4614 = vmatprep.subr.bf16.mxu1 %v6578_v51 }
 0x81f   :  { %4574 = vmatpush1.bf16.msra.mxu0 %v6582_v50  ;;  %4615 = vmatpush1.bf16.msra.mxu1 %v6584_v9 }
 0x820   :  { %4575 = vmatprep.subr.bf16.mxu0 %v6588_v53  ;;  %4616 = vmatprep.subr.bf16.mxu1 %v6930_v63 }
 0x823   :  { %4576 = vmatpush1.bf16.msra.mxu0 %v6931_v29  ;;  %4617 = vmatpush1.bf16.msra.mxu1 %v6932_v40 }
 0x824   :  { %4577 = vmatprep.subr.bf16.mxu0 %v6933_v0  ;;  %4618 = vmatprep.subr.bf16.mxu1 %v6934_v42 }
 0x827   :  { %4578 = vmatpush1.bf16.msra.mxu0 %v6935_v43  ;;  %4619 = vmatpush1.bf16.msra.mxu1 %v6608_v54 }
 0x828   :  { %4579 = vmatprep.subr.bf16.mxu0 %v6612_v39  ;;  %4620 = vmatprep.subr.bf16.mxu1 %v6936_v38 }
 0x82b   :  { %4580 = vmatpush1.bf16.msra.mxu0 %v6618_v28  ;;  %4621 = vmatpush1.bf16.msra.mxu1 %v6620_v21 }
 0x82c   :  { %4581 = vmatprep.subr.bf16.mxu0 %v6624_v33  ;;  %4622 = vmatprep.subr.bf16.mxu1 %v6626_v26 }
 0x82f   :  { %4582 = vmatpush1.bf16.msra.mxu0 %v6630_v11  ;;  %4623 = vmatpush1.bf16.msra.mxu1 %v6632_v37 }
 0x832   :  { %4600 = vmatmul.mubr.bf16.vlgmr.msra.gmra.mrb[60].mxu0 %v5142_v15  ;;  %4641 = vmatmul.mubr.bf16.vlgmr.msra.gmra.mrb[60].mxu1 %v5142_v15 }
 0x8e5   :  { %v4359_v55 = vpop.f32.mrb[56].mxu0  ;;  %v4400_v48 = vpop.f32.mrb[56].mxu1 }
 0x8e6   :  { %v4361_v59 = vpop.f32.mrb[57].mxu0  ;;  %v4402_v52 = vpop.f32.mrb[57].mxu1 }
 0x8e7   :  { %v4363_v62 = vpop.f32.mrb[58].mxu0  ;;  %v4404_v51 = vpop.f32.mrb[58].mxu1 }
 0x8e8   :  { %v4364_v50 = vpop.f32.mrb[59].mxu0  ;;  %v4405_v9 = vpop.f32.mrb[59].mxu1 }
 0x905   :  { %v4601_v53 = vpop.f32.mrb[60].mxu0  ;;  %v4642_v28 = vpop.f32.mrb[60].mxu1 }
 0x906   :  { %v4602_v21 = vadd.f32 %v4601_v53, %v4359_v55  ;;  %v4643_v33 = vadd.f32 %v4642_v28, %v4400_v48  ;;  %v4603_v26 = vpop.f32.mrb[61].mxu0  ;;  %v4644_v11 = vpop.f32.mrb[61].mxu1 }
 0x907   :  { %v4604_v37 = vadd.f32 %v4603_v26, %v4361_v59  ;;  %v4645_v54 = vadd.f32 %v4644_v11, %v4402_v52  ;;  %v4605_v39 = vpop.f32.mrb[62].mxu0  ;;  %v4646_v14 = vpop.f32.mrb[62].mxu1 }
 0x908   :  { %v4649_v10 = vadd.f32 %v4602_v21, %v5922_v30  ;;  %v4606_v31 = vpop.f32.mrb[63].mxu0  ;;  %v4647_v23 = vpop.f32.mrb[63].mxu1  ;;  %v4651_v20 = vadd.f32 %v4643_v33, %v5927_v13 }
 0x909   :  { %v4650_v27 = vadd.f32 %v4604_v37, %v5924_v18  ;;  %v4652_v2 = vadd.f32 %v4645_v54, %v5931_v25 }
 0x90a   :  { %v4653_v16 = vmul.f32 0.5, %v4649_v10 }
 0x90b   :  { %v4657_v22 = vmul.f32 0.5, %v4650_v27  ;;  %v4662_v1 = vmul.f32 0.5, %v4652_v2 }
 0x90c   :  { %5571 = vtanh.f32 %v4653_v16 }
 0x90d   :  { %5573 = vtanh.f32 %v4657_v22 }
 0x90e   :  { %5575 = vtanh.f32 %v4651_v20 }
 0x90f   :  { %5577 = vtanh.f32 %v4662_v1 }
 0x916   :  { %v5572_v3 = vpop.eup %5571 }
 0x917   :  { %v5574_v5 = vpop.eup %5573  ;;  %v4655_v4 = vmul.f32 0.5, %v5572_v3 }
 0x918   :  { %v4659_v19 = vmul.f32 0.5, %v5574_v5  ;;  %v5576_v49 = vpop.eup %5575 }
 0x919   :  { %v4656_v30 = vadd.f32 0.5, %v4655_v4  ;;  %v5578_v35 = vpop.eup %5577 }
 0x91a   :  { %v4660_v32 = vadd.f32 0.5, %v4659_v19  ;;  %v4664_v13 = vmul.f32 0.5, %v5578_v35 }
 0x91b   :  { %v4667_v8 = vmul.f32 %v5576_v49, %v4656_v30 }
 0x91c   :  { %v4666_v18 = vmul.f32 %v4660_v32, %v6682_v24  ;;  %v4665_v60 = vadd.f32 0.5, %v4664_v13 }
 0x91e   :  { %v4668_v56 = vadd.f32 %v4667_v8, %v4666_v18 }
 0x920   :  { %5579 = vtanh.f32 %v4668_v56 }
 0x92a   :  { %v5580_v58 = vpop.eup %5579 }
 0x92b   :  { %v4670_v61 = vmul.f32 %v5580_v58, %v4665_v60 }
 0x92d   :  { %v4671_v25 = vpack.c.bf16 %v4670_v61, %v4670_v61 }
 0x92f   :  { %5207 = vst [vmem:[%s6735_s4 + $0x1c] sm:$0xf] %v4671_v25  ;;  %4674 = vst [vmem:[#allocation2] sm:$0xf] %v4671_v25 }
 0x930   :  { %4680 = vsyncpa [#allocation5], 1 }
 0x931   :  { %4681 = vsyncpa [#allocation7], 1 }

</bundles_post_ra>
